<compile_context>
chip_gen: v6e
topology: v6e:2x2x1
jax: 0.10.0
libtpu: 0.0.40
codegen_flags: <defaults>
</compile_context>

<pallas_src>
import functools

import jax
import jax.numpy as jnp
from jax import lax
from jax.experimental import pallas as pl
from jax.experimental.pallas import tpu as pltpu

HIDDEN = 512
CLASS_NUM = 14
CLASS_PAD = 128          # pad classifier output to a full 128-lane register
LN_EPS = 1e-5
INV_SQRT2 = 0.7071067811865476
SQRT_2_OVER_PI = 0.7978845608028654


def _head_kernel(x_ref, w1_ref, b1_ref, gamma_ref, beta_ref, w2_ref, b2_ref,
                 out_ref, *, matmul_dtype, gelu_approx):
    bb, S, H = x_ref.shape

    # Flatten (BLOCK_B, S, H) -> (BLOCK_B*S, H): fills the MXU M dimension.
    # (Free relayout when S is a multiple of 8; S=8 here.)
    x = x_ref[...].reshape(bb * S, H)
    if x.dtype != matmul_dtype:
        x = x.astype(matmul_dtype)

    # dense_1: (BLOCK_B*S, H) @ (H, H) + b1.  Operands in matmul_dtype
    # (bf16 by default), accumulation in f32 on the MXU.
    h = jnp.dot(x, w1_ref[...], preferred_element_type=jnp.float32)
    h = h + b1_ref[...]                                 # broadcast (1, H)

    if gelu_approx:
        # tanh-approx GELU: tanh runs on the EUP slot (otherwise idle here),
        # keeping the VALU slot free for the LayerNorm math.
        inner = SQRT_2_OVER_PI * (h + 0.044715 * h * h * h)
        h = 0.5 * h * (1.0 + jnp.tanh(inner))
    else:
        # exact (erf-based) GELU, matching nn.GELU() default.
        h = 0.5 * h * (1.0 + lax.erf(h * INV_SQRT2))

    # One-pass LayerNorm over the hidden axis (biased variance, like torch):
    # var = E[h^2] - mu^2 -> saves a full (M, 512) pass and the xc temporary.
    mu = jnp.mean(h, axis=-1, keepdims=True)
    ms = jnp.mean(h * h, axis=-1, keepdims=True)
    var = ms - mu * mu
    h = (h - mu) * lax.rsqrt(var + LN_EPS)
    h = h * gamma_ref[...] + beta_ref[...]              # (BLOCK_B*S, H)

    # mean-pool over the sequence axis (torch.mean(dim=1)).
    pooled = jnp.mean(h.reshape(bb, S, H), axis=1)      # (BLOCK_B, H)

    # dropout / multi-dropout averaging -> identity at inference.

    # dense_2, batched: (BLOCK_B, H) @ (H, CLASS_PAD) + b2 (padded lanes,
    # sliced off outside the kernel).  Lane-dense (BLOCK_B, 128) output.
    logits = jnp.dot(pooled.astype(matmul_dtype), w2_ref[...],
                     preferred_element_type=jnp.float32) + b2_ref[...]
    out_ref[...] = logits                               # (BLOCK_B, CLASS_PAD)


def _num_tensorcores_per_chip():
    """Best-effort TensorCore count (2 on v7x, 1 on v5e/v6e)."""
    try:
        kind = jax.devices()[0].device_kind.lower()
    except Exception:
        return 1
    return 2 if "v7" in kind else 1


def _pick_block_b(B, S):
    """Batch rows per grid step.  Targets ~1024 MXU M-rows; splits into >=2
    steps only on multi-TensorCore chips; keeps block_b a multiple of 8 so
    the (block_b, 128) output block is a full (8,128) sublane tile."""
    m_target = 1024
    bb = max(1, m_target // max(S, 1))
    num_tc = _num_tensorcores_per_chip()
    if num_tc > 1 and B > 8:
        bb = min(bb, pl.cdiv(B, num_tc))    # give every TC some work on v7x
    if B >= 8:
        bb = max(8, min(bb, B))
        bb = (bb // 8) * 8                  # full sublane tile on the output
    else:
        bb = B                              # tiny batch: full-dim block
    return bb


@functools.partial(jax.jit,
                   static_argnames=("block_b", "use_bf16_matmul",
                                    "gelu_approx"))
def bert_head_forward(hidden_states, w1, b1, gamma, beta, w2, b2,
                      block_b=None, use_bf16_matmul=True, gelu_approx=True):
    """hidden_states: (B, S, 512) f32 or bf16 (pass the encoder output dtype
    straight through -- do NOT upcast).  w1: (512,512), b1/gamma/beta: (512,),
    w2: (512,14), b2: (14,).  Returns (B, 14) f32 logits."""
    B, S, H = hidden_states.shape
    assert H == HIDDEN
    # NOTE: the in-kernel (bb, S, H) -> (bb*S, H) reshape is only a free
    # relayout when S is a multiple of 8 (it is for any real BERT seq len).

    if block_b is None:
        block_b = _pick_block_b(B, S)
    n_blocks = pl.cdiv(B, block_b)          # trailing partial block is OK

    matmul_dtype = jnp.bfloat16 if use_bf16_matmul else jnp.float32

    # Pre-cast weights to the matmul dtype outside the kernel (no per-step
    # VPU cast, halved weight DMA / double-buffer when bf16).
    w1m = w1.astype(matmul_dtype)
    w2p = jnp.zeros((H, CLASS_PAD), matmul_dtype).at[:, :CLASS_NUM].set(
        w2.astype(matmul_dtype))
    # Biases / LN params stay f32 (added after f32 accumulation).
    b1r = b1.reshape(1, H).astype(jnp.float32)
    gammar = gamma.reshape(1, H).astype(jnp.float32)
    betar = beta.reshape(1, H).astype(jnp.float32)
    b2p = jnp.zeros((1, CLASS_PAD), jnp.float32).at[0, :CLASS_NUM].set(
        b2.astype(jnp.float32))

    # Advisory cost so XLA overlaps the surrounding graph with this head.
    flops = 2 * B * S * H * H + 2 * B * H * CLASS_PAD
    itemsize_x = jnp.dtype(hidden_states.dtype).itemsize
    itemsize_w = jnp.dtype(matmul_dtype).itemsize
    bytes_accessed = (B * S * H * itemsize_x
                      + H * H * itemsize_w + H * CLASS_PAD * itemsize_w
                      + 4 * H * 4 + CLASS_PAD * 4
                      + B * CLASS_PAD * 4)
    cost = pl.CostEstimate(flops=flops,
                           transcendentals=B * S * H,
                           bytes_accessed=bytes_accessed)

    out_padded = pl.pallas_call(
        functools.partial(_head_kernel, matmul_dtype=matmul_dtype,
                          gelu_approx=gelu_approx),
        out_shape=jax.ShapeDtypeStruct((B, CLASS_PAD), jnp.float32),
        grid_spec=pltpu.PrefetchScalarGridSpec(
            num_scalar_prefetch=0,
            grid=(n_blocks,),
            in_specs=[
                pl.BlockSpec((block_b, S, H), lambda b: (b, 0, 0)),   # x
                pl.BlockSpec((H, H), lambda b: (0, 0)),               # w1
                pl.BlockSpec((1, H), lambda b: (0, 0)),               # b1
                pl.BlockSpec((1, H), lambda b: (0, 0)),               # gamma
                pl.BlockSpec((1, H), lambda b: (0, 0)),               # beta
                pl.BlockSpec((H, CLASS_PAD), lambda b: (0, 0)),       # w2
                pl.BlockSpec((1, CLASS_PAD), lambda b: (0, 0)),       # b2
            ],
            out_specs=pl.BlockSpec((block_b, CLASS_PAD), lambda b: (b, 0)),
        ),
        compiler_params=pltpu.CompilerParams(
            dimension_semantics=("parallel",)),
        cost_estimate=cost,
    )(hidden_states, w1m, b1r, gammar, betar, w2p, b2p)

    return out_padded[:, :CLASS_NUM]                    # (B, 14)


def init_params(key):
    k1, k2, k3, k4 = jax.random.split(key, 4)
    # deterministic, torch-Linear-like uniform init
    bound1 = 1.0 / jnp.sqrt(HIDDEN)
    w1 = jax.random.uniform(k1, (HIDDEN, HIDDEN), jnp.float32,
                            -bound1, bound1)
    b1 = jax.random.uniform(k2, (HIDDEN,), jnp.float32, -bound1, bound1)
    gamma = jnp.ones((HIDDEN,), jnp.float32)
    beta = jnp.zeros((HIDDEN,), jnp.float32)
    w2 = jax.random.uniform(k3, (HIDDEN, CLASS_NUM), jnp.float32,
                            -bound1, bound1)
    b2 = jax.random.uniform(k4, (CLASS_NUM,), jnp.float32, -bound1, bound1)
    return w1, b1, gamma, beta, w2, b2


def reference_forward(hidden_states, w1, b1, gamma, beta, w2, b2):
    h = hidden_states.astype(jnp.float32) @ w1 + b1
    h = 0.5 * h * (1.0 + lax.erf(h * INV_SQRT2))        # exact GELU
    mu = jnp.mean(h, axis=-1, keepdims=True)
    var = jnp.mean((h - mu) ** 2, axis=-1, keepdims=True)
    h = (h - mu) / jnp.sqrt(var + LN_EPS) * gamma + beta
    pooled = jnp.mean(h, axis=1)
    return pooled @ w2 + b2


if __name__ == "__main__":
    key = jax.random.PRNGKey(0)
    kx, kp = jax.random.split(key)

    B, S = 16, 8
    # stand-in for the BERT encoder output (see TODO above)
    hidden_f32 = jax.random.normal(kx, (B, S, HIDDEN), jnp.float32)
    params = init_params(kp)

    ref = reference_forward(hidden_f32, *params)

    # Exact path: f32 MXU operands + erf GELU -> bit-tight parity check.
    out_exact = bert_head_forward(hidden_f32, *params,
                                  use_bf16_matmul=False, gelu_approx=False)
    out_exact = jax.block_until_ready(out_exact)
    assert out_exact.shape == (B, CLASS_NUM)
    assert jnp.allclose(out_exact, ref, atol=1e-4, rtol=1e-4), (
        f"exact max err {jnp.max(jnp.abs(out_exact - ref))}")

    # Default fast path: bf16 encoder output, bf16 MXU operands, tanh GELU.
    hidden_bf16 = hidden_f32.astype(jnp.bfloat16)
    out_fast = jax.block_until_ready(bert_head_forward(hidden_bf16, *params))
    assert out_fast.shape == (B, CLASS_NUM)
    assert jnp.max(jnp.abs(out_fast - ref)) < 7e-2, (
        f"fast max err {jnp.max(jnp.abs(out_fast - ref))}")

    # Ragged batch (partial trailing block path, no wrapper-side jnp.pad).
    out_odd = jax.block_until_ready(
        bert_head_forward(hidden_f32[:5], *params,
                          use_bf16_matmul=False, gelu_approx=False))
    assert jnp.allclose(out_odd, ref[:5], atol=1e-4, rtol=1e-4), (
        f"ragged max err {jnp.max(jnp.abs(out_odd - ref[:5]))}")

    print("KERNEL_OK")
</pallas_src>

<mosaic_0001>
module attributes {stable_mosaic.version = 11 : i64} {
  func.func @_head_kernel(%arg0: i32, %arg1: memref<16x8x512xf32, #tpu.memory_space<vmem>>, %arg2: memref<512x512xf32, #tpu.memory_space<vmem>>, %arg3: memref<1x512xf32, #tpu.memory_space<vmem>>, %arg4: memref<1x512xf32, #tpu.memory_space<vmem>>, %arg5: memref<1x512xf32, #tpu.memory_space<vmem>>, %arg6: memref<512x128xf32, #tpu.memory_space<vmem>>, %arg7: memref<1x128xf32, #tpu.memory_space<vmem>>, %arg8: memref<16x128xf32, #tpu.memory_space<vmem>>) attributes {dimension_semantics = [#tpu.dimension_semantics<parallel>], iteration_bounds = array<i64: 1>, scalar_prefetch = 0 : i64, scratch_operands = 0 : i64, tpu.core_type = #tpu.core_type<tc>, window_params = [{transform_indices = @transform_0, window_bounds = array<i64: 16, 8, 512>}, {pipeline_mode = #tpu.pipeline_mode<synchronous>, transform_indices = @transform_1, window_bounds = array<i64: 512, 512>}, {pipeline_mode = #tpu.pipeline_mode<synchronous>, transform_indices = @transform_2, window_bounds = array<i64: 1, 512>}, {pipeline_mode = #tpu.pipeline_mode<synchronous>, transform_indices = @transform_3, window_bounds = array<i64: 1, 512>}, {pipeline_mode = #tpu.pipeline_mode<synchronous>, transform_indices = @transform_4, window_bounds = array<i64: 1, 512>}, {pipeline_mode = #tpu.pipeline_mode<synchronous>, transform_indices = @transform_5, window_bounds = array<i64: 512, 128>}, {pipeline_mode = #tpu.pipeline_mode<synchronous>, transform_indices = @transform_6, window_bounds = array<i64: 1, 128>}, {transform_indices = @transform_7, window_bounds = array<i64: 16, 128>}]} {
    %c0 = arith.constant 0 : index
    %c0_0 = arith.constant 0 : index
    %c0_1 = arith.constant 0 : index
    %0 = vector.load %arg1[%c0, %c0_0, %c0_1] : memref<16x8x512xf32, #tpu.memory_space<vmem>>, vector<16x8x512xf32>
    %1 = vector.shape_cast %0 : vector<16x8x512xf32> to vector<128x512xf32>
    %c0_2 = arith.constant 0 : index
    %c0_3 = arith.constant 0 : index
    %2 = vector.load %arg2[%c0_2, %c0_3] : memref<512x512xf32, #tpu.memory_space<vmem>>, vector<512x512xf32>
    %cst = arith.constant dense<0.000000e+00> : vector<128x512xf32>
    %3 = tpu.matmul %1, %2, %cst {dimension_numbers = #tpu.dot_dimension_numbers<[1], [0], [0], [1], [0, 0, 1, 1], [], []>} : vector<128x512xf32>, vector<512x512xf32>, vector<128x512xf32> -> vector<128x512xf32>
    %c0_4 = arith.constant 0 : index
    %c0_5 = arith.constant 0 : index
    %4 = vector.load %arg3[%c0_4, %c0_5] : memref<1x512xf32, #tpu.memory_space<vmem>>, vector<1x512xf32>
    %5 = vector.broadcast %4 : vector<1x512xf32> to vector<128x512xf32>
    %6 = arith.addf %3, %5 : vector<128x512xf32>
    %cst_6 = arith.constant 5.000000e-01 : f32
    %7 = vector.broadcast %cst_6 : f32 to vector<128x512xf32>
    %8 = arith.mulf %7, %6 : vector<128x512xf32>
    %cst_7 = arith.constant 0.707106769 : f32
    %9 = vector.broadcast %cst_7 : f32 to vector<128x512xf32>
    %10 = arith.mulf %6, %9 : vector<128x512xf32>
    %11 = math.erf %10 : vector<128x512xf32>
    %cst_8 = arith.constant 1.000000e+00 : f32
    %12 = vector.broadcast %cst_8 : f32 to vector<128x512xf32>
    %13 = arith.addf %12, %11 : vector<128x512xf32>
    %14 = arith.mulf %8, %13 : vector<128x512xf32>
    %cst_9 = arith.constant dense<0.000000e+00> : vector<128xf32>
    %15 = vector.multi_reduction <add>, %14, %cst_9 [1] : vector<128x512xf32> to vector<128xf32>
    %16 = vector.shape_cast %15 : vector<128xf32> to vector<128x1xf32>
    %cst_10 = arith.constant 5.120000e+02 : f32
    %17 = vector.broadcast %cst_10 : f32 to vector<128x1xf32>
    %18 = arith.divf %16, %17 : vector<128x1xf32>
    %19 = arith.mulf %14, %14 : vector<128x512xf32>
    %cst_11 = arith.constant dense<0.000000e+00> : vector<128xf32>
    %20 = vector.multi_reduction <add>, %19, %cst_11 [1] : vector<128x512xf32> to vector<128xf32>
    %21 = vector.shape_cast %20 : vector<128xf32> to vector<128x1xf32>
    %cst_12 = arith.constant 5.120000e+02 : f32
    %22 = vector.broadcast %cst_12 : f32 to vector<128x1xf32>
    %23 = arith.divf %21, %22 : vector<128x1xf32>
    %24 = arith.mulf %18, %18 : vector<128x1xf32>
    %25 = arith.subf %23, %24 : vector<128x1xf32>
    %26 = vector.broadcast %18 : vector<128x1xf32> to vector<128x512xf32>
    %27 = arith.subf %14, %26 : vector<128x512xf32>
    %cst_13 = arith.constant 9.99999974E-6 : f32
    %28 = vector.broadcast %cst_13 : f32 to vector<128x1xf32>
    %29 = arith.addf %25, %28 : vector<128x1xf32>
    %30 = math.rsqrt %29 : vector<128x1xf32>
    %31 = vector.broadcast %30 : vector<128x1xf32> to vector<128x512xf32>
    %32 = arith.mulf %27, %31 : vector<128x512xf32>
    %c0_14 = arith.constant 0 : index
    %c0_15 = arith.constant 0 : index
    %33 = vector.load %arg4[%c0_14, %c0_15] : memref<1x512xf32, #tpu.memory_space<vmem>>, vector<1x512xf32>
    %34 = vector.broadcast %33 : vector<1x512xf32> to vector<128x512xf32>
    %35 = arith.mulf %32, %34 : vector<128x512xf32>
    %c0_16 = arith.constant 0 : index
    %c0_17 = arith.constant 0 : index
    %36 = vector.load %arg5[%c0_16, %c0_17] : memref<1x512xf32, #tpu.memory_space<vmem>>, vector<1x512xf32>
    %37 = vector.broadcast %36 : vector<1x512xf32> to vector<128x512xf32>
    %38 = arith.addf %35, %37 : vector<128x512xf32>
    %39 = vector.shape_cast %38 : vector<128x512xf32> to vector<16x8x512xf32>
    %cst_18 = arith.constant dense<0.000000e+00> : vector<16x512xf32>
    %40 = vector.multi_reduction <add>, %39, %cst_18 [1] : vector<16x8x512xf32> to vector<16x512xf32>
    %cst_19 = arith.constant 8.000000e+00 : f32
    %41 = vector.broadcast %cst_19 : f32 to vector<16x512xf32>
    %42 = arith.divf %40, %41 : vector<16x512xf32>
    %c0_20 = arith.constant 0 : index
    %c0_21 = arith.constant 0 : index
    %43 = vector.load %arg6[%c0_20, %c0_21] : memref<512x128xf32, #tpu.memory_space<vmem>>, vector<512x128xf32>
    %cst_22 = arith.constant dense<0.000000e+00> : vector<16x128xf32>
    %44 = tpu.matmul %42, %43, %cst_22 {dimension_numbers = #tpu.dot_dimension_numbers<[1], [0], [0], [1], [0, 0, 1, 1], [], []>} : vector<16x512xf32>, vector<512x128xf32>, vector<16x128xf32> -> vector<16x128xf32>
    %c0_23 = arith.constant 0 : index
    %c0_24 = arith.constant 0 : index
    %45 = vector.load %arg7[%c0_23, %c0_24] : memref<1x128xf32, #tpu.memory_space<vmem>>, vector<1x128xf32>
    %46 = vector.broadcast %45 : vector<1x128xf32> to vector<16x128xf32>
    %47 = arith.addf %44, %46 : vector<16x128xf32>
    %c0_25 = arith.constant 0 : index
    %c0_26 = arith.constant 0 : index
    %48 = vector.load %arg8[%c0_25, %c0_26] : memref<16x128xf32, #tpu.memory_space<vmem>>, vector<16x128xf32>
    tpu.vector_store %arg8[%c0_25, %c0_26], %47 {strides = array<i32>} : memref<16x128xf32, #tpu.memory_space<vmem>>, vector<16x128xf32>,
    return
  }
  func.func @transform_0(%arg0: i32) -> (i32, i32, i32) {
    %c0_i32 = arith.constant 0 : i32
    %c0_i32_0 = arith.constant 0 : i32
    %c0_i32_1 = arith.constant 0 : i32
    return %arg0, %c0_i32, %c0_i32_0 : i32, i32, i32
  }
  func.func @transform_1(%arg0: i32) -> (i32, i32) {
    %c0_i32 = arith.constant 0 : i32
    %c0_i32_0 = arith.constant 0 : i32
    %c0_i32_1 = arith.constant 0 : i32
    return %c0_i32, %c0_i32_0 : i32, i32
  }
  func.func @transform_2(%arg0: i32) -> (i32, i32) {
    %c0_i32 = arith.constant 0 : i32
    %c0_i32_0 = arith.constant 0 : i32
    %c0_i32_1 = arith.constant 0 : i32
    return %c0_i32, %c0_i32_0 : i32, i32
  }
  func.func @transform_3(%arg0: i32) -> (i32, i32) {
    %c0_i32 = arith.constant 0 : i32
    %c0_i32_0 = arith.constant 0 : i32
    %c0_i32_1 = arith.constant 0 : i32
    return %c0_i32, %c0_i32_0 : i32, i32
  }
  func.func @transform_4(%arg0: i32) -> (i32, i32) {
    %c0_i32 = arith.constant 0 : i32
    %c0_i32_0 = arith.constant 0 : i32
    %c0_i32_1 = arith.constant 0 : i32
    return %c0_i32, %c0_i32_0 : i32, i32
  }
  func.func @transform_5(%arg0: i32) -> (i32, i32) {
    %c0_i32 = arith.constant 0 : i32
    %c0_i32_0 = arith.constant 0 : i32
    %c0_i32_1 = arith.constant 0 : i32
    return %c0_i32, %c0_i32_0 : i32, i32
  }
  func.func @transform_6(%arg0: i32) -> (i32, i32) {
    %c0_i32 = arith.constant 0 : i32
    %c0_i32_0 = arith.constant 0 : i32
    %c0_i32_1 = arith.constant 0 : i32
    return %c0_i32, %c0_i32_0 : i32, i32
  }
  func.func @transform_7(%arg0: i32) -> (i32, i32) {
    %c0_i32 = arith.constant 0 : i32
    %c0_i32_0 = arith.constant 0 : i32
    return %arg0, %c0_i32 : i32, i32
  }
}

</mosaic_0001>

<bundles_post_ra>
// kernel: bert_head_forward.1
= control target key start
LH: loop header
LB: loop body
LE: loop exit
PB: predicated region body
PF: predicated region fallthrough
CT: control target
= control target key end

     0   :  { %s6091_s0 = inlined_call_operand.vmem [shape: f32[16,8,512], index: 0, kind: input, shape index: {}]   ;;  %s6092_s1 = inlined_call_operand.vmem [shape: f32[512,512], index: 1, kind: input, shape index: {}]   ;;  %s6093_s2 = inlined_call_operand.vmem [shape: f32[1,512], index: 2, kind: input, shape index: {}]   ;;  %s6094_s3 = inlined_call_operand.vmem [shape: f32[1,512], index: 3, kind: input, shape index: {}]   ;;  %s6095_s4 = inlined_call_operand.vmem [shape: f32[1,512], index: 4, kind: input, shape index: {}]   ;;  %s6096_s5 = inlined_call_operand.vmem [shape: f32[512,128], index: 5, kind: input, shape index: {}]   ;;  %s6097_s6 = inlined_call_operand.vmem [shape: f32[1,128], index: 6, kind: input, shape index: {}]   ;;  %s6098_s7 = inlined_call_operand.hbm [shape: f32[16,128], index: 7, kind: output, shape index: {}]  }
   0x1   :  { %v152_v0 = vld [vmem:[%s6092_s1 + $0x1e8] sm:$0xff]  ;;  %v151_v1 = vld [vmem:[%s6092_s1 + $0x1e0] sm:$0xff] }
   0x2   :  { %v280_v2 = vld [vmem:[%s6092_s1 + $0x5e8] sm:$0xff]  ;;  %369 = vmatprep.subr.mxu0 %v152_v0  ;;  %v279_v4 = vld [vmem:[%s6092_s1 + $0x5e0] sm:$0xff] }
   0x3   :  { %530 = vmatprep.subr.mxu1 %v280_v2  ;;  %v148_v3 = vld [vmem:[%s6092_s1 + $0x1c8] sm:$0xff]  ;;  %v147_v5 = vld [vmem:[%s6092_s1 + $0x1c0] sm:$0xff]  ;;  %370 = vmatpush1.msra.mxu0 %v151_v1 }
   0x4   :  { %531 = vmatpush1.msra.mxu1 %v279_v4  ;;  %v276_v6 = vld [vmem:[%s6092_s1 + $0x5c8] sm:$0xff]  ;;  %v275_v8 = vld [vmem:[%s6092_s1 + $0x5c0] sm:$0xff]  ;;  %371 = vmatprep.subr.mxu0 %v148_v3 }
   0x5   :  { %v144_v7 = vld [vmem:[%s6092_s1 + $0x1a8] sm:$0xff]  ;;  %532 = vmatprep.subr.mxu1 %v276_v6  ;;  %v143_v9 = vld [vmem:[%s6092_s1 + $0x1a0] sm:$0xff]  ;;  %372 = vmatpush1.msra.mxu0 %v147_v5 }
   0x6   :  { %v272_v10 = vld [vmem:[%s6092_s1 + $0x5a8] sm:$0xff]  ;;  %533 = vmatpush1.msra.mxu1 %v275_v8  ;;  %v271_v12 = vld [vmem:[%s6092_s1 + $0x5a0] sm:$0xff]  ;;  %373 = vmatprep.subr.mxu0 %v144_v7 }
   0x7   :  { %v140_v11 = vld [vmem:[%s6092_s1 + $0x188] sm:$0xff]  ;;  %534 = vmatprep.subr.mxu1 %v272_v10  ;;  %v139_v14 = vld [vmem:[%s6092_s1 + $0x180] sm:$0xff]  ;;  %374 = vmatpush1.msra.mxu0 %v143_v9 }
   0x8   :  { %v268_v13 = vld [vmem:[%s6092_s1 + $0x588] sm:$0xff]  ;;  %v267_v15 = vld [vmem:[%s6092_s1 + $0x580] sm:$0xff]  ;;  %535 = vmatpush1.msra.mxu1 %v271_v12  ;;  %375 = vmatprep.subr.mxu0 %v140_v11 }
   0x9   :  { %v136_v16 = vld [vmem:[%s6092_s1 + $0x168] sm:$0xff]  ;;  %536 = vmatprep.subr.mxu1 %v268_v13  ;;  %v135_v18 = vld [vmem:[%s6092_s1 + $0x160] sm:$0xff]  ;;  %376 = vmatpush1.msra.mxu0 %v139_v14 }
   0xa   :  { %v264_v17 = vld [vmem:[%s6092_s1 + $0x568] sm:$0xff]  ;;  %v263_v19 = vld [vmem:[%s6092_s1 + $0x560] sm:$0xff]  ;;  %537 = vmatpush1.msra.mxu1 %v267_v15  ;;  %377 = vmatprep.subr.mxu0 %v136_v16 }
   0xb   :  { %v132_v20 = vld [vmem:[%s6092_s1 + $0x148] sm:$0xff]  ;;  %538 = vmatprep.subr.mxu1 %v264_v17  ;;  %v131_v22 = vld [vmem:[%s6092_s1 + $0x140] sm:$0xff]  ;;  %378 = vmatpush1.msra.mxu0 %v135_v18 }
   0xc   :  { %v260_v21 = vld [vmem:[%s6092_s1 + $0x548] sm:$0xff]  ;;  %v259_v23 = vld [vmem:[%s6092_s1 + $0x540] sm:$0xff]  ;;  %539 = vmatpush1.msra.mxu1 %v263_v19  ;;  %379 = vmatprep.subr.mxu0 %v132_v20 }
   0xd   :  { %v128_v24 = vld [vmem:[%s6092_s1 + $0x128] sm:$0xff]  ;;  %540 = vmatprep.subr.mxu1 %v260_v21  ;;  %v127_v26 = vld [vmem:[%s6092_s1 + $0x120] sm:$0xff]  ;;  %380 = vmatpush1.msra.mxu0 %v131_v22 }
   0xe   :  { %v256_v25 = vld [vmem:[%s6092_s1 + $0x528] sm:$0xff]  ;;  %v255_v27 = vld [vmem:[%s6092_s1 + $0x520] sm:$0xff]  ;;  %541 = vmatpush1.msra.mxu1 %v259_v23  ;;  %381 = vmatprep.subr.mxu0 %v128_v24 }
   0xf   :  { %v124_v28 = vld [vmem:[%s6092_s1 + $0x108] sm:$0xff]  ;;  %542 = vmatprep.subr.mxu1 %v256_v25  ;;  %v123_v30 = vld [vmem:[%s6092_s1 + $0x100] sm:$0xff]  ;;  %382 = vmatpush1.msra.mxu0 %v127_v26 }
  0x10   :  { %v252_v29 = vld [vmem:[%s6092_s1 + $0x508] sm:$0xff]  ;;  %v251_v31 = vld [vmem:[%s6092_s1 + $0x500] sm:$0xff]  ;;  %543 = vmatpush1.msra.mxu1 %v255_v27  ;;  %383 = vmatprep.subr.mxu0 %v124_v28 }
  0x11   :  { %v120_v32 = vld [vmem:[%s6092_s1 + $0xe8] sm:$0xff]  ;;  %544 = vmatprep.subr.mxu1 %v252_v29  ;;  %v119_v34 = vld [vmem:[%s6092_s1 + $0xe0] sm:$0xff]  ;;  %384 = vmatpush1.msra.mxu0 %v123_v30 }
  0x12   :  { %v248_v33 = vld [vmem:[%s6092_s1 + $0x4e8] sm:$0xff]  ;;  %v247_v35 = vld [vmem:[%s6092_s1 + $0x4e0] sm:$0xff]  ;;  %545 = vmatpush1.msra.mxu1 %v251_v31  ;;  %385 = vmatprep.subr.mxu0 %v120_v32 }
  0x13   :  { %v116_v36 = vld [vmem:[%s6092_s1 + $0xc8] sm:$0xff]  ;;  %546 = vmatprep.subr.mxu1 %v248_v33  ;;  %v115_v38 = vld [vmem:[%s6092_s1 + $0xc0] sm:$0xff]  ;;  %386 = vmatpush1.msra.mxu0 %v119_v34 }
  0x14   :  { %v244_v37 = vld [vmem:[%s6092_s1 + $0x4c8] sm:$0xff]  ;;  %v243_v39 = vld [vmem:[%s6092_s1 + $0x4c0] sm:$0xff]  ;;  %547 = vmatpush1.msra.mxu1 %v247_v35  ;;  %387 = vmatprep.subr.mxu0 %v116_v36 }
  0x15   :  { %v112_v40 = vld [vmem:[%s6092_s1 + $0xa8] sm:$0xff]  ;;  %548 = vmatprep.subr.mxu1 %v244_v37  ;;  %v111_v42 = vld [vmem:[%s6092_s1 + $0xa0] sm:$0xff]  ;;  %388 = vmatpush1.msra.mxu0 %v115_v38 }
  0x16   :  { %v240_v41 = vld [vmem:[%s6092_s1 + $0x4a8] sm:$0xff]  ;;  %v239_v43 = vld [vmem:[%s6092_s1 + $0x4a0] sm:$0xff]  ;;  %549 = vmatpush1.msra.mxu1 %v243_v39  ;;  %389 = vmatprep.subr.mxu0 %v112_v40 }
  0x17   :  { %v108_v44 = vld [vmem:[%s6092_s1 + $0x88] sm:$0xff]  ;;  %550 = vmatprep.subr.mxu1 %v240_v41  ;;  %v107_v46 = vld [vmem:[%s6092_s1 + $0x80] sm:$0xff]  ;;  %390 = vmatpush1.msra.mxu0 %v111_v42 }
  0x18   :  { %v236_v45 = vld [vmem:[%s6092_s1 + $0x488] sm:$0xff]  ;;  %v235_v47 = vld [vmem:[%s6092_s1 + $0x480] sm:$0xff]  ;;  %551 = vmatpush1.msra.mxu1 %v239_v43  ;;  %391 = vmatprep.subr.mxu0 %v108_v44 }
  0x19   :  { %v104_v48 = vld [vmem:[%s6092_s1 + $0x68] sm:$0xff]  ;;  %552 = vmatprep.subr.mxu1 %v236_v45  ;;  %v103_v50 = vld [vmem:[%s6092_s1 + $0x60] sm:$0xff]  ;;  %392 = vmatpush1.msra.mxu0 %v107_v46 }
  0x1a   :  { %v232_v49 = vld [vmem:[%s6092_s1 + $0x468] sm:$0xff]  ;;  %v231_v51 = vld [vmem:[%s6092_s1 + $0x460] sm:$0xff]  ;;  %553 = vmatpush1.msra.mxu1 %v235_v47  ;;  %393 = vmatprep.subr.mxu0 %v104_v48 }
  0x1b   :  { %v100_v52 = vld [vmem:[%s6092_s1 + $0x48] sm:$0xff]  ;;  %554 = vmatprep.subr.mxu1 %v232_v49  ;;  %v99_v54 = vld [vmem:[%s6092_s1 + $0x40] sm:$0xff]  ;;  %394 = vmatpush1.msra.mxu0 %v103_v50 }
  0x1c   :  { %v228_v53 = vld [vmem:[%s6092_s1 + $0x448] sm:$0xff]  ;;  %v227_v55 = vld [vmem:[%s6092_s1 + $0x440] sm:$0xff]  ;;  %555 = vmatpush1.msra.mxu1 %v231_v51  ;;  %395 = vmatprep.subr.mxu0 %v100_v52 }
  0x1d   :  { %v96_v56 = vld [vmem:[%s6092_s1 + $0x28] sm:$0xff]  ;;  %556 = vmatprep.subr.mxu1 %v228_v53  ;;  %v95_v58 = vld [vmem:[%s6092_s1 + $0x20] sm:$0xff]  ;;  %396 = vmatpush1.msra.mxu0 %v99_v54 }
  0x1e   :  { %v224_v57 = vld [vmem:[%s6092_s1 + $0x428] sm:$0xff]  ;;  %v223_v59 = vld [vmem:[%s6092_s1 + $0x420] sm:$0xff]  ;;  %557 = vmatpush1.msra.mxu1 %v227_v55  ;;  %397 = vmatprep.subr.mxu0 %v96_v56 }
  0x1f   :  { %v92_v60 = vld [vmem:[%s6092_s1 + $0x8] sm:$0xff]  ;;  %558 = vmatprep.subr.mxu1 %v224_v57  ;;  %v91_v62 = vld [vmem:[%s6092_s1] sm:$0xff]  ;;  %398 = vmatpush1.msra.mxu0 %v95_v58 }
  0x20   :  { %v220_v61 = vld [vmem:[%s6092_s1 + $0x408] sm:$0xff]  ;;  %v219_v63 = vld [vmem:[%s6092_s1 + $0x400] sm:$0xff]  ;;  %559 = vmatpush1.msra.mxu1 %v223_v59  ;;  %399 = vmatprep.subr.mxu0 %v92_v60 }
  0x21   :  { %v216_v0 = vld [vmem:[%s6092_s1 + $0x3e8] sm:$0xff]  ;;  %560 = vmatprep.subr.mxu1 %v220_v61  ;;  %v215_v2 = vld [vmem:[%s6092_s1 + $0x3e0] sm:$0xff]  ;;  %400 = vmatpush1.msra.mxu0 %v91_v62 }
  0x22   :  { %v344_v1 = vld [vmem:[%s6092_s1 + $0x7e8] sm:$0xff]  ;;  %v343_v3 = vld [vmem:[%s6092_s1 + $0x7e0] sm:$0xff]  ;;  %561 = vmatpush1.msra.mxu1 %v219_v63  ;;  %401 = vmatprep.subr.mxu0 %v216_v0 }
  0x23   :  { %v212_v4 = vld [vmem:[%s6092_s1 + $0x3c8] sm:$0xff]  ;;  %562 = vmatprep.subr.mxu1 %v344_v1  ;;  %v211_v6 = vld [vmem:[%s6092_s1 + $0x3c0] sm:$0xff]  ;;  %402 = vmatpush2.msra.mxu0 %v215_v2  ;;  %v3480_v2 = vld [vmem:[%s6091_s0 + $0x18] sm:$0xff] }
  0x24   :  { %v340_v5 = vld [vmem:[%s6092_s1 + $0x7c8] sm:$0xff]  ;;  %v339_v7 = vld [vmem:[%s6092_s1 + $0x7c0] sm:$0xff]  ;;  %563 = vmatpush2.msra.mxu1 %v343_v3  ;;  %403 = vmatprep.subr.mxu0 %v212_v4  ;;  %v154_v3 = vld [vmem:[%s6092_s1 + $0x1f8] sm:$0xff] }
  0x25   :  { %v208_v8 = vld [vmem:[%s6092_s1 + $0x3a8] sm:$0xff]  ;;  %564 = vmatprep.subr.mxu1 %v340_v5  ;;  %v207_v10 = vld [vmem:[%s6092_s1 + $0x3a0] sm:$0xff]  ;;  %404 = vmatpush2.msra.mxu0 %v211_v6  ;;  %v3488_v4 = vld [vmem:[%s6091_s0 + $0x10] sm:$0xff] }
  0x26   :  { %v336_v9 = vld [vmem:[%s6092_s1 + $0x7a8] sm:$0xff]  ;;  %v335_v11 = vld [vmem:[%s6092_s1 + $0x7a0] sm:$0xff]  ;;  %565 = vmatpush2.msra.mxu1 %v339_v7  ;;  %405 = vmatprep.subr.mxu0 %v208_v8  ;;  %v153_v5 = vld [vmem:[%s6092_s1 + $0x1f0] sm:$0xff] }
  0x27   :  { %v204_v12 = vld [vmem:[%s6092_s1 + $0x388] sm:$0xff]  ;;  %566 = vmatprep.subr.mxu1 %v336_v9  ;;  %v203_v14 = vld [vmem:[%s6092_s1 + $0x380] sm:$0xff]  ;;  %406 = vmatpush2.msra.mxu0 %v207_v10  ;;  %v282_v6 = vld [vmem:[%s6092_s1 + $0x5f8] sm:$0xff] }
  0x28   :  { %v332_v13 = vld [vmem:[%s6092_s1 + $0x788] sm:$0xff]  ;;  %v331_v15 = vld [vmem:[%s6092_s1 + $0x780] sm:$0xff]  ;;  %567 = vmatpush2.msra.mxu1 %v335_v11  ;;  %407 = vmatprep.subr.mxu0 %v204_v12  ;;  %v150_v7 = vld [vmem:[%s6092_s1 + $0x1d8] sm:$0xff] }
  0x29   :  { %v200_v16 = vld [vmem:[%s6092_s1 + $0x368] sm:$0xff]  ;;  %568 = vmatprep.subr.mxu1 %v332_v13  ;;  %v199_v18 = vld [vmem:[%s6092_s1 + $0x360] sm:$0xff]  ;;  %408 = vmatpush2.msra.mxu0 %v203_v14  ;;  %v281_v8 = vld [vmem:[%s6092_s1 + $0x5f0] sm:$0xff] }
  0x2a   :  { %v328_v17 = vld [vmem:[%s6092_s1 + $0x768] sm:$0xff]  ;;  %v327_v19 = vld [vmem:[%s6092_s1 + $0x760] sm:$0xff]  ;;  %569 = vmatpush2.msra.mxu1 %v331_v15  ;;  %409 = vmatprep.subr.mxu0 %v200_v16  ;;  %v149_v10 = vld [vmem:[%s6092_s1 + $0x1d0] sm:$0xff] }
  0x2b   :  { %v196_v20 = vld [vmem:[%s6092_s1 + $0x348] sm:$0xff]  ;;  %570 = vmatprep.subr.mxu1 %v328_v17  ;;  %v195_v22 = vld [vmem:[%s6092_s1 + $0x340] sm:$0xff]  ;;  %410 = vmatpush2.msra.mxu0 %v199_v18  ;;  %v278_v11 = vld [vmem:[%s6092_s1 + $0x5d8] sm:$0xff] }
  0x2c   :  { %v324_v21 = vld [vmem:[%s6092_s1 + $0x748] sm:$0xff]  ;;  %v323_v23 = vld [vmem:[%s6092_s1 + $0x740] sm:$0xff]  ;;  %571 = vmatpush2.msra.mxu1 %v327_v19  ;;  %411 = vmatprep.subr.mxu0 %v196_v20  ;;  %v3524_v13 = vld [vmem:[%s6091_s0 + $0x38] sm:$0xff] }
  0x2d   :  { %v192_v24 = vld [vmem:[%s6092_s1 + $0x328] sm:$0xff]  ;;  %572 = vmatprep.subr.mxu1 %v324_v21  ;;  %v191_v26 = vld [vmem:[%s6092_s1 + $0x320] sm:$0xff]  ;;  %412 = vmatpush2.msra.mxu0 %v195_v22  ;;  %v146_v14 = vld [vmem:[%s6092_s1 + $0x1b8] sm:$0xff] }
  0x2e   :  { %v320_v25 = vld [vmem:[%s6092_s1 + $0x728] sm:$0xff]  ;;  %v319_v27 = vld [vmem:[%s6092_s1 + $0x720] sm:$0xff]  ;;  %573 = vmatpush2.msra.mxu1 %v323_v23  ;;  %413 = vmatprep.subr.mxu0 %v192_v24  ;;  %v277_v15 = vld [vmem:[%s6092_s1 + $0x5d0] sm:$0xff] }
  0x2f   :  { %v188_v28 = vld [vmem:[%s6092_s1 + $0x308] sm:$0xff]  ;;  %574 = vmatprep.subr.mxu1 %v320_v25  ;;  %v187_v30 = vld [vmem:[%s6092_s1 + $0x300] sm:$0xff]  ;;  %414 = vmatpush2.msra.mxu0 %v191_v26  ;;  %v3536_v16 = vld [vmem:[%s6091_s0 + $0x30] sm:$0xff] }
  0x30   :  { %v316_v29 = vld [vmem:[%s6092_s1 + $0x708] sm:$0xff]  ;;  %v315_v31 = vld [vmem:[%s6092_s1 + $0x700] sm:$0xff]  ;;  %575 = vmatpush2.msra.mxu1 %v319_v27  ;;  %415 = vmatprep.subr.mxu0 %v188_v28  ;;  %v145_v17 = vld [vmem:[%s6092_s1 + $0x1b0] sm:$0xff] }
  0x31   :  { %v184_v32 = vld [vmem:[%s6092_s1 + $0x2e8] sm:$0xff]  ;;  %576 = vmatprep.subr.mxu1 %v316_v29  ;;  %v183_v34 = vld [vmem:[%s6092_s1 + $0x2e0] sm:$0xff]  ;;  %416 = vmatpush2.msra.mxu0 %v187_v30  ;;  %v274_v18 = vld [vmem:[%s6092_s1 + $0x5b8] sm:$0xff] }
  0x32   :  { %v312_v33 = vld [vmem:[%s6092_s1 + $0x6e8] sm:$0xff]  ;;  %v311_v35 = vld [vmem:[%s6092_s1 + $0x6e0] sm:$0xff]  ;;  %577 = vmatpush2.msra.mxu1 %v315_v31  ;;  %417 = vmatprep.subr.mxu0 %v184_v32  ;;  %v142_v19 = vld [vmem:[%s6092_s1 + $0x198] sm:$0xff] }
  0x33   :  { %v180_v36 = vld [vmem:[%s6092_s1 + $0x2c8] sm:$0xff]  ;;  %578 = vmatprep.subr.mxu1 %v312_v33  ;;  %v179_v38 = vld [vmem:[%s6092_s1 + $0x2c0] sm:$0xff]  ;;  %418 = vmatpush2.msra.mxu0 %v183_v34  ;;  %v273_v20 = vld [vmem:[%s6092_s1 + $0x5b0] sm:$0xff] }
  0x34   :  { %v308_v37 = vld [vmem:[%s6092_s1 + $0x6c8] sm:$0xff]  ;;  %v307_v39 = vld [vmem:[%s6092_s1 + $0x6c0] sm:$0xff]  ;;  %579 = vmatpush2.msra.mxu1 %v311_v35  ;;  %419 = vmatprep.subr.mxu0 %v180_v36  ;;  %v141_v22 = vld [vmem:[%s6092_s1 + $0x190] sm:$0xff] }
  0x35   :  { %v176_v40 = vld [vmem:[%s6092_s1 + $0x2a8] sm:$0xff]  ;;  %580 = vmatprep.subr.mxu1 %v308_v37  ;;  %v175_v42 = vld [vmem:[%s6092_s1 + $0x2a0] sm:$0xff]  ;;  %420 = vmatpush2.msra.mxu0 %v179_v38  ;;  %v270_v23 = vld [vmem:[%s6092_s1 + $0x598] sm:$0xff] }
  0x36   :  { %v304_v41 = vld [vmem:[%s6092_s1 + $0x6a8] sm:$0xff]  ;;  %v303_v43 = vld [vmem:[%s6092_s1 + $0x6a0] sm:$0xff]  ;;  %581 = vmatpush2.msra.mxu1 %v307_v39  ;;  %421 = vmatprep.subr.mxu0 %v176_v40  ;;  %v3572_v25 = vld [vmem:[%s6091_s0 + $0x58] sm:$0xff] }
  0x37   :  { %v172_v44 = vld [vmem:[%s6092_s1 + $0x288] sm:$0xff]  ;;  %582 = vmatprep.subr.mxu1 %v304_v41  ;;  %v171_v46 = vld [vmem:[%s6092_s1 + $0x280] sm:$0xff]  ;;  %422 = vmatpush2.msra.mxu0 %v175_v42  ;;  %v138_v26 = vld [vmem:[%s6092_s1 + $0x178] sm:$0xff] }
  0x38   :  { %v300_v45 = vld [vmem:[%s6092_s1 + $0x688] sm:$0xff]  ;;  %v299_v47 = vld [vmem:[%s6092_s1 + $0x680] sm:$0xff]  ;;  %583 = vmatpush2.msra.mxu1 %v303_v43  ;;  %423 = vmatprep.subr.mxu0 %v172_v44  ;;  %v269_v27 = vld [vmem:[%s6092_s1 + $0x590] sm:$0xff] }
  0x39   :  { %v168_v48 = vld [vmem:[%s6092_s1 + $0x268] sm:$0xff]  ;;  %584 = vmatprep.subr.mxu1 %v300_v45  ;;  %v167_v50 = vld [vmem:[%s6092_s1 + $0x260] sm:$0xff]  ;;  %424 = vmatpush2.msra.mxu0 %v171_v46  ;;  %v3584_v28 = vld [vmem:[%s6091_s0 + $0x50] sm:$0xff] }
  0x3a   :  { %v296_v49 = vld [vmem:[%s6092_s1 + $0x668] sm:$0xff]  ;;  %v295_v51 = vld [vmem:[%s6092_s1 + $0x660] sm:$0xff]  ;;  %585 = vmatpush2.msra.mxu1 %v299_v47  ;;  %425 = vmatprep.subr.mxu0 %v168_v48  ;;  %v137_v29 = vld [vmem:[%s6092_s1 + $0x170] sm:$0xff] }
  0x3b   :  { %v164_v52 = vld [vmem:[%s6092_s1 + $0x248] sm:$0xff]  ;;  %586 = vmatprep.subr.mxu1 %v296_v49  ;;  %v163_v54 = vld [vmem:[%s6092_s1 + $0x240] sm:$0xff]  ;;  %426 = vmatpush2.msra.mxu0 %v167_v50  ;;  %v266_v30 = vld [vmem:[%s6092_s1 + $0x578] sm:$0xff] }
  0x3c   :  { %v292_v53 = vld [vmem:[%s6092_s1 + $0x648] sm:$0xff]  ;;  %v291_v55 = vld [vmem:[%s6092_s1 + $0x640] sm:$0xff]  ;;  %587 = vmatpush2.msra.mxu1 %v295_v51  ;;  %427 = vmatprep.subr.mxu0 %v164_v52  ;;  %v134_v31 = vld [vmem:[%s6092_s1 + $0x158] sm:$0xff] }
  0x3d   :  { %v160_v56 = vld [vmem:[%s6092_s1 + $0x228] sm:$0xff]  ;;  %588 = vmatprep.subr.mxu1 %v292_v53  ;;  %v159_v58 = vld [vmem:[%s6092_s1 + $0x220] sm:$0xff]  ;;  %428 = vmatpush2.msra.mxu0 %v163_v54  ;;  %v265_v32 = vld [vmem:[%s6092_s1 + $0x570] sm:$0xff] }
  0x3e   :  { %v288_v57 = vld [vmem:[%s6092_s1 + $0x628] sm:$0xff]  ;;  %v287_v59 = vld [vmem:[%s6092_s1 + $0x620] sm:$0xff]  ;;  %589 = vmatpush2.msra.mxu1 %v291_v55  ;;  %429 = vmatprep.subr.mxu0 %v160_v56  ;;  %v133_v34 = vld [vmem:[%s6092_s1 + $0x150] sm:$0xff] }
  0x3f   :  { %v156_v60 = vld [vmem:[%s6092_s1 + $0x208] sm:$0xff]  ;;  %590 = vmatprep.subr.mxu1 %v288_v57  ;;  %v155_v62 = vld [vmem:[%s6092_s1 + $0x200] sm:$0xff]  ;;  %430 = vmatpush2.msra.mxu0 %v159_v58  ;;  %v262_v35 = vld [vmem:[%s6092_s1 + $0x558] sm:$0xff] }
  0x40   :  { %v3460_v61 = vld [vmem:[%s6091_s0 + $0x8] sm:$0xff]  ;;  %591 = vmatpush2.msra.mxu1 %v287_v59  ;;  %v3471_v0 = vld [vmem:[%s6091_s0] sm:$0xff]  ;;  %431 = vmatprep.subr.mxu0 %v156_v60  ;;  %v3620_v37 = vld [vmem:[%s6091_s0 + $0x78] sm:$0xff] }
  0x41   :  { %v284_v63 = vld [vmem:[%s6092_s1 + $0x608] sm:$0xff]  ;;  %v283_v1 = vld [vmem:[%s6092_s1 + $0x600] sm:$0xff]  ;;  %433 = vmatprep.mubr.f32.mxu0 %v3460_v61  ;;  %432 = vmatpush2.msra.mxu0 %v155_v62  ;;  %v130_v38 = vld [vmem:[%s6092_s1 + $0x138] sm:$0xff] }
  0x42   :  { %592 = vmatprep.subr.mxu1 %v284_v63  ;;  %434 = vmatmul.mubr.f32.vlgmr.msra.gmra.mxu0 %v3471_v0  ;;  %v3507_v9 = vld [vmem:[%s6091_s0 + $0x28] sm:$0xff]  ;;  %v3519_v12 = vld [vmem:[%s6091_s0 + $0x20] sm:$0xff]  ;;  %v261_v39 = vld [vmem:[%s6092_s1 + $0x550] sm:$0xff] }
  0x43   :  { %593 = vmatpush2.msra.mxu1 %v283_v1  ;;  %594 = vmatprep.mubr.f32.mxu1 %v3480_v2  ;;  %v3555_v21 = vld [vmem:[%s6091_s0 + $0x48] sm:$0xff]  ;;  %v3567_v24 = vld [vmem:[%s6091_s0 + $0x40] sm:$0xff]  ;;  %v3632_v40 = vld [vmem:[%s6091_s0 + $0x70] sm:$0xff] }
  0x44   :  { %691 = vmatprep.subr.mxu0 %v154_v3  ;;  %595 = vmatmul.mubr.f32.vlgmr.msra.gmra.mxu1 %v3488_v4  ;;  %v3603_v33 = vld [vmem:[%s6091_s0 + $0x68] sm:$0xff]  ;;  %v3615_v36 = vld [vmem:[%s6091_s0 + $0x60] sm:$0xff]  ;;  %v129_v41 = vld [vmem:[%s6092_s1 + $0x130] sm:$0xff] }
  0x45   :  { %692 = vmatpush1.msra.mxu0 %v153_v5  ;;  %852 = vmatprep.subr.mxu1 %v282_v6  ;;  %v258_v42 = vld [vmem:[%s6092_s1 + $0x538] sm:$0xff]  ;;  %v257_v44 = vld [vmem:[%s6092_s1 + $0x530] sm:$0xff]  ;;  %v3651_v45 = vld [vmem:[%s6091_s0 + $0x88] sm:$0xff] }
  0x46   :  { %693 = vmatprep.subr.mxu0 %v150_v7  ;;  %853 = vmatpush1.msra.mxu1 %v281_v8  ;;  %v126_v43 = vld [vmem:[%s6092_s1 + $0x118] sm:$0xff]  ;;  %v125_v46 = vld [vmem:[%s6092_s1 + $0x110] sm:$0xff]  ;;  %v3663_v48 = vld [vmem:[%s6091_s0 + $0x80] sm:$0xff] }
  0x47   :  { %439 = vmatprep.mubr.f32.mxu0 %v3507_v9  ;;  %694 = vmatpush1.msra.mxu0 %v149_v10  ;;  %v254_v47 = vld [vmem:[%s6092_s1 + $0x518] sm:$0xff]  ;;  %v253_v51 = vld [vmem:[%s6092_s1 + $0x510] sm:$0xff]  ;;  %v3699_v57 = vld [vmem:[%s6091_s0 + $0xa8] sm:$0xff] }
  0x48   :  { %854 = vmatprep.subr.mxu1 %v278_v11  ;;  %440 = vmatmul.mubr.f32.gmra.mxu0 %v3519_v12  ;;  %v3668_v49 = vld [vmem:[%s6091_s0 + $0x98] sm:$0xff]  ;;  %v3680_v52 = vld [vmem:[%s6091_s0 + $0x90] sm:$0xff]  ;;  %v3711_v60 = vld [vmem:[%s6091_s0 + $0xa0] sm:$0xff] }
  0x49   :  { %600 = vmatprep.mubr.f32.mxu1 %v3524_v13  ;;  %695 = vmatprep.subr.mxu0 %v146_v14  ;;  %v122_v50 = vld [vmem:[%s6092_s1 + $0xf8] sm:$0xff]  ;;  %v121_v53 = vld [vmem:[%s6092_s1 + $0xf0] sm:$0xff]  ;;  %v3747_v10 = vld [vmem:[%s6091_s0 + $0xc8] sm:$0xff] }
  0x4a   :  { %855 = vmatpush1.msra.mxu1 %v277_v15  ;;  %696 = vmatpush1.msra.mxu0 %v145_v17  ;;  %v250_v54 = vld [vmem:[%s6092_s1 + $0x4f8] sm:$0xff]  ;;  %v249_v56 = vld [vmem:[%s6092_s1 + $0x4f0] sm:$0xff]  ;;  %v3759_v15 = vld [vmem:[%s6091_s0 + $0xc0] sm:$0xff] }
  0x4b   :  { %601 = vmatmul.mubr.f32.gmra.mxu1 %v3536_v16  ;;  %856 = vmatprep.subr.mxu1 %v274_v18  ;;  %v118_v55 = vld [vmem:[%s6092_s1 + $0xd8] sm:$0xff]  ;;  %v117_v58 = vld [vmem:[%s6092_s1 + $0xd0] sm:$0xff] }
  0x4c   :  { %697 = vmatprep.subr.mxu0 %v142_v19  ;;  %857 = vmatpush1.msra.mxu1 %v273_v20  ;;  %v246_v59 = vld [vmem:[%s6092_s1 + $0x4d8] sm:$0xff]  ;;  %v245_v1 = vld [vmem:[%s6092_s1 + $0x4d0] sm:$0xff] }
  0x4d   :  { %445 = vmatprep.mubr.f32.mxu0 %v3555_v21  ;;  %698 = vmatpush1.msra.mxu0 %v141_v22  ;;  %v3716_v62 = vld [vmem:[%s6091_s0 + $0xb8] sm:$0xff]  ;;  %v3728_v3 = vld [vmem:[%s6091_s0 + $0xb0] sm:$0xff] }
  0x4e   :  { %858 = vmatprep.subr.mxu1 %v270_v23  ;;  %446 = vmatmul.mubr.f32.gmra.mxu0 %v3567_v24  ;;  %v114_v63 = vld [vmem:[%s6092_s1 + $0xb8] sm:$0xff]  ;;  %v113_v5 = vld [vmem:[%s6092_s1 + $0xb0] sm:$0xff] }
  0x4f   :  { %606 = vmatprep.mubr.f32.mxu1 %v3572_v25  ;;  %699 = vmatprep.subr.mxu0 %v138_v26  ;;  %v242_v6 = vld [vmem:[%s6092_s1 + $0x4b8] sm:$0xff]  ;;  %v241_v8 = vld [vmem:[%s6092_s1 + $0x4b0] sm:$0xff] }
  0x50   :  { %859 = vmatpush1.msra.mxu1 %v269_v27  ;;  %700 = vmatpush1.msra.mxu0 %v137_v29  ;;  %v110_v7 = vld [vmem:[%s6092_s1 + $0x98] sm:$0xff]  ;;  %v109_v11 = vld [vmem:[%s6092_s1 + $0x90] sm:$0xff]  ;;  %v3795_v29 = vld [vmem:[%s6091_s0 + $0xe8] sm:$0xff] }
  0x51   :  { %607 = vmatmul.mubr.f32.gmra.mxu1 %v3584_v28  ;;  %860 = vmatprep.subr.mxu1 %v266_v30  ;;  %v238_v14 = vld [vmem:[%s6092_s1 + $0x498] sm:$0xff]  ;;  %v237_v19 = vld [vmem:[%s6092_s1 + $0x490] sm:$0xff] }
  0x52   :  { %701 = vmatprep.subr.mxu0 %v134_v31  ;;  %861 = vmatpush1.msra.mxu1 %v265_v32  ;;  %v3764_v17 = vld [vmem:[%s6091_s0 + $0xd8] sm:$0xff]  ;;  %v3776_v20 = vld [vmem:[%s6091_s0 + $0xd0] sm:$0xff]  ;;  %v3807_v32 = vld [vmem:[%s6091_s0 + $0xe0] sm:$0xff] }
  0x53   :  { %451 = vmatprep.mubr.f32.mxu0 %v3603_v33  ;;  %702 = vmatpush1.msra.mxu0 %v133_v34  ;;  %v106_v18 = vld [vmem:[%s6092_s1 + $0x78] sm:$0xff]  ;;  %v105_v22 = vld [vmem:[%s6092_s1 + $0x70] sm:$0xff] }
  0x54   :  { %862 = vmatprep.subr.mxu1 %v262_v35  ;;  %452 = vmatmul.mubr.f32.gmra.mxu0 %v3615_v36  ;;  %v234_v23 = vld [vmem:[%s6092_s1 + $0x478] sm:$0xff]  ;;  %v233_v27 = vld [vmem:[%s6092_s1 + $0x470] sm:$0xff] }
  0x55   :  { %612 = vmatprep.mubr.f32.mxu1 %v3620_v37  ;;  %703 = vmatprep.subr.mxu0 %v130_v38  ;;  %v102_v26 = vld [vmem:[%s6092_s1 + $0x58] sm:$0xff]  ;;  %v101_v30 = vld [vmem:[%s6092_s1 + $0x50] sm:$0xff] }
  0x56   :  { %863 = vmatpush1.msra.mxu1 %v261_v39  ;;  %704 = vmatpush1.msra.mxu0 %v129_v41  ;;  %v230_v31 = vld [vmem:[%s6092_s1 + $0x458] sm:$0xff]  ;;  %v229_v38 = vld [vmem:[%s6092_s1 + $0x450] sm:$0xff] }
  0x57   :  { %613 = vmatmul.mubr.f32.gmra.mxu1 %v3632_v40  ;;  %864 = vmatprep.subr.mxu1 %v258_v42  ;;  %v3812_v34 = vld [vmem:[%s6091_s0 + $0xf8] sm:$0xff]  ;;  %v3824_v39 = vld [vmem:[%s6091_s0 + $0xf0] sm:$0xff] }
  0x58   :  { %705 = vmatprep.subr.mxu0 %v126_v43  ;;  %865 = vmatpush1.msra.mxu1 %v257_v44  ;;  %v98_v35 = vld [vmem:[%s6092_s1 + $0x38] sm:$0xff]  ;;  %v97_v41 = vld [vmem:[%s6092_s1 + $0x30] sm:$0xff] }
  0x59   :  { %457 = vmatprep.mubr.f32.mxu0 %v3651_v45  ;;  %706 = vmatpush1.msra.mxu0 %v125_v46  ;;  %v226_v42 = vld [vmem:[%s6092_s1 + $0x438] sm:$0xff] }
  0x5a   :  { %866 = vmatprep.subr.mxu1 %v254_v47  ;;  %458 = vmatmul.mubr.f32.gmra.mxu0 %v3663_v48  ;;  %v94_v43 = vld [vmem:[%s6092_s1 + $0x18] sm:$0xff] }
  0x5b   :  { %618 = vmatprep.mubr.f32.mxu1 %v3668_v49  ;;  %707 = vmatprep.subr.mxu0 %v122_v50 }
  0x5c   :  { %867 = vmatpush1.msra.mxu1 %v253_v51  ;;  %708 = vmatpush1.msra.mxu0 %v121_v53 }
  0x5d   :  { %619 = vmatmul.mubr.f32.gmra.mxu1 %v3680_v52  ;;  %868 = vmatprep.subr.mxu1 %v250_v54 }
  0x5e   :  { %709 = vmatprep.subr.mxu0 %v118_v55  ;;  %869 = vmatpush1.msra.mxu1 %v249_v56 }
  0x5f   :  { %463 = vmatprep.mubr.f32.mxu0 %v3699_v57  ;;  %710 = vmatpush1.msra.mxu0 %v117_v58 }
  0x60   :  { %870 = vmatprep.subr.mxu1 %v246_v59  ;;  %464 = vmatmul.mubr.f32.gmra.mxu0 %v3711_v60 }
  0x61   :  { %624 = vmatprep.mubr.f32.mxu1 %v3716_v62  ;;  %711 = vmatprep.subr.mxu0 %v114_v63 }
  0x62   :  { %871 = vmatpush1.msra.mxu1 %v245_v1  ;;  %712 = vmatpush1.msra.mxu0 %v113_v5 }
  0x63   :  { %625 = vmatmul.mubr.f32.gmra.mxu1 %v3728_v3  ;;  %872 = vmatprep.subr.mxu1 %v242_v6 }
  0x64   :  { %713 = vmatprep.subr.mxu0 %v110_v7  ;;  %873 = vmatpush1.msra.mxu1 %v241_v8 }
  0x65   :  { %469 = vmatprep.mubr.f32.mxu0 %v3747_v10  ;;  %714 = vmatpush1.msra.mxu0 %v109_v11 }
  0x66   :  { %874 = vmatprep.subr.mxu1 %v238_v14  ;;  %470 = vmatmul.mubr.f32.gmra.mxu0 %v3759_v15 }
  0x67   :  { %630 = vmatprep.mubr.f32.mxu1 %v3764_v17  ;;  %715 = vmatprep.subr.mxu0 %v106_v18 }
  0x68   :  { %875 = vmatpush1.msra.mxu1 %v237_v19  ;;  %716 = vmatpush1.msra.mxu0 %v105_v22 }
  0x69   :  { %631 = vmatmul.mubr.f32.gmra.mxu1 %v3776_v20  ;;  %876 = vmatprep.subr.mxu1 %v234_v23 }
  0x6a   :  { %717 = vmatprep.subr.mxu0 %v102_v26  ;;  %877 = vmatpush1.msra.mxu1 %v233_v27 }
  0x6b   :  { %475 = vmatprep.mubr.f32.mxu0 %v3795_v29  ;;  %718 = vmatpush1.msra.mxu0 %v101_v30 }
  0x6c   :  { %878 = vmatprep.subr.mxu1 %v230_v31  ;;  %476 = vmatmul.mubr.f32.gmra.mxu0 %v3807_v32 }
  0x6d   :  { %636 = vmatprep.mubr.f32.mxu1 %v3812_v34 }
  0x6e   :  { %12 = vsyncpa [#allocation3], 0  ;;  %719 = vmatprep.subr.mxu0 %v98_v35  ;;  %879 = vmatpush1.msra.mxu1 %v229_v38  ;;  %v225_v44 = vld [vmem:[%s6092_s1 + $0x430] sm:$0xff]  ;;  %v3843_v46 = vld [vmem:[%s6091_s0 + $0x108] sm:$0xff]  ;;  %vm2538_vm0 = vcmask 1041409   ;;  %vm2540_vm1 = vcmask 1042434  }
  0x6f   :  { %637 = vmatmul.mubr.f32.gmra.mxu1 %v3824_v39  ;;  %720 = vmatpush1.msra.mxu0 %v97_v41  ;;  %v93_v47 = vld [vmem:[%s6092_s1 + $0x10] sm:$0xff]  ;;  %v222_v50 = vld [vmem:[%s6092_s1 + $0x418] sm:$0xff]  ;;  %v3855_v51 = vld [vmem:[%s6091_s0 + $0x100] sm:$0xff]  ;;  %vm2542_vm2 = vcmask 1043459   ;;  %vm2544_vm3 = vcmask 1044484   ;;  %vm2546_vm4 = vcmask 1045509  }
  0x70   :  { %880 = vmatprep.subr.mxu1 %v226_v42  ;;  %721 = vmatprep.subr.mxu0 %v94_v43  ;;  %v3860_v53 = vld [vmem:[%s6091_s0 + $0x118] sm:$0xff]  ;;  %v221_v55 = vld [vmem:[%s6092_s1 + $0x410] sm:$0xff]  ;;  %v3891_v5 = vld [vmem:[%s6091_s0 + $0x128] sm:$0xff]  ;;  %vm2548_vm5 = vcmask 1046534   ;;  %vm2550_vm6 = vcmask 1047559   ;;  %s3039_s20 = smov [#allocation2]  }
  0x71   :  { %881 = vmatpush1.msra.mxu1 %v225_v44  ;;  %481 = vmatprep.mubr.f32.mxu0 %v3843_v46  ;;  %v218_v54 = vld [vmem:[%s6092_s1 + $0x3f8] sm:$0xff]  ;;  %v3872_v56 = vld [vmem:[%s6091_s0 + $0x110] sm:$0xff]  ;;  %v3903_v8 = vld [vmem:[%s6091_s0 + $0x120] sm:$0xff]  ;;  %s2766_s21 = sshll.u32 %s3039_s20, 4  ;;  %s2767_s21 = int_to_ptr.vmem [resolvable:$true] %s2766_s21 }
  0x72   :  { %722 = vmatpush1.msra.mxu0 %v93_v47  ;;  %882 = vmatprep.subr.mxu1 %v222_v50  ;;  %v217_v58 = vld [vmem:[%s6092_s1 + $0x3f0] sm:$0xff]  ;;  %v346_v59 = vld [vmem:[%s6092_s1 + $0x7f8] sm:$0xff]  ;;  %v3939_v30 = vld [vmem:[%s6091_s0 + $0x148] sm:$0xff]  ;;  %s3017_s22 = scalar_lea.vmem %s2767_s21, 256  ;;  %p3022_p1 = scmp.lt.s32.totalorder %s2767_s21, %s2767_s21 }
  0x73   :  { %482 = vmatmul.mubr.f32.gmra.mxu0 %v3855_v51  ;;  %642 = vmatprep.mubr.f32.mxu1 %v3860_v53  ;;  %v214_v63 = vld [vmem:[%s6092_s1 + $0x3d8] sm:$0xff]  ;;  %v345_v1 = vld [vmem:[%s6092_s1 + $0x7f0] sm:$0xff]  ;;  %v3951_v38 = vld [vmem:[%s6091_s0 + $0x140] sm:$0xff]  ;;  %p3018_p0 = scmp.ne.s32.totalorder %s2767_s21, %s3017_s22  ;;  %p3023_p2 = scmp.lt.s32.totalorder %s3017_s22, %s3017_s22 }
  0x74   :  { %723 = vmatprep.subr.mxu0 %v218_v54  ;;  %883 = vmatpush1.msra.mxu1 %v221_v55  ;;  %v213_v6 = vld [vmem:[%s6092_s1 + $0x3d0] sm:$0xff]  ;;  %v342_v7 = vld [vmem:[%s6092_s1 + $0x7d8] sm:$0xff] }
  0x75   :  { %643 = vmatmul.mubr.f32.gmra.mxu1 %v3872_v56  ;;  %724 = vmatpush2.msra.mxu0 %v217_v58  ;;  %v3908_v11 = vld [vmem:[%s6091_s0 + $0x138] sm:$0xff]  ;;  %v341_v18 = vld [vmem:[%s6092_s1 + $0x7d0] sm:$0xff]  ;;  %v3987_v58 = vld [vmem:[%s6091_s0 + $0x168] sm:$0xff]  ;;  %p3024_p3 = por %p3023_p2, %p3022_p1 }
  0x76   :  { %884 = vmatprep.subr.mxu1 %v346_v59  ;;  %725 = vmatprep.subr.mxu0 %v214_v63  ;;  %v210_v14 = vld [vmem:[%s6092_s1 + $0x3b8] sm:$0xff]  ;;  %v3920_v19 = vld [vmem:[%s6091_s0 + $0x130] sm:$0xff] }
  0x77   :  { %885 = vmatpush2.msra.mxu1 %v345_v1  ;;  %487 = vmatprep.mubr.f32.mxu0 %v3891_v5  ;;  %v209_v22 = vld [vmem:[%s6092_s1 + $0x3b0] sm:$0xff]  ;;  %v338_v23 = vld [vmem:[%s6092_s1 + $0x7b8] sm:$0xff]  ;;  %v3999_v1 = vld [vmem:[%s6091_s0 + $0x160] sm:$0xff]  ;;  %p3025_p4 = pnand %p3024_p3, %p3018_p0 }
  0x78   :  { %726 = vmatpush2.msra.mxu0 %v213_v6  ;;  %886 = vmatprep.subr.mxu1 %v342_v7  ;;  %v206_v26 = vld [vmem:[%s6092_s1 + $0x398] sm:$0xff]  ;;  %v337_v27 = vld [vmem:[%s6092_s1 + $0x7b0] sm:$0xff] }
  0x79   :  { %488 = vmatmul.mubr.f32.gmra.mxu0 %v3903_v8  ;;  %648 = vmatprep.mubr.f32.mxu1 %v3908_v11  ;;  %v205_v31 = vld [vmem:[%s6092_s1 + $0x390] sm:$0xff]  ;;  %v334_v35 = vld [vmem:[%s6092_s1 + $0x798] sm:$0xff] }
  0x7a   :  { %727 = vmatprep.subr.mxu0 %v210_v14  ;;  %887 = vmatpush2.msra.mxu1 %v341_v18  ;;  %v3956_v41 = vld [vmem:[%s6091_s0 + $0x158] sm:$0xff]  ;;  %v333_v43 = vld [vmem:[%s6092_s1 + $0x790] sm:$0xff] }
  0x7b   :  { %649 = vmatmul.mubr.f32.gmra.mxu1 %v3920_v19  ;;  %728 = vmatpush2.msra.mxu0 %v209_v22  ;;  %v202_v42 = vld [vmem:[%s6092_s1 + $0x378] sm:$0xff]  ;;  %v3968_v44 = vld [vmem:[%s6091_s0 + $0x150] sm:$0xff] }
  0x7c   :  { %888 = vmatprep.subr.mxu1 %v338_v23  ;;  %729 = vmatprep.subr.mxu0 %v206_v26  ;;  %v201_v47 = vld [vmem:[%s6092_s1 + $0x370] sm:$0xff]  ;;  %v330_v50 = vld [vmem:[%s6092_s1 + $0x778] sm:$0xff] }
  0x7d   :  { %889 = vmatpush2.msra.mxu1 %v337_v27  ;;  %493 = vmatprep.mubr.f32.mxu0 %v3939_v30  ;;  %v198_v54 = vld [vmem:[%s6092_s1 + $0x358] sm:$0xff]  ;;  %v329_v55 = vld [vmem:[%s6092_s1 + $0x770] sm:$0xff] }
  0x7e   :  { %730 = vmatpush2.msra.mxu0 %v205_v31  ;;  %890 = vmatprep.subr.mxu1 %v334_v35  ;;  %v197_v59 = vld [vmem:[%s6092_s1 + $0x350] sm:$0xff]  ;;  %v326_v63 = vld [vmem:[%s6092_s1 + $0x758] sm:$0xff]  ;;  %v4035_v31 = vld [vmem:[%s6091_s0 + $0x188] sm:$0xff] }
  0x7f   :  { %494 = vmatmul.mubr.f32.gmra.mxu0 %v3951_v38  ;;  %654 = vmatprep.mubr.f32.mxu1 %v3956_v41  ;;  %v4004_v6 = vld [vmem:[%s6091_s0 + $0x178] sm:$0xff]  ;;  %v325_v14 = vld [vmem:[%s6092_s1 + $0x750] sm:$0xff] }
  0x80   :  { %731 = vmatprep.subr.mxu0 %v202_v42  ;;  %891 = vmatpush2.msra.mxu1 %v333_v43  ;;  %v194_v7 = vld [vmem:[%s6092_s1 + $0x338] sm:$0xff]  ;;  %v4016_v18 = vld [vmem:[%s6091_s0 + $0x170] sm:$0xff]  ;;  %v4047_v43 = vld [vmem:[%s6091_s0 + $0x180] sm:$0xff] }
  0x81   :  { %655 = vmatmul.mubr.f32.gmra.mxu1 %v3968_v44  ;;  %732 = vmatpush2.msra.mxu0 %v201_v47  ;;  %v193_v22 = vld [vmem:[%s6092_s1 + $0x330] sm:$0xff]  ;;  %v322_v23 = vld [vmem:[%s6092_s1 + $0x738] sm:$0xff] }
  0x82   :  { %892 = vmatprep.subr.mxu1 %v330_v50  ;;  %733 = vmatprep.subr.mxu0 %v198_v54  ;;  %v190_v26 = vld [vmem:[%s6092_s1 + $0x318] sm:$0xff]  ;;  %v321_v27 = vld [vmem:[%s6092_s1 + $0x730] sm:$0xff] }
  0x83   :  { %893 = vmatpush2.msra.mxu1 %v329_v55  ;;  %499 = vmatprep.mubr.f32.mxu0 %v3987_v58  ;;  %v189_v35 = vld [vmem:[%s6092_s1 + $0x310] sm:$0xff]  ;;  %v318_v42 = vld [vmem:[%s6092_s1 + $0x718] sm:$0xff] }
  0x84   :  { %734 = vmatpush2.msra.mxu0 %v197_v59  ;;  %894 = vmatprep.subr.mxu1 %v326_v63  ;;  %v4052_v47 = vld [vmem:[%s6091_s0 + $0x198] sm:$0xff]  ;;  %v317_v54 = vld [vmem:[%s6092_s1 + $0x710] sm:$0xff] }
  0x85   :  { %500 = vmatmul.mubr.f32.gmra.mxu0 %v3999_v1  ;;  %660 = vmatprep.mubr.f32.mxu1 %v4004_v6  ;;  %v186_v50 = vld [vmem:[%s6092_s1 + $0x2f8] sm:$0xff]  ;;  %v4064_v55 = vld [vmem:[%s6091_s0 + $0x190] sm:$0xff] }
  0x86   :  { %735 = vmatprep.subr.mxu0 %v194_v7  ;;  %895 = vmatpush2.msra.mxu1 %v325_v14  ;;  %v185_v59 = vld [vmem:[%s6092_s1 + $0x2f0] sm:$0xff]  ;;  %v314_v63 = vld [vmem:[%s6092_s1 + $0x6f8] sm:$0xff] }
  0x87   :  { %661 = vmatmul.mubr.f32.gmra.mxu1 %v4016_v18  ;;  %736 = vmatpush2.msra.mxu0 %v193_v22  ;;  %v182_v7 = vld [vmem:[%s6092_s1 + $0x2d8] sm:$0xff]  ;;  %v313_v14 = vld [vmem:[%s6092_s1 + $0x6f0] sm:$0xff]  ;;  %v4083_v22 = vld [vmem:[%s6091_s0 + $0x1a8] sm:$0xff] }
  0x88   :  { %896 = vmatprep.subr.mxu1 %v322_v23  ;;  %737 = vmatprep.subr.mxu0 %v190_v26  ;;  %v181_v23 = vld [vmem:[%s6092_s1 + $0x2d0] sm:$0xff]  ;;  %v310_v26 = vld [vmem:[%s6092_s1 + $0x6d8] sm:$0xff] }
  0x89   :  { %897 = vmatpush2.msra.mxu1 %v321_v27  ;;  %505 = vmatprep.mubr.f32.mxu0 %v4035_v31  ;;  %v4095_v27 = vld [vmem:[%s6091_s0 + $0x1a0] sm:$0xff] }
  0x8a   :  { %738 = vmatpush2.msra.mxu0 %v189_v35  ;;  %898 = vmatprep.subr.mxu1 %v318_v42  ;;  %v4100_v35 = vld [vmem:[%s6091_s0 + $0x1b8] sm:$0xff] }
  0x8b   :  { %506 = vmatmul.mubr.f32.gmra.mxu0 %v4047_v43  ;;  %666 = vmatprep.mubr.f32.mxu1 %v4052_v47  ;;  %v178_v42 = vld [vmem:[%s6092_s1 + $0x2b8] sm:$0xff] }
  0x8c   :  { %739 = vmatprep.subr.mxu0 %v186_v50  ;;  %899 = vmatpush2.msra.mxu1 %v317_v54  ;;  %v309_v50 = vld [vmem:[%s6092_s1 + $0x6d0] sm:$0xff] }
  0x8d   :  { %667 = vmatmul.mubr.f32.gmra.mxu1 %v4064_v55  ;;  %740 = vmatpush2.msra.mxu0 %v185_v59  ;;  %v4112_v54 = vld [vmem:[%s6091_s0 + $0x1b0] sm:$0xff] }
  0x8e   :  { %900 = vmatprep.subr.mxu1 %v314_v63  ;;  %741 = vmatprep.subr.mxu0 %v182_v7  ;;  %6239 = vst [vmem:[#allocation5_spill] sm:$0xff] %v4112_v54  ;;  %v177_v59 = vld [vmem:[%s6092_s1 + $0x2b0] sm:$0xff]  ;;  %v306_v63 = vld [vmem:[%s6092_s1 + $0x6b8] sm:$0xff] }
  0x8f   :  { %901 = vmatpush2.msra.mxu1 %v313_v14  ;;  %511 = vmatprep.mubr.f32.mxu0 %v4083_v22  ;;  %v174_v7 = vld [vmem:[%s6092_s1 + $0x298] sm:$0xff]  ;;  %v305_v14 = vld [vmem:[%s6092_s1 + $0x6b0] sm:$0xff] }
  0x90   :  { %742 = vmatpush2.msra.mxu0 %v181_v23  ;;  %902 = vmatprep.subr.mxu1 %v310_v26  ;;  %v4131_v23 = vld [vmem:[%s6091_s0 + $0x1c8] sm:$0xff]  ;;  %v173_v26 = vld [vmem:[%s6092_s1 + $0x290] sm:$0xff] }
  0x91   :  { %512 = vmatmul.mubr.f32.gmra.mxu0 %v4095_v27  ;;  %672 = vmatprep.mubr.f32.mxu1 %v4100_v35  ;;  %6240 = vst [vmem:[#allocation6_spill] sm:$0xff] %v4131_v23 }
  0x92   :  { %743 = vmatprep.subr.mxu0 %v178_v42  ;;  %903 = vmatpush2.msra.mxu1 %v309_v50  ;;  %v302_v42 = vld [vmem:[%s6092_s1 + $0x698] sm:$0xff]  ;;  %v4143_v50 = vld [vmem:[%s6091_s0 + $0x1c0] sm:$0xff] }
  0x93   :  { %673 = vmatmul.mubr.f32.gmra.mxu1 %v4112_v54  ;;  %744 = vmatpush2.msra.mxu0 %v177_v59  ;;  %6241 = vst [vmem:[#allocation7_spill] sm:$0xff] %v4143_v50  ;;  %v4148_v54 = vld [vmem:[%s6091_s0 + $0x1d8] sm:$0xff] }
  0x94   :  { %904 = vmatprep.subr.mxu1 %v306_v63  ;;  %745 = vmatprep.subr.mxu0 %v174_v7  ;;  %6242 = vst [vmem:[#allocation8_spill] sm:$0xff] %v4148_v54  ;;  %v170_v59 = vld [vmem:[%s6092_s1 + $0x278] sm:$0xff]  ;;  %v301_v63 = vld [vmem:[%s6092_s1 + $0x690] sm:$0xff] }
  0x95   :  { %905 = vmatpush2.msra.mxu1 %v305_v14  ;;  %517 = vmatprep.mubr.f32.mxu0 %v4131_v23  ;;  %v4160_v7 = vld [vmem:[%s6091_s0 + $0x1d0] sm:$0xff]  ;;  %v298_v23 = vld [vmem:[%s6092_s1 + $0x678] sm:$0xff] }
  0x96   :  { %746 = vmatpush2.msra.mxu0 %v173_v26  ;;  %906 = vmatprep.subr.mxu1 %v302_v42  ;;  %6243 = vst [vmem:[#allocation9_spill] sm:$0xff] %v4160_v7  ;;  %v169_v14 = vld [vmem:[%s6092_s1 + $0x270] sm:$0xff]  ;;  %v166_v26 = vld [vmem:[%s6092_s1 + $0x258] sm:$0xff] }
  0x97   :  { %518 = vmatmul.mubr.f32.gmra.mxu0 %v4143_v50  ;;  %678 = vmatprep.mubr.f32.mxu1 %v4148_v54  ;;  %v297_v42 = vld [vmem:[%s6092_s1 + $0x670] sm:$0xff]  ;;  %v4179_v50 = vld [vmem:[%s6091_s0 + $0x1e8] sm:$0xff] }
  0x98   :  { %747 = vmatprep.subr.mxu0 %v170_v59  ;;  %907 = vmatpush2.msra.mxu1 %v301_v63  ;;  %6244 = vst [vmem:[#allocation10_spill] sm:$0xff] %v4179_v50  ;;  %v165_v54 = vld [vmem:[%s6092_s1 + $0x250] sm:$0xff]  ;;  %v294_v59 = vld [vmem:[%s6092_s1 + $0x658] sm:$0xff]  ;;  %v4191_v63 = vld [vmem:[%s6091_s0 + $0x1e0] sm:$0xff] }
  0x99   :  { %679 = vmatmul.mubr.f32.gmra.mxu1 %v4160_v7  ;;  %748 = vmatpush2.msra.mxu0 %v169_v14  ;;  %6245 = vst [vmem:[#allocation11_spill] sm:$0xff] %v4191_v63  ;;  %v4196_v7 = vld [vmem:[%s6091_s0 + $0x1f8] sm:$0xff] }
  0x9a   :  { %908 = vmatprep.subr.mxu1 %v298_v23  ;;  %749 = vmatprep.subr.mxu0 %v166_v26  ;;  %6246 = vst [vmem:[#allocation12_spill] sm:$0xff] %v4196_v7  ;;  %v162_v14 = vld [vmem:[%s6092_s1 + $0x238] sm:$0xff]  ;;  %v293_v23 = vld [vmem:[%s6092_s1 + $0x650] sm:$0xff] }
  0x9b   :  { %909 = vmatpush2.msra.mxu1 %v297_v42  ;;  %523 = vmatprep.mubr.f32.mxu0 %v4179_v50  ;;  %v4208_v26 = vld [vmem:[%s6091_s0 + $0x1f0] sm:$0xff]  ;;  %v290_v50 = vld [vmem:[%s6092_s1 + $0x638] sm:$0xff] }
  0x9c   :  { %750 = vmatpush2.msra.mxu0 %v165_v54  ;;  %910 = vmatprep.subr.mxu1 %v294_v59  ;;  %v161_v42 = vld [vmem:[%s6092_s1 + $0x230] sm:$0xff]  ;;  %v158_v54 = vld [vmem:[%s6092_s1 + $0x218] sm:$0xff] }
  0x9d   :  { %524 = vmatmul.mubr.f32.gmra.mxu0 %v4191_v63  ;;  %684 = vmatprep.mubr.f32.mxu1 %v4196_v7  ;;  %v289_v59 = vld [vmem:[%s6092_s1 + $0x630] sm:$0xff]  ;;  %v286_v7 = vld [vmem:[%s6092_s1 + $0x618] sm:$0xff] }
  0x9e   :  { %751 = vmatprep.subr.mxu0 %v162_v14  ;;  %911 = vmatpush2.msra.mxu1 %v293_v23  ;;  %v157_v63 = vld [vmem:[%s6092_s1 + $0x210] sm:$0xff] }
  0x9f   :  { %685 = vmatmul.mubr.f32.gmra.mxu1 %v4208_v26  ;;  %752 = vmatpush2.msra.mxu0 %v161_v42  ;;  %v285_v14 = vld [vmem:[%s6092_s1 + $0x610] sm:$0xff] }
  0xa0   :  { %912 = vmatprep.subr.mxu1 %v290_v50  ;;  %753 = vmatprep.subr.mxu0 %v158_v54 }
  0xa1   :  { %913 = vmatpush2.msra.mxu1 %v289_v59  ;;  %754 = vmatpush2.msra.mxu0 %v157_v63 }
  0xa2   :  { %755 = vmatprep.mubr.f32.mxu0 %v3460_v61  ;;  %914 = vmatprep.subr.mxu1 %v286_v7  ;;  %v6247_v61 = vld [vmem:[#allocation6_spill] sm:$0xff] }
  0xa3   :  { %756 = vmatmul.mubr.f32.vlgmr.msra.gmra.mxu0 %v3471_v0  ;;  %915 = vmatpush2.msra.mxu1 %v285_v14  ;;  %v6248_v0 = vld [vmem:[#allocation5_spill] sm:$0xff] }
  0xa4   :  { %916 = vmatprep.mubr.f32.mxu1 %v3480_v2  ;;  %761 = vmatprep.mubr.f32.mxu0 %v3507_v9  ;;  %v6249_v2 = vld [vmem:[#allocation8_spill] sm:$0xff]  ;;  %v6251_v9 = vld [vmem:[#allocation10_spill] sm:$0xff] }
  0xa5   :  { %917 = vmatmul.mubr.f32.vlgmr.msra.gmra.mxu1 %v3488_v4  ;;  %v6250_v4 = vld [vmem:[#allocation7_spill] sm:$0xff] }
  0xa6   :  { %922 = vmatprep.mubr.f32.mxu1 %v3524_v13  ;;  %v6253_v13 = vld [vmem:[#allocation12_spill] sm:$0xff] }
  0xa7   :  { %762 = vmatmul.mubr.f32.gmra.mxu0 %v3519_v12  ;;  %v6252_v12 = vld [vmem:[#allocation9_spill] sm:$0xff] }
  0xa8   :  { %767 = vmatprep.mubr.f32.mxu0 %v3555_v21  ;;  %v349_v21 = vlaneseq }
  0xa9   :  { %923 = vmatmul.mubr.f32.gmra.mxu1 %v3536_v16  ;;  %v6254_v16 = vld [vmem:[#allocation11_spill] sm:$0xff] }
  0xaa   :  { %928 = vmatprep.mubr.f32.mxu1 %v3572_v25 }
  0xab   :  { %768 = vmatmul.mubr.f32.gmra.mxu0 %v3567_v24  ;;  %v4298_v24 = vshrl.u32 %v349_v21, 7 }
  0xac   :  { %773 = vmatprep.mubr.f32.mxu0 %v3603_v33  ;;  %v4306_v33 = vld [vmem:[%s6093_s2] sm:$0xf] }
  0xad   :  { %929 = vmatmul.mubr.f32.gmra.mxu1 %v3584_v28  ;;  %v4301_v28 = vsub.s32 0, %v4298_v24 }
  0xae   :  { %934 = vmatprep.mubr.f32.mxu1 %v3620_v37 }
  0xaf   :  { %774 = vmatmul.mubr.f32.gmra.mxu0 %v3615_v36  ;;  %6255 = vst [vmem:[#allocation6_spill] sm:$0xff] %v4301_v28 }
  0xb0   :  { %779 = vmatprep.mubr.f32.mxu0 %v3651_v45 }
  0xb1   :  { %935 = vmatmul.mubr.f32.gmra.mxu1 %v3632_v40  ;;  %v4309_v40 = vsub.s32 1, %v4298_v24 }
  0xb2   :  { %940 = vmatprep.mubr.f32.mxu1 %v3668_v49 }
  0xb3   :  { %780 = vmatmul.mubr.f32.gmra.mxu0 %v3663_v48  ;;  %6256 = vst [vmem:[#allocation5_spill] sm:$0xff] %v4309_v40  ;;  %v4313_v48 = vrot.slane %v4306_v33, %v4301_v28 }
  0xb4   :  { %785 = vmatprep.mubr.f32.mxu0 %v3699_v57 }
  0xb5   :  { %941 = vmatmul.mubr.f32.gmra.mxu1 %v3680_v52  ;;  %v4317_v52 = vrot.slane %v4306_v33, %v4309_v40 }
  0xb6   :  { %946 = vmatprep.mubr.f32.mxu1 %v3716_v62 }
  0xb7   :  { %786 = vmatmul.mubr.f32.gmra.mxu0 %v3711_v60 }
  0xb8   :  { %791 = vmatprep.mubr.f32.mxu0 %v3747_v10 }
  0xb9   :  { %947 = vmatmul.mubr.f32.gmra.mxu1 %v3728_v3 }
  0xba   :  { %952 = vmatprep.mubr.f32.mxu1 %v3764_v17 }
  0xbb   :  { %792 = vmatmul.mubr.f32.gmra.mxu0 %v3759_v15 }
  0xbc   :  { %797 = vmatprep.mubr.f32.mxu0 %v3795_v29 }
  0xbd   :  { %953 = vmatmul.mubr.f32.gmra.mxu1 %v3776_v20 }
  0xbe   :  { %958 = vmatprep.mubr.f32.mxu1 %v3812_v34 }
  0xbf   :  { %798 = vmatmul.mubr.f32.gmra.mxu0 %v3807_v32 }
  0xc0   :  { %803 = vmatprep.mubr.f32.mxu0 %v3843_v46 }
  0xc1   :  { %959 = vmatmul.mubr.f32.gmra.mxu1 %v3824_v39 }
  0xc2   :  { %964 = vmatprep.mubr.f32.mxu1 %v3860_v53 }
  0xc3   :  { %804 = vmatmul.mubr.f32.gmra.mxu0 %v3855_v51 }
  0xc4   :  { %809 = vmatprep.mubr.f32.mxu0 %v3891_v5 }
  0xc5   :  { %965 = vmatmul.mubr.f32.gmra.mxu1 %v3872_v56 }
  0xc6   :  { %970 = vmatprep.mubr.f32.mxu1 %v3908_v11 }
  0xc7   :  { %810 = vmatmul.mubr.f32.gmra.mxu0 %v3903_v8 }
  0xc8   :  { %815 = vmatprep.mubr.f32.mxu0 %v3939_v30 }
  0xc9   :  { %971 = vmatmul.mubr.f32.gmra.mxu1 %v3920_v19 }
  0xca   :  { %976 = vmatprep.mubr.f32.mxu1 %v3956_v41 }
  0xcb   :  { %816 = vmatmul.mubr.f32.gmra.mxu0 %v3951_v38 }
  0xcc   :  { %821 = vmatprep.mubr.f32.mxu0 %v3987_v58 }
  0xcd   :  { %977 = vmatmul.mubr.f32.gmra.mxu1 %v3968_v44 }
  0xce   :  { %982 = vmatprep.mubr.f32.mxu1 %v4004_v6 }
  0xcf   :  { %822 = vmatmul.mubr.f32.gmra.mxu0 %v3999_v1 }
  0xd0   :  { %827 = vmatprep.mubr.f32.mxu0 %v4035_v31 }
  0xd1   :  { %983 = vmatmul.mubr.f32.gmra.mxu1 %v4016_v18 }
  0xd2   :  { %988 = vmatprep.mubr.f32.mxu1 %v4052_v47 }
  0xd3   :  { %828 = vmatmul.mubr.f32.gmra.mxu0 %v4047_v43 }
  0xd4   :  { %833 = vmatprep.mubr.f32.mxu0 %v4083_v22 }
  0xd5   :  { %989 = vmatmul.mubr.f32.gmra.mxu1 %v4064_v55 }
  0xd6   :  { %994 = vmatprep.mubr.f32.mxu1 %v4100_v35 }
  0xd7   :  { %834 = vmatmul.mubr.f32.gmra.mxu0 %v4095_v27 }
  0xd8   :  { %839 = vmatprep.mubr.f32.mxu0 %v6247_v61 }
  0xd9   :  { %995 = vmatmul.mubr.f32.gmra.mxu1 %v6248_v0 }
  0xda   :  { %1000 = vmatprep.mubr.f32.mxu1 %v6249_v2 }
  0xdb   :  { %840 = vmatmul.mubr.f32.gmra.mxu0 %v6250_v4 }
  0xdc   :  { %845 = vmatprep.mubr.f32.mxu0 %v6251_v9 }
  0xdd   :  { %1001 = vmatmul.mubr.f32.gmra.mxu1 %v6252_v12 }
  0xde   :  { %1006 = vmatprep.mubr.f32.mxu1 %v6253_v13 }
  0xdf   :  { %846 = vmatmul.mubr.f32.gmra.mxu0 %v6254_v16 }
  0xe1   :  { %1007 = vmatmul.mubr.f32.gmra.mxu1 %v4208_v26 }
 0x102   :  { %v435_v25 = vpop.f32.mrf.mxu0 }
 0x103   :  { %v436_v35 = vadd.f32 %v435_v25, %v4313_v48 }
 0x104   :  { %v596_v36 = vpop.f32.mrf.mxu1  ;;  %v437_v37 = vpop.f32.mrf.mxu0 }
 0x105   :  { %v438_v47 = vadd.f32 %v437_v37, %v4317_v52  ;;  %v4349_v54 = vadd.f32 %v596_v36, %v436_v35 }
 0x106   :  { %v598_v45 = vpop.f32.mrf.mxu1 }
 0x107   :  { %v599_v63 = vadd.f32 %v598_v45, %v438_v47  ;;  %v1077_v13 = vmul.f32 0.70710677, %v4349_v54 }
 0x108   :  { %v441_v49 = vpop.f32.mrf.mxu0 }
 0x109   :  { %v442_v57 = vadd.f32 %v441_v49, %v4313_v48  ;;  %v1078_v61 = vmul.f32 0.70710677, %v599_v63 }
 0x10a   :  { %v443_v62 = vpop.f32.mrf.mxu0 }
 0x10b   :  { %v602_v60 = vpop.f32.mrf.mxu1  ;;  %v444_v10 = vadd.f32 %v443_v62, %v4317_v52  ;;  %2857 = verf.f32 %v1078_v61 }
 0x10c   :  { %v4320_v3 = vadd.f32 %v602_v60, %v442_v57  ;;  %2859 = verf.f32 %v1077_v13 }
 0x10d   :  { %v604_v15 = vpop.f32.mrf.mxu1 }
 0x10e   :  { %v4323_v17 = vadd.f32 %v604_v15, %v444_v10  ;;  %v447_v20 = vpop.f32.mrf.mxu0  ;;  %v1081_v37 = vmul.f32 0.70710677, %v4320_v3 }
 0x10f   :  { %v448_v29 = vadd.f32 %v447_v20, %v4313_v48 }
 0x110   :  { %v449_v34 = vpop.f32.mrf.mxu0  ;;  %v1082_v25 = vmul.f32 0.70710677, %v4323_v17 }
 0x111   :  { %v608_v32 = vpop.f32.mrf.mxu1  ;;  %v450_v46 = vadd.f32 %v449_v34, %v4317_v52 }
 0x112   :  { %v4326_v39 = vadd.f32 %v608_v32, %v448_v29  ;;  %2861 = verf.f32 %v1082_v25 }
 0x113   :  { %v610_v51 = vpop.f32.mrf.mxu1  ;;  %2863 = verf.f32 %v1081_v37 }
 0x114   :  { %v4329_v53 = vadd.f32 %v610_v51, %v450_v46  ;;  %v453_v56 = vpop.f32.mrf.mxu0  ;;  %v1085_v20 = vmul.f32 0.70710677, %v4326_v39 }
 0x115   :  { %v454_v5 = vadd.f32 %v453_v56, %v4313_v48 }
 0x116   :  { %v455_v11 = vpop.f32.mrf.mxu0  ;;  %v1086_v10 = vmul.f32 0.70710677, %v4329_v53 }
 0x117   :  { %v614_v8 = vpop.f32.mrf.mxu1  ;;  %v456_v30 = vadd.f32 %v455_v11, %v4317_v52 }
 0x118   :  { %v4332_v19 = vadd.f32 %v614_v8, %v454_v5  ;;  %2865 = verf.f32 %v1086_v10 }
 0x119   :  { %v616_v38 = vpop.f32.mrf.mxu1  ;;  %2867 = verf.f32 %v1085_v20 }
 0x11a   :  { %v4335_v41 = vadd.f32 %v616_v38, %v456_v30  ;;  %v459_v44 = vpop.f32.mrf.mxu0  ;;  %v1089_v11 = vmul.f32 0.70710677, %v4332_v19 }
 0x11b   :  { %v460_v58 = vadd.f32 %v459_v44, %v4313_v48  ;;  %v2858_v44 = vpop.eup %2857 }
 0x11c   :  { %v461_v6 = vpop.f32.mrf.mxu0  ;;  %v1090_v56 = vmul.f32 0.70710677, %v4335_v41  ;;  %v2860_v35 = vpop.eup %2859 }
 0x11d   :  { %v620_v1 = vpop.f32.mrf.mxu1  ;;  %v462_v31 = vadd.f32 %v461_v6, %v4317_v52 }
 0x11e   :  { %v4338_v18 = vadd.f32 %v620_v1, %v460_v58  ;;  %v4379_v1 = vsub.s32 2, %v4298_v24  ;;  %2869 = verf.f32 %v1090_v56  ;;  %v1021_v56 = vmul.f32 0.5, %v4326_v39 }
 0x11f   :  { %v622_v43 = vpop.f32.mrf.mxu1  ;;  %2871 = verf.f32 %v1089_v11  ;;  %v2862_v61 = vpop.eup %2861  ;;  %v1025_v11 = vmul.f32 0.5, %v4332_v19 }
 0x120   :  { %v4342_v55 = vadd.f32 %v622_v43, %v462_v31  ;;  %v465_v22 = vpop.f32.mrf.mxu0  ;;  %6257 = vst [vmem:[#allocation8_spill] sm:$0xff] %v4379_v1  ;;  %v1093_v6 = vmul.f32 0.70710677, %v4338_v18  ;;  %v4384_v43 = vsub.s32 3, %v4298_v24  ;;  %v4393_v24 = vrot.slane %v4306_v33, %v4379_v1 }
 0x121   :  { %v466_v27 = vadd.f32 %v465_v22, %v4313_v48 }
 0x122   :  { %v467_v7 = vpop.f32.mrf.mxu0  ;;  %6258 = vst [vmem:[#allocation7_spill] sm:$0xff] %v4384_v43  ;;  %v1094_v47 = vmul.f32 0.70710677, %v4342_v55  ;;  %2873 = verf.f32 %v1093_v6 }
 0x123   :  { %v626_v50 = vpop.f32.mrf.mxu1  ;;  %v468_v26 = vadd.f32 %v467_v7, %v4317_v52 }
 0x124   :  { %v4346_v23 = vadd.f32 %v626_v50, %v466_v27  ;;  %v1206_v50 = vadd.f32 1.0, %v2858_v44  ;;  %2875 = verf.f32 %v1094_v47 }
 0x125   :  { %v628_v42 = vpop.f32.mrf.mxu1 }
 0x126   :  { %v4351_v59 = vadd.f32 %v628_v42, %v468_v26  ;;  %v471_v14 = vpop.f32.mrf.mxu0  ;;  %v1097_v13 = vmul.f32 0.70710677, %v4346_v23 }
 0x127   :  { %v472_v0 = vadd.f32 %v471_v14, %v4313_v48 }
 0x128   :  { %v473_v4 = vpop.f32.mrf.mxu0  ;;  %v1098_v42 = vmul.f32 0.70710677, %v4351_v59 }
 0x129   :  { %v632_v2 = vpop.f32.mrf.mxu1  ;;  %v474_v12 = vadd.f32 %v473_v4, %v4317_v52  ;;  %v2864_v4 = vpop.eup %2863 }
 0x12a   :  { %v4354_v9 = vadd.f32 %v632_v2, %v472_v0  ;;  %v1014_v0 = vmul.f32 0.5, %v599_v63  ;;  %v4397_v2 = vrot.slane %v4306_v33, %v4384_v43  ;;  %v1210_v33 = vadd.f32 1.0, %v2862_v61 }
 0x12b   :  { %v634_v16 = vpop.f32.mrf.mxu1  ;;  %2877 = verf.f32 %v1098_v42  ;;  %v1209_v20 = vadd.f32 1.0, %v2864_v4 }
 0x12c   :  { %v4358_v21 = vadd.f32 %v634_v16, %v474_v12  ;;  %v477_v36 = vpop.f32.mrf.mxu0  ;;  %v1205_v12 = vadd.f32 1.0, %v2860_v35  ;;  %v4403_v63 = vmul.f32 %v1206_v50, %v1014_v0  ;;  %v1101_v37 = vmul.f32 0.70710677, %v4354_v9 }
 0x12d   :  { %v478_v45 = vadd.f32 %v477_v36, %v4313_v48  ;;  %v1013_v36 = vmul.f32 0.5, %v4349_v54  ;;  %2879 = verf.f32 %v1097_v13  ;;  %v1029_v0 = vmul.f32 0.5, %v4338_v18 }
 0x12e   :  { %v479_v57 = vpop.f32.mrf.mxu0  ;;  %6259 = vst [vmem:[#allocation10_spill] sm:$0xff] %v4403_v63  ;;  %2881 = verf.f32 %v1101_v37 }
 0x12f   :  { %v638_v49 = vpop.f32.mrf.mxu1  ;;  %v480_v62 = vadd.f32 %v479_v57, %v4317_v52  ;;  %v1102_v57 = vmul.f32 0.70710677, %v4358_v21 }
 0x130   :  { %v4363_v60 = vadd.f32 %v638_v49, %v478_v45  ;;  %v1017_v49 = vmul.f32 0.5, %v4320_v3  ;;  %v1022_v3 = vmul.f32 0.5, %v4329_v53 }
 0x131   :  { %v640_v15 = vpop.f32.mrf.mxu1  ;;  %2883 = verf.f32 %v1102_v57 }
 0x132   :  { %v4368_v29 = vadd.f32 %v640_v15, %v480_v62  ;;  %v2866_v15 = vpop.eup %2865  ;;  %v4425_v39 = vmul.f32 %v1209_v20, %v1017_v49  ;;  %v1105_v47 = vmul.f32 0.70710677, %v4363_v60 }
 0x133   :  { %v483_v32 = vpop.f32.mrf.mxu0 }
 0x134   :  { %v484_v34 = vadd.f32 %v483_v32, %v4313_v48  ;;  %v1018_v32 = vmul.f32 0.5, %v4323_v17  ;;  %v1431_v17 = vmul.f32 %v4403_v63, %v4403_v63  ;;  %6262 = vst [vmem:[#allocation11_spill] sm:$0xff] %v4425_v39  ;;  %v1434_v18 = vmul.f32 %v4425_v39, %v4425_v39 }
 0x135   :  { %v644_v46 = vpop.f32.mrf.mxu1  ;;  %v485_v51 = vpop.f32.mrf.mxu0 }
 0x136   :  { %v4372_v5 = vadd.f32 %v644_v46, %v484_v34  ;;  %v486_v8 = vadd.f32 %v485_v51, %v4317_v52  ;;  %v2868_v46 = vpop.eup %2867  ;;  %v4413_v51 = vmul.f32 %v1205_v12, %v1013_v36  ;;  %v4421_v44 = vmul.f32 %v1210_v33, %v1018_v32 }
 0x137   :  { %v646_v30 = vpop.f32.mrf.mxu1  ;;  %v1213_v53 = vadd.f32 1.0, %v2868_v46  ;;  %v1030_v32 = vmul.f32 0.5, %v4342_v55 }
 0x138   :  { %v4376_v38 = vadd.f32 %v646_v30, %v486_v8  ;;  %6260 = vst [vmem:[#allocation9_spill] sm:$0xff] %v4413_v51  ;;  %v1106_v30 = vmul.f32 0.70710677, %v4368_v29  ;;  %6261 = vst [vmem:[#allocation12_spill] sm:$0xff] %v4421_v44  ;;  %v4433_v42 = vadd.f32 %v4403_v63, %v4413_v51  ;;  %v1109_v13 = vmul.f32 0.70710677, %v4372_v5 }
 0x139   :  { %v489_v58 = vpop.f32.mrf.mxu0  ;;  %v1435_v37 = vmul.f32 %v4421_v44, %v4421_v44 }
 0x13a   :  { %v490_v31 = vadd.f32 %v489_v58, %v4313_v48  ;;  %v1214_v58 = vadd.f32 1.0, %v2866_v15  ;;  %v1110_v35 = vmul.f32 0.70710677, %v4376_v38  ;;  %2885 = verf.f32 %v1106_v30 }
 0x13b   :  { %v650_v22 = vpop.f32.mrf.mxu1  ;;  %v491_v27 = vpop.f32.mrf.mxu0  ;;  %2887 = verf.f32 %v1105_v47 }
 0x13c   :  { %v4387_v7 = vadd.f32 %v650_v22, %v490_v31  ;;  %v492_v26 = vadd.f32 %v491_v27, %v4317_v52  ;;  %v2870_v22 = vpop.eup %2869  ;;  %v1026_v27 = vmul.f32 0.5, %v4335_v41  ;;  %v4441_v41 = vmul.f32 %v1214_v58, %v1022_v3 }
 0x13d   :  { %v652_v14 = vpop.f32.mrf.mxu1  ;;  %v2872_v61 = vpop.eup %2871  ;;  %v1218_v49 = vadd.f32 1.0, %v2870_v22  ;;  %2889 = verf.f32 %v1110_v35  ;;  %v1033_v3 = vmul.f32 0.5, %v4346_v23 }
 0x13e   :  { %v4400_v16 = vadd.f32 %v652_v14, %v492_v26  ;;  %v1430_v14 = vmul.f32 %v4413_v51, %v4413_v51  ;;  %6263 = vst [vmem:[#allocation13_spill] sm:$0xff] %v4441_v41  ;;  %v2874_v33 = vpop.eup %2873  ;;  %v1217_v57 = vadd.f32 1.0, %v2872_v61  ;;  %2891 = verf.f32 %v1109_v13 }
 0x13f   :  { %v495_v25 = vpop.f32.mrf.mxu0  ;;  %v2876_v20 = vpop.eup %2875  ;;  %v1439_v58 = vmul.f32 %v4441_v41, %v4441_v41  ;;  %v4467_v55 = vmul.f32 %v1218_v49, %v1026_v27  ;;  %v1221_v23 = vadd.f32 1.0, %v2874_v33  ;;  %v1038_v33 = vmul.f32 0.5, %v4358_v21 }
 0x140   :  { %v496_v45 = vadd.f32 %v495_v25, %v4313_v48  ;;  %v4444_v36 = vadd.f32 %v1431_v17, %v1430_v14  ;;  %v4463_v17 = vadd.f32 %v1435_v37, %v1434_v18  ;;  %v4474_v22 = vmul.f32 %v1217_v57, %v1025_v11 }
 0x141   :  { %v656_v62 = vpop.f32.mrf.mxu1  ;;  %v497_v10 = vpop.f32.mrf.mxu0  ;;  %6265 = vst [vmem:[#allocation15_spill] sm:$0xff] %v4467_v55  ;;  %v1222_v35 = vadd.f32 1.0, %v2876_v20  ;;  %v1034_v14 = vmul.f32 0.5, %v4351_v59 }
 0x142   :  { %v4410_v34 = vadd.f32 %v656_v62, %v496_v45  ;;  %v498_v54 = vadd.f32 %v497_v10, %v4317_v52  ;;  %v4448_v45 = vmul.f32 %v1213_v53, %v1021_v56  ;;  %v1114_v62 = vmul.f32 0.70710677, %v4400_v16  ;;  %6266 = vst [vmem:[#allocation16_spill] sm:$0xff] %v4474_v22 }
 0x143   :  { %v658_v8 = vpop.f32.mrf.mxu1  ;;  %v4460_v56 = vadd.f32 %v4421_v44, %v4425_v39  ;;  %v4494_v20 = vmul.f32 %v1222_v35, %v1030_v32 }
 0x144   :  { %v4423_v6 = vadd.f32 %v658_v8, %v498_v54  ;;  %6264 = vst [vmem:[#allocation14_spill] sm:$0xff] %v4448_v45  ;;  %v1113_v54 = vmul.f32 0.70710677, %v4387_v7  ;;  %2893 = verf.f32 %v1114_v62  ;;  %v4481_v27 = vadd.f32 %v4441_v41, %v4448_v45 }
 0x145   :  { %v501_v31 = vpop.f32.mrf.mxu0  ;;  %v1117_v11 = vmul.f32 0.70710677, %v4410_v34  ;;  %v1443_v62 = vmul.f32 %v4467_v55, %v4467_v55  ;;  %6268 = vst [vmem:[#allocation18_spill] sm:$0xff] %v4494_v20 }
 0x146   :  { %v502_v19 = vadd.f32 %v501_v31, %v4313_v48  ;;  %v2878_v31 = vpop.eup %2877  ;;  %2895 = verf.f32 %v1113_v54  ;;  %v1118_v59 = vmul.f32 0.70710677, %v4423_v6 }
 0x147   :  { %v662_v50 = vpop.f32.mrf.mxu1  ;;  %v503_v26 = vpop.f32.mrf.mxu0  ;;  %v1226_v13 = vadd.f32 1.0, %v2878_v31  ;;  %v4504_v31 = vadd.f32 %v4467_v55, %v4474_v22  ;;  %2897 = verf.f32 %v1117_v11 }
 0x148   :  { %v4438_v4 = vadd.f32 %v662_v50, %v502_v19  ;;  %v504_v12 = vadd.f32 %v503_v26, %v4317_v52  ;;  %v1438_v19 = vmul.f32 %v4448_v45, %v4448_v45  ;;  %v2880_v26 = vpop.eup %2879  ;;  %2899 = verf.f32 %v1118_v59 }
 0x149   :  { %v664_v25 = vpop.f32.mrf.mxu1 }
 0x14a   :  { %v4453_v10 = vadd.f32 %v664_v25, %v504_v12  ;;  %v2882_v12 = vpop.eup %2881  ;;  %v1037_v25 = vmul.f32 0.5, %v4354_v9  ;;  %v4485_v49 = vadd.f32 %v1439_v58, %v1438_v19  ;;  %v1225_v9 = vadd.f32 1.0, %v2880_v26 }
 0x14b   :  { %v507_v15 = vpop.f32.mrf.mxu0  ;;  %v2884_v18 = vpop.eup %2883  ;;  %v1229_v32 = vadd.f32 1.0, %v2882_v12  ;;  %v1447_v12 = vmul.f32 %v4494_v20, %v4494_v20 }
 0x14c   :  { %v508_v46 = vadd.f32 %v507_v15, %v4313_v48  ;;  %v4492_v15 = vmul.f32 %v1221_v23, %v1029_v0  ;;  %v2886_v0 = vpop.eup %2885  ;;  %v1230_v19 = vadd.f32 1.0, %v2884_v18  ;;  %v1122_v35 = vmul.f32 0.70710677, %v4453_v10 }
 0x14d   :  { %v668_v8 = vpop.f32.mrf.mxu1  ;;  %v509_v30 = vpop.f32.mrf.mxu0  ;;  %v1234_v11 = vadd.f32 1.0, %v2886_v0  ;;  %v1121_v18 = vmul.f32 0.70710677, %v4438_v4 }
 0x14e   :  { %v4469_v53 = vadd.f32 %v668_v8, %v508_v46  ;;  %v510_v47 = vadd.f32 %v509_v30, %v4317_v52  ;;  %6267 = vst [vmem:[#allocation17_spill] sm:$0xff] %v4492_v15  ;;  %v1442_v8 = vmul.f32 %v4474_v22, %v4474_v22  ;;  %v1041_v30 = vmul.f32 0.5, %v4363_v60  ;;  %v2888_v26 = vpop.eup %2887 }
 0x14f   :  { %v670_v50 = vpop.f32.mrf.mxu1  ;;  %2901 = verf.f32 %v1122_v35  ;;  %v1046_v22 = vmul.f32 0.5, %v4376_v38  ;;  %v1049_v38 = vmul.f32 0.5, %v4387_v7 }
 0x150   :  { %v4477_v61 = vadd.f32 %v670_v50, %v510_v47  ;;  %v4506_v47 = vmul.f32 %v1226_v13, %v1034_v14  ;;  %v4511_v60 = vadd.f32 %v1443_v62, %v1442_v8  ;;  %v1446_v14 = vmul.f32 %v4492_v15, %v4492_v15  ;;  %v2890_v13 = vpop.eup %2889 }
 0x151   :  { %v513_v37 = vpop.f32.mrf.mxu0  ;;  %v4524_v62 = vadd.f32 %v4494_v20, %v4492_v15  ;;  %v2892_v0 = vpop.eup %2891  ;;  %2903 = verf.f32 %v1121_v18 }
 0x152   :  { %v514_v57 = vadd.f32 %v513_v37, %v4313_v48  ;;  %6269 = vst [vmem:[#allocation19_spill] sm:$0xff] %v4506_v47  ;;  %v4513_v37 = vmul.f32 %v1225_v9, %v1033_v3  ;;  %v4526_v3 = vmul.f32 %v1229_v32, %v1037_v25  ;;  %v1045_v9 = vmul.f32 0.5, %v4372_v5 }
 0x153   :  { %v674_v54 = vpop.f32.mrf.mxu1  ;;  %v515_v46 = vpop.f32.mrf.mxu0  ;;  %v1238_v25 = vadd.f32 1.0, %v2890_v13 }
 0x154   :  { %v4499_v21 = vadd.f32 %v674_v54, %v514_v57  ;;  %v516_v58 = vadd.f32 %v515_v46, %v4317_v52  ;;  %6270 = vst [vmem:[#allocation20_spill] sm:$0xff] %v4513_v37  ;;  %v1042_v57 = vmul.f32 0.5, %v4368_v29  ;;  %6271 = vst [vmem:[#allocation21_spill] sm:$0xff] %v4526_v3  ;;  %v4528_v29 = vmul.f32 %v1230_v19, %v1038_v33  ;;  %v2894_v19 = vpop.eup %2893 }
 0x155   :  { %v676_v23 = vpop.f32.mrf.mxu1  ;;  %v4537_v33 = vadd.f32 %v1447_v12, %v1446_v14  ;;  %v1450_v5 = vmul.f32 %v4513_v37, %v4513_v37  ;;  %v4547_v35 = vadd.f32 %v4506_v47, %v4513_v37  ;;  %v1125_v14 = vmul.f32 0.70710677, %v4469_v53 }
 0x156   :  { %v4509_v50 = vadd.f32 %v676_v23, %v516_v58  ;;  %6272 = vst [vmem:[#allocation22_spill] sm:$0xff] %v4528_v29  ;;  %v1451_v58 = vmul.f32 %v4506_v47, %v4506_v47  ;;  %v1233_v23 = vadd.f32 1.0, %v2888_v26  ;;  %v4541_v20 = vmul.f32 %v1234_v11, %v1042_v57  ;;  %v2896_v26 = vpop.eup %2895 }
 0x157   :  { %v519_v54 = vpop.f32.mrf.mxu0  ;;  %v1454_v11 = vmul.f32 %v4526_v3, %v4526_v3  ;;  %v1455_v18 = vmul.f32 %v4528_v29, %v4528_v29  ;;  %v1242_v7 = vadd.f32 1.0, %v2894_v19  ;;  %2905 = verf.f32 %v1125_v14  ;;  %v2898_v19 = vpop.eup %2897 }
 0x158   :  { %v520_v59 = vadd.f32 %v519_v54, %v4313_v48  ;;  %6273 = vst [vmem:[#allocation23_spill] sm:$0xff] %v4541_v20  ;;  %v4551_v13 = vadd.f32 %v1451_v58, %v1450_v5  ;;  %v1241_v5 = vadd.f32 1.0, %v2896_v26  ;;  %v1054_v26 = vmul.f32 0.5, %v4423_v6 }
 0x159   :  { %v680_v46 = vpop.f32.mrf.mxu1  ;;  %v521_v8 = vpop.f32.mrf.mxu0  ;;  %v4637_v45 = vmul.f32 0.5, %v4499_v21 }
 0x15a   :  { %v4533_v55 = vadd.f32 %v680_v46, %v520_v59  ;;  %v522_v54 = vadd.f32 %v521_v8, %v4317_v52  ;;  %v1237_v59 = vadd.f32 1.0, %v2892_v0  ;;  %v4553_v46 = vmul.f32 %v1233_v23, %v1041_v30 }
 0x15b   :  { %v682_v32 = vpop.f32.mrf.mxu1  ;;  %v4560_v8 = vmul.f32 %v1238_v25, %v1046_v22  ;;  %v1050_v0 = vmul.f32 0.5, %v4400_v16  ;;  %v1459_v23 = vmul.f32 %v4541_v20, %v4541_v20  ;;  %v1053_v22 = vmul.f32 0.5, %v4410_v34 }
 0x15c   :  { %v4543_v15 = vadd.f32 %v682_v32, %v522_v54  ;;  %6274 = vst [vmem:[#allocation24_spill] sm:$0xff] %v4553_v46  ;;  %v1126_v54 = vmul.f32 0.70710677, %v4477_v61  ;;  %v4574_v16 = vadd.f32 %v4528_v29, %v4526_v3  ;;  %v4591_v6 = vmul.f32 %v1241_v5, %v1049_v38 }
 0x15d   :  { %v525_v12 = vpop.f32.mrf.mxu0  ;;  %6275 = vst [vmem:[#allocation25_spill] sm:$0xff] %v4560_v8  ;;  %v4585_v34 = vmul.f32 %v1242_v7, %v1050_v0  ;;  %v1058_v0 = vmul.f32 0.5, %v4453_v10  ;;  %v1129_v7 = vmul.f32 0.70710677, %v4499_v21  ;;  %v4614_v10 = vmul.f32 0.5, %v4477_v61 }
 0x15e   :  { %v526_v57 = vadd.f32 %v525_v12, %v4313_v48  ;;  %v4569_v12 = vmul.f32 %v1237_v59, %v1045_v9  ;;  %v4583_v9 = vadd.f32 %v4541_v20, %v4553_v46  ;;  %v2900_v59 = vpop.eup %2899  ;;  %2907 = verf.f32 %v1126_v54  ;;  %6278 = vst [vmem:[#allocation28_spill] sm:$0xff] %v4591_v6 }
 0x15f   :  { %v686_v32 = vpop.f32.mrf.mxu1  ;;  %v527_v58 = vpop.f32.mrf.mxu0  ;;  %6277 = vst [vmem:[#allocation27_spill] sm:$0xff] %v4585_v34  ;;  %v1245_v20 = vadd.f32 1.0, %v2898_v19  ;;  %v4611_v19 = vmul.f32 0.5, %v4469_v53  ;;  %v1466_v53 = vmul.f32 %v4591_v6, %v4591_v6  ;;  %2909 = verf.f32 %v1129_v7 }
 0x160   :  { %v4564_v30 = vadd.f32 %v686_v32, %v526_v57  ;;  %v528_v48 = vadd.f32 %v527_v58, %v4317_v52  ;;  %6276 = vst [vmem:[#allocation26_spill] sm:$0xff] %v4569_v12  ;;  %v4577_v57 = vadd.f32 %v1455_v18, %v1454_v11  ;;  %v1458_v52 = vmul.f32 %v4553_v46, %v4553_v46 }
 0x161   :  { %v688_v25 = vpop.f32.mrf.mxu1  ;;  %v1463_v58 = vmul.f32 %v4560_v8, %v4560_v8  ;;  %v4594_v11 = vmul.f32 0.5, %v4438_v4  ;;  %v1246_v46 = vadd.f32 1.0, %v2900_v59  ;;  %v4608_v5 = vadd.f32 %v4560_v8, %v4569_v12 }
 0x162   :  { %v4587_v14 = vadd.f32 %v688_v25, %v528_v48  ;;  %v4597_v29 = vadd.f32 %v1459_v23, %v1458_v52  ;;  %v1462_v25 = vmul.f32 %v4569_v12, %v4569_v12  ;;  %v2902_v23 = vpop.eup %2901  ;;  %v1467_v59 = vmul.f32 %v4585_v34, %v4585_v34 }
 0x163   :  { %v757_v32 = vpop.f32.mrf.mxu0  ;;  %v2904_v61 = vpop.eup %2903  ;;  %v4628_v8 = vmul.f32 %v1245_v20, %v1053_v22  ;;  %v4633_v37 = vmul.f32 %v1246_v46, %v1054_v26  ;;  %v1250_v41 = vadd.f32 1.0, %v2902_v23  ;;  %v4648_v26 = vmul.f32 0.5, %v4509_v50 }
 0x164   :  { %v758_v18 = vadd.f32 %v757_v32, %v4393_v24  ;;  %v4616_v3 = vadd.f32 %v1463_v58, %v1462_v25 }
 0x165   :  { %v918_v54 = vpop.f32.mrf.mxu1  ;;  %v759_v48 = vpop.f32.mrf.mxu0  ;;  %6279 = vst [vmem:[#allocation29_spill] sm:$0xff] %v4628_v8  ;;  %6280 = vst [vmem:[#allocation30_spill] sm:$0xff] %v4633_v37 }
 0x166   :  { %v4603_v38 = vadd.f32 %v918_v54, %v758_v18  ;;  %v760_v4 = vadd.f32 %v759_v48, %v4397_v2  ;;  %v1130_v18 = vmul.f32 0.70710677, %v4509_v50  ;;  %v4624_v48 = vadd.f32 %v4585_v34, %v4591_v6 }
 0x167   :  { %v920_v52 = vpop.f32.mrf.mxu1  ;;  %v763_v32 = vpop.f32.mrf.mxu0 }
 0x168   :  { %v1079_v54 = vmul.f32 0.70710677, %v4603_v38  ;;  %v4630_v58 = vadd.f32 %v920_v52, %v760_v4  ;;  %v764_v25 = vadd.f32 %v763_v32, %v4393_v24  ;;  %v4642_v4 = vadd.f32 %v1467_v59, %v1466_v53 }
 0x169   :  { %v924_v12 = vpop.f32.mrf.mxu1  ;;  %v765_v47 = vpop.f32.mrf.mxu0  ;;  %v1249_v52 = vadd.f32 1.0, %v2904_v61  ;;  %v4653_v59 = vmul.f32 %v1250_v41, %v1058_v0  ;;  %v1471_v53 = vmul.f32 %v4633_v37, %v4633_v37 }
 0x16a   :  { %2911 = verf.f32 %v1079_v54  ;;  %v766_v34 = vadd.f32 %v765_v47, %v4397_v2  ;;  %v1080_v6 = vmul.f32 0.70710677, %v4630_v58  ;;  %v4640_v20 = vadd.f32 %v924_v12, %v764_v25  ;;  %v2906_v54 = vpop.eup %2905 }
 0x16b   :  { %v926_v22 = vpop.f32.mrf.mxu1  ;;  %v769_v7 = vpop.f32.mrf.mxu0  ;;  %2913 = verf.f32 %v1130_v18  ;;  %v1470_v12 = vmul.f32 %v4628_v8, %v4628_v8  ;;  %6281 = vst [vmem:[#allocation31_spill] sm:$0xff] %v4653_v59  ;;  %v1133_v18 = vmul.f32 0.70710677, %v4533_v55  ;;  %v4667_v0 = vmul.f32 %v1249_v52, %v4594_v11 }
 0x16c   :  { %v4644_v32 = vadd.f32 %v926_v22, %v766_v34  ;;  %v770_v46 = vadd.f32 %v769_v7, %v4393_v24  ;;  %2915 = verf.f32 %v1080_v6  ;;  %v1083_v21 = vmul.f32 0.70710677, %v4640_v20  ;;  %v2908_v41 = vpop.eup %2907 }
 0x16d   :  { %v771_v47 = vpop.f32.mrf.mxu0  ;;  %v930_v23 = vpop.f32.mrf.mxu1  ;;  %v4664_v22 = vadd.f32 %v4633_v37, %v4628_v8  ;;  %6283 = vst [vmem:[#allocation33_spill] sm:$0xff] %v4667_v0  ;;  %v1134_v7 = vmul.f32 0.70710677, %v4543_v15  ;;  %v1137_v8 = vmul.f32 0.70710677, %v4564_v30  ;;  %v4678_v11 = vadd.f32 %v1471_v53, %v1470_v12 }
 0x16e   :  { %v1084_v34 = vmul.f32 0.70710677, %v4644_v32  ;;  %2917 = verf.f32 %v1083_v21  ;;  %v772_v50 = vadd.f32 %v771_v47, %v4397_v2  ;;  %v4660_v6 = vadd.f32 %v930_v23, %v770_v46 }
 0x16f   :  { %v775_v61 = vpop.f32.mrf.mxu0  ;;  %v932_v25 = vpop.f32.mrf.mxu1  ;;  %6282 = vst [vmem:[#allocation32_spill] sm:$0xff] %v4664_v22  ;;  %v1253_v21 = vadd.f32 1.0, %v2906_v54  ;;  %v4672_v47 = vmul.f32 0.5, %v4533_v55  ;;  %6285 = vst [vmem:[#allocation35_spill] sm:$0xff] %v4678_v11  ;;  %v1475_v52 = vmul.f32 %v4653_v59, %v4653_v59  ;;  %v4683_v54 = vmul.f32 0.5, %v4543_v15 }
 0x170   :  { %2919 = verf.f32 %v1084_v34  ;;  %v776_v44 = vadd.f32 %v775_v61, %v4393_v24  ;;  %v1087_v46 = vmul.f32 0.70710677, %v4660_v6  ;;  %v4675_v23 = vadd.f32 %v932_v25, %v772_v50 }
 0x171   :  { %6284 = vst [vmem:[#allocation34_spill] sm:$0xff] %v4672_v47  ;;  %v777_v39 = vpop.f32.mrf.mxu0  ;;  %v936_v37 = vpop.f32.mrf.mxu1  ;;  %2921 = verf.f32 %v1133_v18  ;;  %v1254_v34 = vadd.f32 1.0, %v2908_v41  ;;  %6286 = vst [vmem:[#allocation36_spill] sm:$0xff] %v4683_v54  ;;  %v1474_v12 = vmul.f32 %v4667_v0, %v4667_v0  ;;  %v4693_v53 = vmul.f32 %v1253_v21, %v4611_v19 }
 0x172   :  { %v1088_v55 = vmul.f32 0.70710677, %v4675_v23  ;;  %v778_v61 = vadd.f32 %v777_v39, %v4397_v2  ;;  %2923 = verf.f32 %v1134_v7  ;;  %v4687_v63 = vadd.f32 %v936_v37, %v776_v44  ;;  %v2910_v44 = vpop.eup %2909 }
 0x173   :  { %v781_v50 = vpop.f32.mrf.mxu0  ;;  %v938_v25 = vpop.f32.mrf.mxu1  ;;  %6287 = vst [vmem:[#allocation37_spill] sm:$0xff] %v4693_v53  ;;  %v4696_v15 = vmul.f32 0.5, %v4564_v30  ;;  %2925 = verf.f32 %v1087_v46  ;;  %v4700_v39 = vadd.f32 %v4653_v59, %v4667_v0  ;;  %v4708_v21 = vmul.f32 %v1254_v34, %v4614_v10 }
 0x174   :  { %v782_v18 = vadd.f32 %v781_v50, %v4393_v24  ;;  %2927 = verf.f32 %v1137_v8  ;;  %v4705_v50 = vadd.f32 %v1475_v52, %v1474_v12  ;;  %v1015_v30 = vmul.f32 0.5, %v4603_v38 }
 0x175   :  { %6288 = vst [vmem:[#allocation38_spill] sm:$0xff] %v4696_v15  ;;  %v783_v41 = vpop.f32.mrf.mxu0  ;;  %v942_v51 = vpop.f32.mrf.mxu1  ;;  %6289 = vst [vmem:[#allocation39_spill] sm:$0xff] %v4700_v39  ;;  %2929 = verf.f32 %v1088_v55  ;;  %v4711_v46 = vadd.f32 %v938_v25, %v778_v61  ;;  %v1091_v8 = vmul.f32 0.70710677, %v4687_v63  ;;  %v1138_v10 = vmul.f32 0.70710677, %v4587_v14 }
 0x176   :  { %v784_v37 = vadd.f32 %v783_v41, %v4397_v2  ;;  %v4703_v7 = vadd.f32 %v942_v51, %v782_v18  ;;  %6290 = vst [vmem:[#allocation40_spill] sm:$0xff] %v4705_v50  ;;  %6291 = vst [vmem:[#allocation41_spill] sm:$0xff] %v4708_v21  ;;  %v4717_v18 = vmul.f32 0.5, %v4587_v14  ;;  %v4724_v61 = vmul.f32 %v4693_v53, %v4693_v53 }
 0x177   :  { %v2912_v19 = vpop.eup %2911  ;;  %v787_v43 = vpop.f32.mrf.mxu0  ;;  %v4726_v12 = vadd.f32 1.0, %v2910_v44  ;;  %v1016_v1 = vmul.f32 0.5, %v4630_v58  ;;  %v1092_v14 = vmul.f32 0.70710677, %v4711_v46 }
 0x178   :  { %v944_v59 = vpop.f32.mrf.mxu1  ;;  %v1207_v0 = vadd.f32 1.0, %v2912_v19  ;;  %v1095_v41 = vmul.f32 0.70710677, %v4703_v7  ;;  %v788_v51 = vadd.f32 %v787_v43, %v4393_v24  ;;  %v2914_v52 = vpop.eup %2913  ;;  %6292 = vst [vmem:[#allocation42_spill] sm:$0xff] %v4717_v18  ;;  %6293 = vst [vmem:[#allocation43_spill] sm:$0xff] %v4724_v61 }
 0x179   :  { %v4720_v34 = vadd.f32 %v944_v59, %v784_v37  ;;  %v789_v38 = vpop.f32.mrf.mxu0  ;;  %v2916_v25 = vpop.eup %2915 }
 0x17a   :  { %v948_v55 = vpop.f32.mrf.mxu1  ;;  %v4728_v19 = vmul.f32 %v1207_v0, %v1015_v30  ;;  %2931 = verf.f32 %v1095_v41  ;;  %v790_v43 = vadd.f32 %v789_v38, %v4397_v2  ;;  %v1208_v28 = vadd.f32 1.0, %v2916_v25 }
 0x17b   :  { %v1096_v59 = vmul.f32 0.70710677, %v4720_v34  ;;  %v793_v37 = vpop.f32.mrf.mxu0  ;;  %v2918_v18 = vpop.eup %2917  ;;  %2933 = verf.f32 %v1091_v8  ;;  %v4734_v15 = vadd.f32 %v948_v55, %v788_v51  ;;  %v1019_v25 = vmul.f32 0.5, %v4640_v20 }
 0x17c   :  { %6294 = vst [vmem:[#allocation44_spill] sm:$0xff] %v4728_v19  ;;  %v950_v40 = vpop.f32.mrf.mxu1  ;;  %v794_v44 = vadd.f32 %v793_v37, %v4393_v24  ;;  %v1211_v41 = vadd.f32 1.0, %v2918_v18  ;;  %v4739_v50 = vmul.f32 %v1208_v28, %v1016_v1  ;;  %v1334_v39 = vadd.f32 %v4433_v42, %v4728_v19 }
 0x17d   :  { %v4737_v0 = vadd.f32 %v950_v40, %v790_v43  ;;  %v2920_v30 = vpop.eup %2919  ;;  %2935 = verf.f32 %v1096_v59  ;;  %v795_v38 = vpop.f32.mrf.mxu0  ;;  %v4746_v8 = vadd.f32 %v4708_v21, %v4693_v53  ;;  %v4750_v40 = vmul.f32 %v4708_v21, %v4708_v21 }
 0x17e   :  { %v954_v58 = vpop.f32.mrf.mxu1  ;;  %6295 = vst [vmem:[#allocation45_spill] sm:$0xff] %v4739_v50  ;;  %2937 = verf.f32 %v1138_v10  ;;  %v4752_v51 = vpop.eup %2921  ;;  %v796_v28 = vadd.f32 %v795_v38, %v4397_v2  ;;  %v1335_v10 = vadd.f32 %v1334_v39, %v4739_v50  ;;  %v1212_v20 = vadd.f32 1.0, %v2920_v30 }
 0x17f   :  { %6296 = vst [vmem:[#allocation46_spill] sm:$0xff] %v4746_v8  ;;  %6297 = vst [vmem:[#allocation47_spill] sm:$0xff] %v4750_v40  ;;  %2939 = verf.f32 %v1092_v14  ;;  %v4755_v1 = vadd.f32 %v954_v58, %v794_v44  ;;  %v799_v18 = vpop.f32.mrf.mxu0  ;;  %v1099_v55 = vmul.f32 0.70710677, %v4734_v15  ;;  %v1432_v59 = vmul.f32 %v4728_v19, %v4728_v19  ;;  %v4762_v37 = vpop.eup %2923 }
 0x180   :  { %v956_v42 = vpop.f32.mrf.mxu1  ;;  %v800_v43 = vadd.f32 %v799_v18, %v4393_v24  ;;  %v4764_v21 = vadd.f32 1.0, %v2914_v52  ;;  %v4766_v14 = vmul.f32 %v1211_v41, %v1019_v25  ;;  %v1020_v44 = vmul.f32 0.5, %v4644_v32  ;;  %1336 = vadd.xlane.f32.xlu0 %v1335_v10  ;;  %v2926_v58 = vpop.eup %2925 }
 0x181   :  { %v1100_v38 = vmul.f32 0.70710677, %v4737_v0  ;;  %v801_v39 = vpop.f32.mrf.mxu0  ;;  %v4770_v53 = vadd.f32 %v956_v42, %v796_v28  ;;  %v1433_v19 = vmul.f32 %v4739_v50, %v4739_v50  ;;  %v1495_v52 = vadd.f32 %v4444_v36, %v1432_v59  ;;  %v4776_v8 = vpop.eup %2927 }
 0x182   :  { %6298 = vst [vmem:[#allocation48_spill] sm:$0xff] %v4764_v21  ;;  %v960_v30 = vpop.f32.mrf.mxu1  ;;  %v802_v18 = vadd.f32 %v801_v39, %v4397_v2  ;;  %6299 = vst [vmem:[#allocation49_spill] sm:$0xff] %v4776_v8  ;;  %v1023_v41 = vmul.f32 0.5, %v4660_v6  ;;  %v1024_v32 = vmul.f32 0.5, %v4675_v23  ;;  %v1103_v25 = vmul.f32 0.70710677, %v4755_v1  ;;  %v2930_v42 = vpop.eup %2929 }
 0x183   :  { %v4781_v10 = vadd.f32 %v960_v30, %v800_v43  ;;  %v805_v22 = vpop.f32.mrf.mxu0  ;;  %v4783_v54 = vmul.f32 %v1212_v20, %v1020_v44  ;;  %v4786_v39 = vmul.f32 0.5, %v4687_v63  ;;  %v4789_v36 = vmul.f32 0.5, %v4711_v46 }
 0x184   :  { %v962_v28 = vpop.f32.mrf.mxu1  ;;  %2941 = verf.f32 %v1099_v55  ;;  %v1215_v59 = vadd.f32 1.0, %v2926_v58  ;;  %v806_v6 = vadd.f32 %v805_v22, %v4393_v24  ;;  %v1496_v50 = vadd.f32 %v1495_v52, %v1433_v19 }
 0x185   :  { %v4792_v23 = vadd.f32 %v962_v28, %v802_v18  ;;  %v807_v43 = vpop.f32.mrf.mxu0  ;;  %2943 = verf.f32 %v1100_v38  ;;  %v1104_v8 = vmul.f32 0.70710677, %v4770_v53  ;;  %v1436_v63 = vmul.f32 %v4766_v14, %v4766_v14 }
 0x186   :  { %v966_v30 = vpop.f32.mrf.mxu1  ;;  %v808_v20 = vadd.f32 %v807_v43, %v4397_v2  ;;  %v1216_v46 = vadd.f32 1.0, %v2930_v42  ;;  %v1031_v55 = vmul.f32 0.5, %v4703_v7  ;;  %2945 = verf.f32 %v1103_v25  ;;  %1497 = vadd.xlane.f32.xlu0 %v1496_v50 }
 0x187   :  { %v2932_v44 = vpop.eup %2931  ;;  %v1107_v22 = vmul.f32 0.70710677, %v4781_v10  ;;  %v811_v58 = vpop.f32.mrf.mxu0  ;;  %v1108_v18 = vmul.f32 0.70710677, %v4792_v23  ;;  %v4801_v38 = vadd.f32 %v966_v30, %v806_v6  ;;  %v1437_v52 = vmul.f32 %v4783_v54, %v4783_v54 }
 0x188   :  { %v968_v19 = vpop.f32.mrf.mxu1  ;;  %v1500_v28 = vadd.f32 %v4463_v17, %v1436_v63  ;;  %v2934_v43 = vpop.eup %2933  ;;  %v4806_v47 = vmul.f32 %v1215_v59, %v1023_v41  ;;  %v1032_v7 = vmul.f32 0.5, %v4720_v34  ;;  %v812_v25 = vadd.f32 %v811_v58, %v4393_v24 }
 0x189   :  { %v4810_v42 = vadd.f32 %v968_v19, %v808_v20  ;;  %v813_v50 = vpop.f32.mrf.mxu0  ;;  %v1223_v61 = vadd.f32 1.0, %v2932_v44  ;;  %2947 = verf.f32 %v1104_v8  ;;  %v1111_v6 = vmul.f32 0.70710677, %v4801_v38 }
 0x18a   :  { %6300 = vst [vmem:[#allocation50_spill] sm:$0xff] %v4806_v47  ;;  %v972_v11 = vpop.f32.mrf.mxu1  ;;  %v2936_v40 = vpop.eup %2935  ;;  %v1501_v30 = vadd.f32 %v1500_v28, %v1437_v52  ;;  %v4815_v17 = vmul.f32 %v1216_v46, %v1024_v32  ;;  %v4818_v41 = vmul.f32 0.5, %v4734_v15  ;;  %2949 = verf.f32 %v1107_v22 }
 0x18b   :  { %v4813_v21 = vpop.eup %2937  ;;  %v1339_v34 = vadd.f32 %v4460_v56, %v4766_v14  ;;  %v817_v59 = vpop.f32.mrf.mxu0  ;;  %v1219_v58 = vadd.f32 1.0, %v2934_v43  ;;  %2951 = verf.f32 %v1108_v18  ;;  %v814_v8 = vadd.f32 %v813_v50, %v4397_v2 }
 0x18c   :  { %6301 = vst [vmem:[#allocation51_spill] sm:$0xff] %v4815_v17  ;;  %v974_v20 = vpop.f32.mrf.mxu1  ;;  %v2940_v63 = vpop.eup %2939  ;;  %1502 = vadd.xlane.f32.xlu1 %v1501_v30  ;;  %v4823_v44 = vadd.f32 %v972_v11, %v812_v25  ;;  %v1224_v19 = vadd.f32 1.0, %v2936_v40  ;;  %v1112_v32 = vmul.f32 0.70710677, %v4810_v42  ;;  %v1344_v46 = vadd.f32 %v4481_v27, %v4806_v47 }
 0x18d   :  { %v1340_v15 = vadd.f32 %v1339_v34, %v4783_v54  ;;  %v819_v22 = vpop.f32.mrf.mxu0  ;;  %v4829_v52 = vmul.f32 %v1223_v61, %v1031_v55  ;;  %v4832_v28 = vmul.f32 0.5, %v4737_v0  ;;  %2953 = verf.f32 %v1111_v6 }
 0x18e   :  { %v978_v56 = vpop.f32.mrf.mxu1  ;;  %v1115_v18 = vmul.f32 0.70710677, %v4823_v44  ;;  %v1345_v11 = vadd.f32 %v1344_v46, %v4815_v17  ;;  %v818_v40 = vadd.f32 %v817_v59, %v4393_v24  ;;  %v4837_v43 = vadd.f32 %v974_v20, %v814_v8 }
 0x18f   :  { %6302 = vst [vmem:[#allocation52_spill] sm:$0xff] %v4829_v52  ;;  %1341 = vadd.xlane.f32.xlu0 %v1340_v15  ;;  %v820_v25 = vadd.f32 %v819_v22, %v4397_v2  ;;  %v823_v27 = vpop.f32.mrf.mxu0  ;;  %v1220_v30 = vadd.f32 1.0, %v2940_v63  ;;  %v4841_v61 = vmul.f32 0.5, %v4755_v1  ;;  %v1440_v0 = vmul.f32 %v4806_v47, %v4806_v47 }
 0x190   :  { %v980_v50 = vpop.f32.mrf.mxu1  ;;  %v1441_v55 = vmul.f32 %v4815_v17, %v4815_v17  ;;  %v4848_v34 = vmul.f32 %v1219_v58, %v4786_v39  ;;  %v4850_v59 = vmul.f32 %v1224_v19, %v1032_v7  ;;  %2955 = verf.f32 %v1112_v32  ;;  %1346 = vadd.xlane.f32.xlu1 %v1345_v11 }
 0x191   :  { %v2942_v6 = vpop.eup %2941  ;;  %v4852_v20 = vadd.f32 %v978_v56, %v818_v40  ;;  %v825_v63 = vpop.f32.mrf.mxu0  ;;  %v1116_v1 = vmul.f32 0.70710677, %v4837_v43  ;;  %v1505_v15 = vadd.f32 %v4485_v49, %v1440_v0  ;;  %v824_v46 = vadd.f32 %v823_v27, %v4393_v24 }
 0x192   :  { %6303 = vst [vmem:[#allocation53_spill] sm:$0xff] %v4848_v34  ;;  %6304 = vst [vmem:[#allocation54_spill] sm:$0xff] %v4850_v59  ;;  %v984_v8 = vpop.f32.mrf.mxu1  ;;  %v1354_v22 = vadd.f32 %v4524_v62, %v4829_v52  ;;  %v2944_v17 = vpop.eup %2943  ;;  %v4860_v39 = vmul.f32 0.5, %v4770_v53  ;;  %v4863_v7 = vmul.f32 0.5, %v4781_v10  ;;  %2957 = verf.f32 %v1115_v18 }
 0x193   :  { %v4865_v58 = vadd.f32 %v980_v50, %v820_v25  ;;  %v829_v19 = vpop.f32.mrf.mxu0  ;;  %v2946_v56 = vpop.eup %2945  ;;  %v4868_v49 = vmul.f32 %v1220_v30, %v4789_v36  ;;  %v1227_v11 = vadd.f32 1.0, %v2942_v6  ;;  %v4871_v40 = vmul.f32 0.5, %v4792_v23 }
 0x194   :  { %v986_v32 = vpop.f32.mrf.mxu1  ;;  %v1506_v62 = vadd.f32 %v1505_v15, %v1441_v55  ;;  %v4874_v53 = vmul.f32 0.5, %v4801_v38  ;;  %v1119_v10 = vmul.f32 0.70710677, %v4852_v20  ;;  %v1355_v18 = vadd.f32 %v1354_v22, %v4850_v59 }
 0x195   :  { %6305 = vst [vmem:[#allocation55_spill] sm:$0xff] %v4868_v49  ;;  %v826_v25 = vadd.f32 %v825_v63, %v4397_v2  ;;  %v831_v27 = vpop.f32.mrf.mxu0  ;;  %v1228_v0 = vadd.f32 1.0, %v2944_v17  ;;  %2959 = verf.f32 %v1116_v1  ;;  %v4879_v36 = vadd.f32 %v984_v8, %v824_v46 }
 0x196   :  { %v990_v50 = vpop.f32.mrf.mxu1  ;;  %1507 = vadd.xlane.f32.xlu1 %v1506_v62  ;;  %v1349_v23 = vadd.f32 %v4504_v31, %v4848_v34  ;;  %v2948_v30 = vpop.eup %2947  ;;  %v1231_v55 = vadd.f32 1.0, %v2946_v56  ;;  %v4884_v38 = vmul.f32 0.5, %v4810_v42  ;;  %v1120_v6 = vmul.f32 0.70710677, %v4865_v58  ;;  %1356 = vadd.xlane.f32.xlu0 %v1355_v18 }
 0x197   :  { %v830_v63 = vadd.f32 %v829_v19, %v4393_v24  ;;  %v835_v15 = vpop.f32.mrf.mxu0  ;;  %v2950_v17 = vpop.eup %2949  ;;  %v4889_v1 = vmul.f32 %v1227_v11, %v4818_v41  ;;  %v4892_v46 = vadd.f32 %v986_v32, %v826_v25  ;;  %v1448_v31 = vmul.f32 %v4829_v52, %v4829_v52 }
 0x198   :  { %v992_v22 = vpop.f32.mrf.mxu1  ;;  %v1350_v8 = vadd.f32 %v1349_v23, %v4868_v49  ;;  %v2952_v42 = vpop.eup %2951  ;;  %v4897_v56 = vmul.f32 0.5, %v4823_v44  ;;  %2961 = verf.f32 %v1119_v10  ;;  %v1123_v19 = vmul.f32 0.70710677, %v4879_v36 }
 0x199   :  { %6306 = vst [vmem:[#allocation56_spill] sm:$0xff] %v4889_v1  ;;  %v1449_v62 = vmul.f32 %v4850_v59, %v4850_v59  ;;  %v837_v18 = vpop.f32.mrf.mxu0  ;;  %v4903_v11 = vmul.f32 %v1228_v0, %v4832_v28  ;;  %v4906_v32 = vmul.f32 0.5, %v4837_v43  ;;  %v1515_v25 = vadd.f32 %v4537_v33, %v1448_v31 }
 0x19a   :  { %v996_v41 = vpop.f32.mrf.mxu1  ;;  %1351 = vadd.xlane.f32.xlu1 %v1350_v8  ;;  %v832_v44 = vadd.f32 %v831_v27, %v4397_v2  ;;  %v2954_v23 = vpop.eup %2953  ;;  %v4911_v10 = vmul.f32 %v1231_v55, %v4841_v61  ;;  %2963 = verf.f32 %v1120_v6  ;;  %v4913_v52 = vadd.f32 %v990_v50, %v830_v63 }
 0x19b   :  { %6307 = vst [vmem:[#allocation57_spill] sm:$0xff] %v4903_v11  ;;  %v1444_v59 = vmul.f32 %v4848_v34, %v4848_v34  ;;  %v841_v28 = vpop.f32.mrf.mxu0  ;;  %v1124_v43 = vmul.f32 0.70710677, %v4892_v46  ;;  %v1516_v47 = vadd.f32 %v1515_v25, %v1449_v62  ;;  %v1445_v33 = vmul.f32 %v4868_v49, %v4868_v49 }
 0x19c   :  { %6308 = vst [vmem:[#allocation58_spill] sm:$0xff] %v4911_v10  ;;  %v998_v0 = vpop.f32.mrf.mxu1  ;;  %v836_v27 = vadd.f32 %v835_v15, %v4393_v24  ;;  %v1232_v8 = vadd.f32 1.0, %v2948_v30  ;;  %2965 = verf.f32 %v1123_v19  ;;  %v1127_v61 = vmul.f32 0.70710677, %v4913_v52 }
 0x19d   :  { %v1510_v50 = vadd.f32 %v4511_v60, %v1444_v59  ;;  %v2956_v6 = vpop.eup %2955  ;;  %v1235_v63 = vadd.f32 1.0, %v2950_v17  ;;  %v4924_v31 = vmul.f32 0.5, %v4852_v20  ;;  %1517 = vadd.xlane.f32.xlu0 %v1516_v47  ;;  %v4926_v34 = vadd.f32 %v992_v22, %v832_v44  ;;  %v843_v49 = vpop.f32.mrf.mxu0 }
 0x19e   :  { %v1002_v55 = vpop.f32.mrf.mxu1  ;;  %v1359_v62 = vadd.f32 %v4547_v35, %v4889_v1  ;;  %v1236_v25 = vadd.f32 1.0, %v2952_v42  ;;  %v1239_v15 = vadd.f32 1.0, %v2954_v23  ;;  %v1452_v19 = vmul.f32 %v4889_v1, %v4889_v1 }
 0x19f   :  { %v1511_v30 = vadd.f32 %v1510_v50, %v1445_v33  ;;  %v2958_v60 = vpop.eup %2957  ;;  %2967 = verf.f32 %v1124_v43  ;;  %v1128_v59 = vmul.f32 0.70710677, %v4926_v34  ;;  %v4934_v17 = vadd.f32 %v996_v41, %v836_v27 }
 0x1a0   :  { %v1360_v20 = vadd.f32 %v1359_v62, %v4903_v11  ;;  %v4937_v47 = vmul.f32 %v1232_v8, %v4860_v39  ;;  %2969 = verf.f32 %v1127_v61  ;;  %v838_v35 = vadd.f32 %v837_v18, %v4397_v2  ;;  %v1004_v42 = vpop.f32.mrf.mxu1  ;;  %v847_v61 = vpop.f32.mrf.mxu0 }
 0x1a1   :  { %1512 = vadd.xlane.f32.xlu1 %v1511_v30  ;;  %v1453_v22 = vmul.f32 %v4903_v11, %v4903_v11  ;;  %v1240_v44 = vadd.f32 1.0, %v2956_v6  ;;  %v4943_v23 = vmul.f32 0.5, %v4865_v58  ;;  %v1520_v43 = vadd.f32 %v4551_v13, %v1452_v19 }
 0x1a2   :  { %6309 = vst [vmem:[#allocation59_spill] sm:$0xff] %v4937_v47  ;;  %1361 = vadd.xlane.f32.xlu0 %v1360_v20  ;;  %v842_v41 = vadd.f32 %v841_v28, %v4393_v24  ;;  %v2960_v33 = vpop.eup %2959  ;;  %v4948_v39 = vmul.f32 %v1235_v63, %v4863_v7  ;;  %v4951_v27 = vmul.f32 %v1236_v25, %v4871_v40  ;;  %v1243_v18 = vadd.f32 1.0, %v2958_v60  ;;  %v1008_v63 = vpop.f32.mrf.mxu1 }
 0x1a3   :  { %v1364_v8 = vadd.f32 %v4574_v16, %v4911_v10  ;;  %v4956_v58 = vmul.f32 %v1239_v15, %v4874_v53  ;;  %2971 = verf.f32 %v1128_v59  ;;  %v1131_v13 = vmul.f32 0.70710677, %v4934_v17 }
 0x1a4   :  { %v1521_v50 = vadd.f32 %v1520_v43, %v1453_v22  ;;  %v4959_v28 = vadd.f32 %v998_v0, %v838_v35  ;;  %v844_v6 = vadd.f32 %v843_v49, %v4397_v2  ;;  %v4963_v40 = vadd.f32 %v1002_v55, %v842_v41 }
 0x1a5   :  { %v1365_v7 = vadd.f32 %v1364_v8, %v4937_v47  ;;  %v2962_v62 = vpop.eup %2961  ;;  %v4966_v16 = vmul.f32 %v1240_v44, %v4884_v38  ;;  %v1244_v25 = vadd.f32 1.0, %v2960_v33  ;;  %v1456_v53 = vmul.f32 %v4911_v10, %v4911_v10  ;;  %v849_v38 = vpop.f32.mrf.mxu0 }
 0x1a6   :  { %1522 = vadd.xlane.f32.xlu1 %v1521_v50  ;;  %v1457_v0 = vmul.f32 %v4937_v47, %v4937_v47  ;;  %v4973_v15 = vmul.f32 %v1243_v18, %v4897_v56  ;;  %v1135_v49 = vmul.f32 0.70710677, %v4963_v40  ;;  %v848_v55 = vadd.f32 %v847_v61, %v4393_v24  ;;  %v1010_v24 = vpop.f32.mrf.mxu1 }
 0x1a7   :  { %1366 = vadd.xlane.f32.xlu0 %v1365_v7  ;;  %v4977_v30 = vadd.f32 %v1004_v42, %v844_v6  ;;  %v2964_v19 = vpop.eup %2963  ;;  %2973 = verf.f32 %v1131_v13  ;;  %v1525_v60 = vadd.f32 %v4577_v57, %v1456_v53  ;;  %v1460_v59 = vmul.f32 %v4948_v39, %v4948_v39 }
 0x1a8   :  { %6310 = vst [vmem:[#allocation60_spill] sm:$0xff] %v4973_v15  ;;  %v1461_v20 = vmul.f32 %v4951_v27, %v4951_v27  ;;  %v1247_v56 = vadd.f32 1.0, %v2962_v62  ;;  %v1132_v35 = vmul.f32 0.70710677, %v4959_v28  ;;  %2975 = verf.f32 %v1135_v49 }
 0x1a9   :  { %v1136_v22 = vmul.f32 0.70710677, %v4977_v30  ;;  %v2966_v42 = vpop.eup %2965  ;;  %v4987_v44 = vmul.f32 %v1244_v25, %v4906_v32  ;;  %v1526_v43 = vadd.f32 %v1525_v60, %v1457_v0  ;;  %v1530_v57 = vadd.f32 %v4597_v29, %v1460_v59 }
 0x1aa   :  { %v850_v41 = vadd.f32 %v849_v38, %v4397_v2  ;;  %v1248_v33 = vadd.f32 1.0, %v2964_v19  ;;  %v4991_v18 = vadd.f32 %v1008_v63, %v848_v55  ;;  %v1369_v8 = vadd.f32 %v4583_v9, %v4948_v39 }
 0x1ab   :  { %6311 = vst [vmem:[#allocation61_spill] sm:$0xff] %v4987_v44  ;;  %2977 = verf.f32 %v1136_v22  ;;  %1527 = vadd.xlane.f32.xlu1 %v1526_v43  ;;  %v1531_v61 = vadd.f32 %v1530_v57, %v1461_v20  ;;  %v1464_v32 = vmul.f32 %v4956_v58, %v4956_v58  ;;  %v1465_v50 = vmul.f32 %v4966_v16, %v4966_v16 }
 0x1ac   :  { %v4995_v13 = vadd.f32 %v1010_v24, %v850_v41  ;;  %v2968_v29 = vpop.eup %2967  ;;  %v5002_v2 = vmul.f32 %v1247_v56, %v4924_v31  ;;  %v1251_v7 = vadd.f32 1.0, %v2966_v42  ;;  %2979 = verf.f32 %v1132_v35  ;;  %v6316_v24 = vld [vmem:[#allocation43_spill] sm:$0xff] }
 0x1ad   :  { %v1139_v6 = vmul.f32 0.70710677, %v4991_v18  ;;  %v2970_v63 = vpop.eup %2969  ;;  %1532 = vadd.xlane.f32.xlu0 %v1531_v61  ;;  %v1370_v9 = vadd.f32 %v1369_v8, %v4951_v27  ;;  %v1535_v25 = vadd.f32 %v4616_v3, %v1464_v32  ;;  %v1374_v53 = vadd.f32 %v4608_v5, %v4956_v58  ;;  %v6317_v42 = vld [vmem:[#allocation47_spill] sm:$0xff]  ;;  %v6319_v8 = vld [vmem:[#allocation34_spill] sm:$0xff] }
 0x1ae   :  { %v1140_v62 = vmul.f32 0.70710677, %v4995_v13  ;;  %v1261_v0 = vadd.f32 1.0, %v4752_v51  ;;  %v1059_v31 = vmul.f32 0.5, %v4879_v36  ;;  %v1468_v49 = vmul.f32 %v4973_v15, %v4973_v15 }
 0x1af   :  { %2981 = verf.f32 %v1139_v6  ;;  %v5015_v55 = vmul.f32 %v1248_v33, %v4943_v23  ;;  %1371 = vadd.xlane.f32.xlu1 %v1370_v9  ;;  %v1536_v38 = vadd.f32 %v1535_v25, %v1465_v50  ;;  %v1379_v3 = vadd.f32 %v4624_v48, %v4973_v15  ;;  %v6318_v33 = vld [vmem:[#allocation35_spill] sm:$0xff] }
 0x1b0   :  { %2983 = verf.f32 %v1140_v62  ;;  %v2972_v19 = vpop.eup %2971  ;;  %v1262_v5 = vadd.f32 1.0, %v4762_v37  ;;  %v5020_v60 = vmul.f32 %v1251_v7, %v1059_v31  ;;  %v1252_v51 = vadd.f32 1.0, %v2968_v29  ;;  %v6314_v37 = vld [vmem:[#allocation48_spill] sm:$0xff]  ;;  %v6326_v62 = vld [vmem:[#allocation49_spill] sm:$0xff] }
 0x1b1   :  { %v1255_v36 = vadd.f32 1.0, %v2970_v63  ;;  %1537 = vadd.xlane.f32.xlu0 %v1536_v38  ;;  %v1375_v59 = vadd.f32 %v1374_v53, %v4966_v16  ;;  %v1469_v23 = vmul.f32 %v4987_v44, %v4987_v44  ;;  %v1540_v20 = vadd.f32 %v4642_v4, %v1468_v49  ;;  %v6325_v63 = vld [vmem:[#allocation32_spill] sm:$0xff] }
 0x1b2   :  { %6312 = vst [vmem:[#allocation62_spill] sm:$0xff] %v5020_v60  ;;  %v1472_v56 = vmul.f32 %v5002_v2, %v5002_v2  ;;  %v5030_v48 = vmul.f32 %v4726_v12, %v4637_v45  ;;  %v5034_v35 = vmul.f32 %v6314_v37, %v4648_v26  ;;  %v1060_v22 = vmul.f32 0.5, %v4892_v46 }
 0x1b3   :  { %v1554_v43 = vadd.f32 %v6317_v42, %v6316_v24  ;;  %v1063_v57 = vmul.f32 0.5, %v4913_v52  ;;  %1376 = vadd.xlane.f32.xlu1 %v1375_v59  ;;  %v1380_v4 = vadd.f32 %v1379_v3, %v4987_v44  ;;  %v1473_v41 = vmul.f32 %v5015_v55, %v5015_v55  ;;  %v6322_v52 = vld [vmem:[#allocation36_spill] sm:$0xff]  ;;  %v6331_v24 = vld [vmem:[#allocation38_spill] sm:$0xff] }
 0x1b4   :  { %6313 = vst [vmem:[#allocation63_spill] sm:$0xff] %v5030_v48  ;;  %6315 = vst [vmem:[#allocation48_spill] sm:$0xff] %v5034_v35  ;;  %v1545_v45 = vadd.f32 %v6318_v33, %v1472_v56  ;;  %v2974_v12 = vpop.eup %2973  ;;  %v5045_v61 = vmul.f32 %v1261_v0, %v6319_v8  ;;  %v5047_v26 = vmul.f32 %v1252_v51, %v1060_v22  ;;  %v1256_v46 = vadd.f32 1.0, %v2972_v19 }
 0x1b5   :  { %v1476_v32 = vmul.f32 %v5020_v60, %v5020_v60  ;;  %v2976_v50 = vpop.eup %2975  ;;  %v5052_v29 = vmul.f32 %v1262_v5, %v6322_v52  ;;  %v5054_v7 = vmul.f32 %v1255_v36, %v1063_v57  ;;  %1381 = vadd.xlane.f32.xlu0 %v1380_v4  ;;  %v1541_v6 = vadd.f32 %v1540_v20, %v1469_v23  ;;  %v6327_v5 = vld [vmem:[#allocation39_spill] sm:$0xff]  ;;  %v6333_v57 = vld [vmem:[#allocation42_spill] sm:$0xff] }
 0x1b6   :  { %6320 = vst [vmem:[#allocation43_spill] sm:$0xff] %v5045_v61  ;;  %6321 = vst [vmem:[#allocation47_spill] sm:$0xff] %v5047_v26  ;;  %v1384_v9 = vadd.f32 %v6325_v63, %v5002_v2  ;;  %v1265_v25 = vadd.f32 1.0, %v6326_v62  ;;  %v1266_v53 = vadd.f32 1.0, %v4813_v21  ;;  %v1064_v0 = vmul.f32 0.5, %v4926_v34  ;;  %v6329_v21 = vld [vmem:[#allocation40_spill] sm:$0xff] }
 0x1b7   :  { %6323 = vst [vmem:[#allocation35_spill] sm:$0xff] %v5052_v29  ;;  %6324 = vst [vmem:[#allocation34_spill] sm:$0xff] %v5054_v7  ;;  %v1263_v31 = vadd.f32 1.0, %v2976_v50  ;;  %v1259_v38 = vadd.f32 1.0, %v2974_v12  ;;  %v1071_v3 = vmul.f32 0.5, %v4963_v40  ;;  %1542 = vadd.xlane.f32.xlu1 %v1541_v6  ;;  %v1546_v19 = vadd.f32 %v1545_v45, %v1473_v41 }
 0x1b8   :  { %v2978_v49 = vpop.eup %2977  ;;  %v1389_v51 = vadd.f32 %v6327_v5, %v5020_v60  ;;  %v5064_v36 = vmul.f32 %v1256_v46, %v1064_v0  ;;  %v1067_v59 = vmul.f32 0.5, %v4934_v17  ;;  %v1477_v23 = vmul.f32 %v5047_v26, %v5047_v26  ;;  %v6336_v46 = vld [vmem:[#allocation46_spill] sm:$0xff] }
 0x1b9   :  { %v1550_v20 = vadd.f32 %v6329_v21, %v1476_v32  ;;  %v2980_v34 = vpop.eup %2979  ;;  %v5070_v56 = vmul.f32 %v1263_v31, %v1071_v3  ;;  %v1264_v37 = vadd.f32 1.0, %v2978_v49  ;;  %1547 = vadd.xlane.f32.xlu0 %v1546_v19  ;;  %v1385_v40 = vadd.f32 %v1384_v9, %v5015_v55 }
 0x1ba   :  { %6328 = vst [vmem:[#allocation36_spill] sm:$0xff] %v5064_v36  ;;  %v1480_v22 = vmul.f32 %v5054_v7, %v5054_v7  ;;  %v5076_v42 = vmul.f32 %v1265_v25, %v6331_v24  ;;  %v5079_v17 = vmul.f32 %v1266_v53, %v6333_v57  ;;  %v1072_v4 = vmul.f32 0.5, %v4977_v30 }
 0x1bb   :  { %6330 = vst [vmem:[#allocation32_spill] sm:$0xff] %v5070_v56  ;;  %v1403_v41 = vadd.f32 %v5052_v29, %v5045_v61  ;;  %v5084_v45 = vmul.f32 %v1259_v38, %v1067_v59  ;;  %v1075_v12 = vmul.f32 0.5, %v4991_v18  ;;  %1386 = vadd.xlane.f32.xlu1 %v1385_v40  ;;  %v1390_v8 = vadd.f32 %v1389_v51, %v5047_v26  ;;  %v6396_v26 = vld [vmem:[#allocation41_spill] sm:$0xff] }
 0x1bc   :  { %6332 = vst [vmem:[#allocation49_spill] sm:$0xff] %v5076_v42  ;;  %6334 = vst [vmem:[#allocation39_spill] sm:$0xff] %v5079_v17  ;;  %v2982_v33 = vpop.eup %2981  ;;  %v1394_v32 = vadd.f32 %v6336_v46, %v5054_v7  ;;  %v1260_v52 = vadd.f32 1.0, %v2980_v34  ;;  %v1551_v63 = vadd.f32 %v1550_v20, %v1477_v23  ;;  %v1481_v30 = vmul.f32 %v5064_v36, %v5064_v36 }
 0x1bd   :  { %6335 = vst [vmem:[#allocation40_spill] sm:$0xff] %v5084_v45  ;;  %v2984_v50 = vpop.eup %2983  ;;  %v1267_v6 = vadd.f32 1.0, %v2982_v33  ;;  %v5092_v9 = vmul.f32 %v1264_v37, %v1072_v4  ;;  %1391 = vadd.xlane.f32.xlu0 %v1390_v8  ;;  %v1555_v25 = vadd.f32 %v1554_v43, %v1480_v22  ;;  %v1404_v18 = vadd.f32 %v1403_v41, %v5070_v56 }
 0x1be   :  { %v1268_v62 = vadd.f32 1.0, %v2984_v50  ;;  %v1068_v53 = vmul.f32 0.5, %v4959_v28  ;;  %v1398_v31 = vadd.f32 %v5034_v35, %v5030_v48  ;;  %v1482_v49 = vmul.f32 %v5030_v48, %v5030_v48 }
 0x1bf   :  { %6337 = vst [vmem:[#allocation38_spill] sm:$0xff] %v5092_v9  ;;  %v5096_v0 = vmul.f32 %v1267_v6, %v1075_v12  ;;  %v1076_v38 = vmul.f32 0.5, %v4995_v13  ;;  %1552 = vadd.xlane.f32.xlu1 %v1551_v63  ;;  %v1395_v3 = vadd.f32 %v1394_v32, %v5064_v36  ;;  %v1408_v43 = vadd.f32 %v5079_v17, %v5076_v42 }
 0x1c0   :  { %v1483_v19 = vmul.f32 %v5034_v35, %v5034_v35  ;;  %v5108_v28 = vmul.f32 %v1260_v52, %v1068_v53  ;;  %v1399_v5 = vadd.f32 %v1398_v31, %v5084_v45  ;;  %v1484_v51 = vmul.f32 %v5084_v45, %v5084_v45  ;;  %v2433_v31 = vld [vmem:[%s6096_s5 + $0xf0] sm:$0xff]  ;;  %v6369_v35 = vld [vmem:[#allocation19_spill] sm:$0xff] }
 0x1c1   :  { %6338 = vst [vmem:[#allocation42_spill] sm:$0xff] %v5096_v0  ;;  %v1487_v59 = vmul.f32 %v5052_v29, %v5052_v29  ;;  %v5115_v13 = vmul.f32 %v1268_v62, %v1076_v38  ;;  %1396 = vadd.xlane.f32.xlu0 %v1395_v3  ;;  %v1556_v23 = vadd.f32 %v1555_v25, %v1481_v30  ;;  %v2434_v30 = vld [vmem:[%s6096_s5 + $0xf8] sm:$0xff]  ;;  %v2417_v38 = vld [vmem:[%s6096_s5 + $0x70] sm:$0xff] }
 0x1c2   :  { %6339 = vst [vmem:[#allocation46_spill] sm:$0xff] %v5108_v28  ;;  %v1405_v21 = vadd.f32 %v1404_v18, %v5092_v9  ;;  %v1409_v20 = vadd.f32 %v1408_v43, %v5096_v0  ;;  %v1486_v34 = vmul.f32 %v5045_v61, %v5045_v61  ;;  %v1559_v37 = vadd.f32 %v1483_v19, %v1482_v49  ;;  %v2466_v62 = vld [vmem:[%s6096_s5 + $0x1f8] sm:$0xff]  ;;  %v2465_v49 = vld [vmem:[%s6096_s5 + $0x1f0] sm:$0xff]  ;;  %v2432_v19 = vld [vmem:[%s6096_s5 + $0xe8] sm:$0xff] }
 0x1c3   :  { %6340 = vst [vmem:[#allocation64_spill] sm:$0xff] %v5115_v13  ;;  %1557 = vadd.xlane.f32.xlu1 %v1556_v23  ;;  %v1488_v40 = vmul.f32 %v5070_v56, %v5070_v56  ;;  %v1491_v22 = vmul.f32 %v5079_v17, %v5079_v17  ;;  %v1400_v24 = vadd.f32 %v1399_v5, %v5108_v28  ;;  %v2418_v25 = vld [vmem:[%s6096_s5 + $0x78] sm:$0xff]  ;;  %v2449_v3 = vld [vmem:[%s6096_s5 + $0x170] sm:$0xff]  ;;  %v2464_v5 = vld [vmem:[%s6096_s5 + $0x1e8] sm:$0xff] }
 0x1c4   :  { %v1564_v57 = vadd.f32 %v1487_v59, %v1486_v34  ;;  %v1490_v4 = vmul.f32 %v5076_v42, %v5076_v42  ;;  %v1410_v41 = vadd.f32 %v1409_v20, %v5115_v13  ;;  %v1485_v33 = vmul.f32 %v5108_v28, %v5108_v28  ;;  %2778 = vmatprep.subr.mxu0 %v2434_v30  ;;  %v2450_v18 = vld [vmem:[%s6096_s5 + $0x178] sm:$0xff]  ;;  %v2448_v59 = vld [vmem:[%s6096_s5 + $0x168] sm:$0xff]  ;;  %v2431_v23 = vld [vmem:[%s6096_s5 + $0xe0] sm:$0xff] }
 0x1c5   :  { %1406 = vadd.xlane.f32.xlu0 %v1405_v21  ;;  %v1560_v12 = vadd.f32 %v1559_v37, %v1484_v51  ;;  %v1492_v8 = vmul.f32 %v5096_v0, %v5096_v0  ;;  %v1489_v46 = vmul.f32 %v5092_v9, %v5092_v9  ;;  %v1493_v6 = vmul.f32 %v5115_v13, %v5115_v13  ;;  %v2416_v51 = vld [vmem:[%s6096_s5 + $0x68] sm:$0xff]  ;;  %v2463_v21 = vld [vmem:[%s6096_s5 + $0x1e0] sm:$0xff]  ;;  %v2430_v37 = vld [vmem:[%s6096_s5 + $0xd8] sm:$0xff] }
 0x1c6   :  { %v1565_v32 = vadd.f32 %v1564_v57, %v1488_v40  ;;  %v1569_v50 = vadd.f32 %v1491_v22, %v1490_v4  ;;  %2816 = vmatprep.subr.mxu1 %v2466_v62  ;;  %2779 = vmatpush3.msra.mxu0 %v2418_v25  ;;  %v2415_v20 = vld [vmem:[%s6096_s5 + $0x60] sm:$0xff]  ;;  %v2462_v40 = vld [vmem:[%s6096_s5 + $0x1d8] sm:$0xff]  ;;  %v2429_v57 = vld [vmem:[%s6096_s5 + $0xd0] sm:$0xff] }
 0x1c7   :  { %1401 = vadd.xlane.f32.xlu1 %v1400_v24  ;;  %v1561_v52 = vadd.f32 %v1560_v12, %v1485_v33  ;;  %2817 = vmatpush3.msra.mxu1 %v2450_v18  ;;  %v2447_v34 = vld [vmem:[%s6096_s5 + $0x160] sm:$0xff]  ;;  %v2414_v22 = vld [vmem:[%s6096_s5 + $0x58] sm:$0xff]  ;;  %v2461_v4 = vld [vmem:[%s6096_s5 + $0x1d0] sm:$0xff] }
 0x1c8   :  { %v1570_v63 = vadd.f32 %v1569_v50, %v1492_v8  ;;  %v1566_v53 = vadd.f32 %v1565_v32, %v1489_v46  ;;  %2780 = vmatprep.subr.mxu0 %v2433_v31  ;;  %2818 = vmatprep.subr.mxu1 %v2465_v49  ;;  %v2446_v24 = vld [vmem:[%s6096_s5 + $0x158] sm:$0xff]  ;;  %v2445_v33 = vld [vmem:[%s6096_s5 + $0x150] sm:$0xff]  ;;  %v2428_v12 = vld [vmem:[%s6096_s5 + $0xc8] sm:$0xff] }
 0x1c9   :  { %1411 = vadd.xlane.f32.xlu0 %v1410_v41  ;;  %2781 = vmatpush3.msra.mxu0 %v2417_v38  ;;  %v2413_v41 = vld [vmem:[%s6096_s5 + $0x50] sm:$0xff]  ;;  %v2460_v8 = vld [vmem:[%s6096_s5 + $0x1c8] sm:$0xff]  ;;  %v2427_v50 = vld [vmem:[%s6096_s5 + $0xc0] sm:$0xff] }
 0x1ca   :  { %v1571_v43 = vadd.f32 %v1570_v63, %v1493_v6  ;;  %2782 = vmatprep.subr.mxu0 %v2432_v19  ;;  %2819 = vmatpush3.msra.mxu1 %v2449_v3  ;;  %v2412_v46 = vld [vmem:[%s6096_s5 + $0x48] sm:$0xff]  ;;  %v2411_v6 = vld [vmem:[%s6096_s5 + $0x40] sm:$0xff]  ;;  %v2426_v30 = vld [vmem:[%s6096_s5 + $0xb8] sm:$0xff] }
 0x1cb   :  { %1562 = vadd.xlane.f32.xlu1 %v1561_v52  ;;  %2783 = vmatpush3.msra.mxu0 %v2416_v51  ;;  %v2444_v32 = vld [vmem:[%s6096_s5 + $0x148] sm:$0xff]  ;;  %v2459_v52 = vld [vmem:[%s6096_s5 + $0x1c0] sm:$0xff]  ;;  %v2458_v62 = vld [vmem:[%s6096_s5 + $0x1b8] sm:$0xff] }
 0x1cc   :  { %2820 = vmatprep.subr.mxu1 %v2464_v5  ;;  %2784 = vmatprep.subr.mxu0 %v2431_v23  ;;  %v2443_v63 = vld [vmem:[%s6096_s5 + $0x140] sm:$0xff]  ;;  %v2410_v25 = vld [vmem:[%s6096_s5 + $0x38] sm:$0xff]  ;;  %v2457_v31 = vld [vmem:[%s6096_s5 + $0x1b0] sm:$0xff] }
 0x1cd   :  { %1567 = vadd.xlane.f32.xlu0 %v1566_v53  ;;  %2821 = vmatpush3.msra.mxu1 %v2448_v59  ;;  %v2442_v18 = vld [vmem:[%s6096_s5 + $0x138] sm:$0xff]  ;;  %v2425_v53 = vld [vmem:[%s6096_s5 + $0xb0] sm:$0xff]  ;;  %v2424_v3 = vld [vmem:[%s6096_s5 + $0xa8] sm:$0xff] }
 0x1ce   :  { %2822 = vmatprep.subr.mxu1 %v2463_v21  ;;  %2785 = vmatpush3.msra.mxu0 %v2415_v20  ;;  %v2409_v49 = vld [vmem:[%s6096_s5 + $0x30] sm:$0xff]  ;;  %v2408_v19 = vld [vmem:[%s6096_s5 + $0x28] sm:$0xff]  ;;  %v2423_v51 = vld [vmem:[%s6096_s5 + $0xa0] sm:$0xff] }
 0x1cf   :  { %1572 = vadd.xlane.f32.xlu1 %v1571_v43  ;;  %2823 = vmatpush3.msra.mxu1 %v2447_v34  ;;  %v2441_v38 = vld [vmem:[%s6096_s5 + $0x130] sm:$0xff]  ;;  %v2456_v43 = vld [vmem:[%s6096_s5 + $0x1a8] sm:$0xff]  ;;  %v2455_v59 = vld [vmem:[%s6096_s5 + $0x1a0] sm:$0xff] }
 0x1d0   :  { %2786 = vmatprep.subr.mxu0 %v2430_v37  ;;  %2824 = vmatprep.subr.mxu1 %v2462_v40  ;;  %v2440_v5 = vld [vmem:[%s6096_s5 + $0x128] sm:$0xff]  ;;  %v2407_v23 = vld [vmem:[%s6096_s5 + $0x20] sm:$0xff]  ;;  %v2422_v20 = vld [vmem:[%s6096_s5 + $0x98] sm:$0xff] }
 0x1d1   :  { %2787 = vmatpush3.msra.mxu0 %v2414_v22  ;;  %2825 = vmatpush3.msra.mxu1 %v2446_v24  ;;  %v2439_v21 = vld [vmem:[%s6096_s5 + $0x120] sm:$0xff]  ;;  %v2454_v34 = vld [vmem:[%s6096_s5 + $0x198] sm:$0xff]  ;;  %v2421_v22 = vld [vmem:[%s6096_s5 + $0x90] sm:$0xff] }
 0x1d2   :  { %2788 = vmatprep.subr.mxu0 %v2429_v57  ;;  %2826 = vmatprep.subr.mxu1 %v2461_v4  ;;  %v2406_v37 = vld [vmem:[%s6096_s5 + $0x18] sm:$0xff]  ;;  %v2453_v24 = vld [vmem:[%s6096_s5 + $0x190] sm:$0xff] }
 0x1d3   :  { %2789 = vmatpush3.msra.mxu0 %v2413_v41  ;;  %2827 = vmatpush3.msra.mxu1 %v2445_v33  ;;  %v2438_v40 = vld [vmem:[%s6096_s5 + $0x118] sm:$0xff]  ;;  %v2405_v57 = vld [vmem:[%s6096_s5 + $0x10] sm:$0xff]  ;;  %v2420_v41 = vld [vmem:[%s6096_s5 + $0x88] sm:$0xff] }
 0x1d4   :  { %2790 = vmatprep.subr.mxu0 %v2428_v12  ;;  %2828 = vmatprep.subr.mxu1 %v2460_v8  ;;  %v2437_v4 = vld [vmem:[%s6096_s5 + $0x110] sm:$0xff]  ;;  %v2452_v33 = vld [vmem:[%s6096_s5 + $0x188] sm:$0xff] }
 0x1d5   :  { %2791 = vmatpush3.msra.mxu0 %v2412_v46  ;;  %2829 = vmatpush3.msra.mxu1 %v2444_v32  ;;  %v2404_v12 = vld [vmem:[%s6096_s5 + $0x8] sm:$0xff]  ;;  %v2419_v46 = vld [vmem:[%s6096_s5 + $0x80] sm:$0xff] }
 0x1d6   :  { %2792 = vmatprep.subr.mxu0 %v2427_v50  ;;  %2830 = vmatprep.subr.mxu1 %v2459_v52  ;;  %v2436_v8 = vld [vmem:[%s6096_s5 + $0x108] sm:$0xff]  ;;  %v2451_v32 = vld [vmem:[%s6096_s5 + $0x180] sm:$0xff] }
 0x1d7   :  { %2793 = vmatpush3.msra.mxu0 %v2411_v6  ;;  %2831 = vmatpush3.msra.mxu1 %v2443_v63  ;;  %v2403_v50 = vld [vmem:[%s6096_s5] sm:$0xff] }
 0x1d8   :  { %2794 = vmatprep.subr.mxu0 %v2426_v30  ;;  %2832 = vmatprep.subr.mxu1 %v2458_v62  ;;  %v2435_v52 = vld [vmem:[%s6096_s5 + $0x100] sm:$0xff] }
 0x1d9   :  { %2795 = vmatpush3.msra.mxu0 %v2410_v25  ;;  %2833 = vmatpush3.msra.mxu1 %v2442_v18 }
 0x1da   :  { %2796 = vmatprep.subr.mxu0 %v2425_v53  ;;  %2834 = vmatprep.subr.mxu1 %v2457_v31 }
 0x1db   :  { %2797 = vmatpush3.msra.mxu0 %v2409_v49  ;;  %2835 = vmatpush3.msra.mxu1 %v2441_v38 }
 0x1dc   :  { %2798 = vmatprep.subr.mxu0 %v2424_v3  ;;  %2836 = vmatprep.subr.mxu1 %v2456_v43  ;;  %v1782_v43 = vld [vmem:[%s6094_s3] sm:$0xf] }
 0x1dd   :  { %2799 = vmatpush3.msra.mxu0 %v2408_v19  ;;  %2837 = vmatpush3.msra.mxu1 %v2440_v5  ;;  %v1868_v19 = vld [vmem:[%s6095_s4] sm:$0xf] }
 0x1de   :  { %2800 = vmatprep.subr.mxu0 %v2423_v51  ;;  %2838 = vmatprep.subr.mxu1 %v2455_v59 }
 0x1df   :  { %2801 = vmatpush3.msra.mxu0 %v2407_v23  ;;  %2839 = vmatpush3.msra.mxu1 %v2439_v21  ;;  %v6341_v21 = vld [vmem:[#allocation6_spill] sm:$0xff] }
 0x1e0   :  { %2802 = vmatprep.subr.mxu0 %v2422_v20  ;;  %2840 = vmatprep.subr.mxu1 %v2454_v34  ;;  %v5342_v20 = vrot.slane %v1782_v43, %v6341_v21  ;;  %v5345_v34 = vrot.slane %v1868_v19, %v6341_v21 }
 0x1e1   :  { %2803 = vmatpush3.msra.mxu0 %v2406_v37  ;;  %2841 = vmatpush3.msra.mxu1 %v2438_v40  ;;  %v6342_v37 = vld [vmem:[#allocation5_spill] sm:$0xff] }
 0x1e2   :  { %2804 = vmatprep.subr.mxu0 %v2421_v22  ;;  %2842 = vmatprep.subr.mxu1 %v2453_v24  ;;  %v5348_v40 = vrot.slane %v1782_v43, %v6342_v37  ;;  %v5351_v22 = vrot.slane %v1868_v19, %v6342_v37  ;;  %v6343_v24 = vld [vmem:[#allocation8_spill] sm:$0xff] }
 0x1e3   :  { %2805 = vmatpush3.msra.mxu0 %v2405_v57  ;;  %2843 = vmatpush3.msra.mxu1 %v2437_v4  ;;  %v5354_v57 = vrot.slane %v1782_v43, %v6343_v24  ;;  %v5357_v4 = vrot.slane %v1868_v19, %v6343_v24  ;;  %v6358_v24 = vld [vmem:[#allocation18_spill] sm:$0xff] }
 0x1e4   :  { %2806 = vmatprep.subr.mxu0 %v2420_v41  ;;  %2844 = vmatprep.subr.mxu1 %v2452_v33 }
 0x1e5   :  { %2807 = vmatpush3.msra.mxu0 %v2404_v12  ;;  %2845 = vmatpush3.msra.mxu1 %v2436_v8  ;;  %v6344_v12 = vld [vmem:[#allocation7_spill] sm:$0xff] }
 0x1e6   :  { %2808 = vmatprep.subr.mxu0 %v2419_v46  ;;  %2846 = vmatprep.subr.mxu1 %v2451_v32  ;;  %v5360_v8 = vrot.slane %v1782_v43, %v6344_v12  ;;  %v5363_v46 = vrot.slane %v1868_v19, %v6344_v12  ;;  %v6354_v12 = vld [vmem:[#allocation13_spill] sm:$0xff] }
 0x1e7   :  { %2809 = vmatpush3.msra.mxu0 %v2403_v50  ;;  %2847 = vmatpush3.msra.mxu1 %v2435_v52 }
 0x1e8   :  { %6345 = vst [vmem:[#allocation6_spill] sm:$0xff] %v5363_v46 }
 0x209   :  { %v1337_v6 = vpop.xlane.xlu0 %1336 }
 0x20a   :  { %v1414_v63 = vmul.f32 0.001953125, %v1337_v6  ;;  %v6346_v6 = vld [vmem:[#allocation9_spill] sm:$0xff] }
 0x20c   :  { %v1590_v62 = vmul.f32 %v1414_v63, %v1414_v63 }
 0x20f   :  { %v1498_v30 = vpop.xlane.xlu0 %1497 }
 0x210   :  { %v1574_v25 = vmul.f32 0.001953125, %v1498_v30  ;;  %v1622_v30 = vsub.f32 %v6346_v6, %v1414_v63 }
 0x212   :  { %v1606_v18 = vsub.f32 %v1574_v25, %v1590_v62  ;;  %v6347_v62 = vld [vmem:[#allocation10_spill] sm:$0xff] }
 0x213   :  { %v1623_v25 = vsub.f32 %v6347_v62, %v1414_v63 }
 0x214   :  { %v1686_v53 = vadd.f32 1e-05, %v1606_v18  ;;  %v6348_v18 = vld [vmem:[#allocation44_spill] sm:$0xff] }
 0x215   :  { %v1503_v31 = vpop.xlane.xlu1 %1502 }
 0x216   :  { %2985 = vrsqrt.f32 %v1686_v53  ;;  %v1575_v5 = vmul.f32 0.001953125, %v1503_v31  ;;  %v1624_v53 = vsub.f32 %v6348_v18, %v1414_v63  ;;  %v6349_v31 = vld [vmem:[#allocation45_spill] sm:$0xff] }
 0x218   :  { %v1342_v49 = vpop.xlane.xlu0 %1341 }
 0x219   :  { %v5329_v38 = vmul.f32 0.001953125, %v1342_v49  ;;  %v1347_v3 = vpop.xlane.xlu1 %1346  ;;  %v1625_v49 = vsub.f32 %v6349_v31, %v1414_v63 }
 0x21a   :  { %v5339_v59 = vmul.f32 0.001953125, %v1347_v3  ;;  %v6350_v3 = vld [vmem:[#allocation11_spill] sm:$0xff] }
 0x21b   :  { %v1591_v51 = vmul.f32 %v5329_v38, %v5329_v38  ;;  %v1626_v43 = vsub.f32 %v6350_v3, %v5329_v38  ;;  %v1628_v21 = vsub.f32 %v4766_v14, %v5329_v38  ;;  %v1629_v37 = vsub.f32 %v4783_v54, %v5329_v38  ;;  %v6356_v54 = vld [vmem:[#allocation51_spill] sm:$0xff] }
 0x21c   :  { %v1592_v32 = vmul.f32 %v5339_v59, %v5339_v59 }
 0x21d   :  { %v1607_v23 = vsub.f32 %v1575_v5, %v1591_v51  ;;  %v6352_v51 = vld [vmem:[#allocation12_spill] sm:$0xff] }
 0x21f   :  { %v1687_v41 = vadd.f32 1e-05, %v1607_v23  ;;  %v1508_v33 = vpop.xlane.xlu1 %1507  ;;  %v1357_v52 = vpop.xlane.xlu0 %1356  ;;  %v1627_v23 = vsub.f32 %v6352_v51, %v5329_v38  ;;  %v6362_v38 = vld [vmem:[#allocation15_spill] sm:$0xff] }
 0x220   :  { %v1576_v50 = vmul.f32 0.001953125, %v1508_v33  ;;  %v5373_v19 = vmul.f32 0.001953125, %v1357_v52 }
 0x221   :  { %2987 = vrsqrt.f32 %v1687_v41 }
 0x222   :  { %v1608_v5 = vsub.f32 %v1576_v50, %v1592_v32  ;;  %6351 = vst [vmem:[#allocation5_spill] sm:$0xff] %v5373_v19 }
 0x223   :  { %v1352_v33 = vpop.xlane.xlu1 %1351  ;;  %v2986_v63 = vpop.eup %2985 }
 0x224   :  { %v1688_v52 = vadd.f32 1e-05, %v1608_v5  ;;  %v5387_v62 = vmul.f32 0.001953125, %v1352_v33  ;;  %v1719_v18 = vmul.f32 %v2986_v63, %v1623_v25  ;;  %v1721_v31 = vmul.f32 %v2986_v63, %v1625_v49  ;;  %v6360_v5 = vld [vmem:[#allocation54_spill] sm:$0xff] }
 0x225   :  { %v1718_v14 = vmul.f32 %v2986_v63, %v1622_v30  ;;  %v1720_v3 = vmul.f32 %v2986_v63, %v1624_v53  ;;  %v1594_v25 = vmul.f32 %v5373_v19, %v5373_v19 }
 0x226   :  { %v1518_v30 = vpop.xlane.xlu0 %1517  ;;  %v1805_v53 = vmul.f32 %v5348_v40, %v1719_v18  ;;  %v1807_v49 = vmul.f32 %v5360_v8, %v1721_v31  ;;  %2989 = vrsqrt.f32 %v1688_v52 }
 0x227   :  { %v1578_v63 = vmul.f32 0.001953125, %v1518_v30  ;;  %v1804_v50 = vmul.f32 %v5342_v20, %v1718_v14  ;;  %v1806_v41 = vmul.f32 %v5354_v57, %v1720_v3  ;;  %v1593_v3 = vmul.f32 %v5387_v62, %v5387_v62 }
 0x228   :  { %v1891_v6 = vadd.f32 %v5351_v22, %v1805_v53  ;;  %v1893_v32 = vadd.f32 %v5363_v46, %v1807_v49 }
 0x229   :  { %v1610_v31 = vsub.f32 %v1578_v63, %v1594_v25  ;;  %v5414_v30 = vadd.f32 %v5345_v34, %v1804_v50  ;;  %v5417_v14 = vadd.f32 %v5357_v4, %v1806_v41 }
 0x22a   :  { %v1513_v52 = vpop.xlane.xlu1 %1512  ;;  %v1960_v13 = vrot.slane %v1891_v6, 4  ;;  %v1972_v53 = vrot.slane %v1893_v32, 4 }
 0x22b   :  { %6364 = vst [vmem:[#allocation8_spill] sm:$0xff] %v5414_v30  ;;  %6365 = vst [vmem:[#allocation7_spill] sm:$0xff] %v5417_v14  ;;  %v1577_v0 = vmul.f32 0.001953125, %v1513_v52  ;;  %v1362_v33 = vpop.xlane.xlu0 %1361  ;;  %v1690_v42 = vadd.f32 1e-05, %v1610_v31  ;;  %v6373_v52 = vsub.f32 %v6354_v12, %v5339_v59 }
 0x22c   :  { %v5423_v51 = vmul.f32 0.001953125, %v1362_v33  ;;  %v1961_v63 = vadd.f32 %v1960_v13, %v1891_v6  ;;  %v5426_v18 = vadd.f32 %v1972_v53, %v1893_v32 }
 0x22d   :  { %v1609_v50 = vsub.f32 %v1577_v0, %v1593_v3  ;;  %2991 = vrsqrt.f32 %v1690_v42 }
 0x22e   :  { %6367 = vst [vmem:[#allocation9_spill] sm:$0xff] %v5426_v18  ;;  %v2988_v28 = vpop.eup %2987  ;;  %v1595_v42 = vmul.f32 %v5423_v51, %v5423_v51 }
 0x22f   :  { %v1722_v31 = vmul.f32 %v2988_v28, %v1626_v43  ;;  %v1723_v17 = vmul.f32 %v2988_v28, %v1627_v23  ;;  %v1724_v25 = vmul.f32 %v2988_v28, %v1628_v21  ;;  %v1725_v0 = vmul.f32 %v2988_v28, %v1629_v37  ;;  %v1523_v13 = vpop.xlane.xlu1 %1522 }
 0x230   :  { %v1689_v6 = vadd.f32 1e-05, %v1609_v50  ;;  %v1579_v3 = vmul.f32 0.001953125, %v1523_v13  ;;  %v1367_v53 = vpop.xlane.xlu0 %1366  ;;  %v1962_v21 = vrot.slane %v1961_v63, 2 }
 0x231   :  { %v1808_v41 = vmul.f32 %v5342_v20, %v1722_v31  ;;  %v1809_v45 = vmul.f32 %v5348_v40, %v1723_v17  ;;  %v1810_v33 = vmul.f32 %v5354_v57, %v1724_v25  ;;  %v1811_v43 = vmul.f32 %v5360_v8, %v1725_v0  ;;  %v6371_v25 = vld [vmem:[#allocation22_spill] sm:$0xff] }
 0x232   :  { %2993 = vrsqrt.f32 %v1689_v6  ;;  %v1611_v28 = vsub.f32 %v1579_v3, %v1595_v42  ;;  %v5443_v23 = vmul.f32 0.001953125, %v1367_v53  ;;  %v1963_v18 = vadd.f32 %v1962_v21, %v1961_v63 }
 0x233   :  { %v1894_v37 = vadd.f32 %v5345_v34, %v1808_v41  ;;  %v1895_v50 = vadd.f32 %v5351_v22, %v1809_v45  ;;  %v1896_v13 = vadd.f32 %v5357_v4, %v1810_v33  ;;  %v1897_v32 = vadd.f32 %v5363_v46, %v1811_v43  ;;  %v5455_v3 = vpop.eup %2989 }
 0x234   :  { %v1691_v31 = vadd.f32 1e-05, %v1611_v28  ;;  %6372 = vst [vmem:[#allocation10_spill] sm:$0xff] %v5455_v3  ;;  %v1528_v14 = vpop.xlane.xlu1 %1527  ;;  %v1596_v28 = vmul.f32 %v5443_v23, %v5443_v23  ;;  %v6377_v21 = vsub.f32 %v6356_v54, %v5339_v59 }
 0x235   :  { %v1978_v42 = vrot.slane %v1894_v37, 4  ;;  %v1984_v41 = vrot.slane %v1895_v50, 4  ;;  %v1990_v53 = vrot.slane %v1896_v13, 4  ;;  %v1996_v45 = vrot.slane %v1897_v32, 4 }
 0x236   :  { %2995 = vrsqrt.f32 %v1691_v31  ;;  %v1580_v43 = vmul.f32 0.001953125, %v1528_v14  ;;  %v1533_v6 = vpop.xlane.xlu0 %1532  ;;  %v1727_v31 = vmul.f32 %v5455_v3, %v6373_v52 }
 0x237   :  { %v1979_v48 = vadd.f32 %v1978_v42, %v1894_v37  ;;  %v1985_v0 = vadd.f32 %v1984_v41, %v1895_v50  ;;  %v1991_v1 = vadd.f32 %v1990_v53, %v1896_v13  ;;  %v5461_v30 = vadd.f32 %v1996_v45, %v1897_v32 }
 0x238   :  { %v1612_v10 = vsub.f32 %v1580_v43, %v1596_v28  ;;  %v1581_v17 = vmul.f32 0.001953125, %v1533_v6  ;;  %v1372_v49 = vpop.xlane.xlu1 %1371  ;;  %v1813_v32 = vmul.f32 %v5348_v40, %v1727_v31  ;;  %v1964_v13 = vrot.slane %v1963_v18, 1 }
 0x239   :  { %v1980_v11 = vrot.slane %v1979_v48, 2  ;;  %v1986_v33 = vrot.slane %v1985_v0, 2  ;;  %v1992_v14 = vrot.slane %v1991_v1, 2  ;;  %v5468_v50 = vmul.f32 0.001953125, %v1372_v49  ;;  %v6378_v49 = vld [vmem:[#allocation24_spill] sm:$0xff] }
 0x23a   :  { %v1692_v37 = vadd.f32 1e-05, %v1612_v10  ;;  %v5471_v42 = vpop.eup %2991  ;;  %v1538_v52 = vpop.xlane.xlu0 %1537  ;;  %v5481_v41 = vmul.f32 %v5455_v3, %v6377_v21  ;;  %v1965_v47 = vadd.f32 %v1964_v13, %v1963_v18  ;;  %v6381_v45 = vsub.f32 %v6360_v5, %v5373_v19  ;;  %v6394_v3 = vld [vmem:[#allocation31_spill] sm:$0xff] }
 0x23b   :  { %6374 = vst [vmem:[#allocation44_spill] sm:$0xff] %v5471_v42  ;;  %v5473_v6 = vadd.f32 %v1980_v11, %v1979_v48  ;;  %v5475_v12 = vadd.f32 %v1992_v14, %v1991_v1  ;;  %v1987_v63 = vadd.f32 %v1986_v33, %v1985_v0  ;;  %v1597_v10 = vmul.f32 %v5468_v50, %v5468_v50  ;;  %v6379_v11 = vld [vmem:[#allocation23_spill] sm:$0xff] }
 0x23c   :  { %2997 = vrsqrt.f32 %v1692_v37  ;;  %v1377_v33 = vpop.xlane.xlu1 %1376  ;;  %v1582_v28 = vmul.f32 0.001953125, %v1538_v52  ;;  %v6380_v14 = vsub.f32 %v6358_v24, %v5373_v19  ;;  %v1899_v0 = vadd.f32 %v5351_v22, %v1813_v32  ;;  %v6382_v24 = vld [vmem:[#allocation26_spill] sm:$0xff] }
 0x23d   :  { %6375 = vst [vmem:[#allocation45_spill] sm:$0xff] %v5473_v6  ;;  %6376 = vst [vmem:[#allocation11_spill] sm:$0xff] %v5475_v12  ;;  %v1613_v43 = vsub.f32 %v1581_v17, %v1597_v10  ;;  %v5495_v31 = vmul.f32 0.001953125, %v1377_v33  ;;  %v1988_v54 = vrot.slane %v1987_v63, 1  ;;  %v5508_v17 = vmul.f32 %v5471_v42, %v6381_v45 }
 0x23e   :  { %v1735_v37 = vmul.f32 %v5471_v42, %v6380_v14  ;;  %v1382_v1 = vpop.xlane.xlu0 %1381  ;;  %v6383_v14 = vld [vmem:[#allocation25_spill] sm:$0xff]  ;;  %v6385_v45 = vsub.f32 %v6362_v38, %v5387_v62  ;;  %v2008_v15 = vrot.slane %v1899_v0, 4  ;;  %v5555_v32 = vmul.f32 0.125, %v1965_v47 }
 0x23f   :  { %v5501_v21 = vpop.eup %2993  ;;  %v1693_v52 = vadd.f32 1e-05, %v1613_v43  ;;  %v1598_v10 = vmul.f32 %v5495_v31, %v5495_v31  ;;  %v5520_v5 = vmul.f32 0.001953125, %v1382_v1  ;;  %v5545_v42 = vadd.f32 %v1988_v54, %v1987_v63  ;;  %v6389_v63 = vld [vmem:[#allocation29_spill] sm:$0xff] }
 0x240   :  { %v1543_v13 = vpop.xlane.xlu1 %1542  ;;  %v1731_v43 = vmul.f32 %v5501_v21, %v6385_v45  ;;  %v1821_v12 = vmul.f32 %v5348_v40, %v1735_v37 }
 0x241   :  { %6384 = vst [vmem:[#allocation12_spill] sm:$0xff] %v5520_v5  ;;  %2999 = vrsqrt.f32 %v1693_v52  ;;  %v1614_v53 = vsub.f32 %v1582_v28, %v1598_v10  ;;  %v1583_v33 = vmul.f32 0.001953125, %v1543_v13  ;;  %v1599_v28 = vmul.f32 %v5520_v5, %v5520_v5 }
 0x242   :  { %v1548_v45 = vpop.xlane.xlu0 %1547  ;;  %v6388_v10 = vsub.f32 %v6369_v35, %v5423_v51  ;;  %v1817_v1 = vmul.f32 %v5348_v40, %v1731_v43  ;;  %v1907_v18 = vadd.f32 %v5351_v22, %v1821_v12  ;;  %v5553_v35 = vadd.f32 %v2008_v15, %v1899_v0 }
 0x243   :  { %v5527_v48 = vpop.eup %2995  ;;  %v1694_v52 = vadd.f32 1e-05, %v1614_v53  ;;  %v1584_v37 = vmul.f32 0.001953125, %v1548_v45  ;;  %v1615_v38 = vsub.f32 %v1583_v33, %v1599_v28  ;;  %v6392_v33 = vsub.f32 %v6371_v25, %v5443_v23 }
 0x244   :  { %v1739_v13 = vmul.f32 %v5527_v48, %v6388_v10  ;;  %v1387_v6 = vpop.xlane.xlu1 %1386  ;;  %v5551_v5 = vadd.f32 %v5351_v22, %v1817_v1  ;;  %v2056_v10 = vrot.slane %v1907_v18, 4  ;;  %v6400_v1 = vsub.f32 %v4951_v27, %v5468_v50 }
 0x245   :  { %3001 = vrsqrt.f32 %v1694_v52  ;;  %v5547_v53 = vmul.f32 0.001953125, %v1387_v6  ;;  %v1695_v43 = vadd.f32 1e-05, %v1615_v38  ;;  %v6390_v6 = vld [vmem:[#allocation30_spill] sm:$0xff] }
 0x246   :  { %v1825_v44 = vmul.f32 %v5348_v40, %v1739_v13  ;;  %v1392_v45 = vpop.xlane.xlu0 %1391  ;;  %v5593_v19 = vadd.f32 %v2056_v10, %v1907_v18 }
 0x247   :  { %v1600_v12 = vmul.f32 %v5547_v53, %v5547_v53  ;;  %v5569_v47 = vmul.f32 0.001953125, %v1392_v45  ;;  %3003 = vrsqrt.f32 %v1695_v43  ;;  %v6418_v29 = vsub.f32 %v6390_v6, %v5547_v53 }
 0x248   :  { %v1553_v0 = vpop.xlane.xlu1 %1552  ;;  %v5572_v38 = vadd.f32 %v5351_v22, %v1825_v44 }
 0x249   :  { %v5563_v52 = vpop.eup %2997  ;;  %6391 = vst [vmem:[#allocation13_spill] sm:$0xff] %v5569_v47  ;;  %v1616_v28 = vsub.f32 %v1584_v37, %v1600_v12  ;;  %v1585_v13 = vmul.f32 0.001953125, %v1553_v0  ;;  %v1601_v12 = vmul.f32 %v5569_v47, %v5569_v47 }
 0x24a   :  { %v1743_v54 = vmul.f32 %v5563_v52, %v6392_v33  ;;  %v1397_v43 = vpop.xlane.xlu0 %1396 }
 0x24b   :  { %v1696_v37 = vadd.f32 1e-05, %v1616_v28  ;;  %v5588_v25 = vmul.f32 0.001953125, %v1397_v43  ;;  %v1617_v44 = vsub.f32 %v1585_v13, %v1601_v12  ;;  %v6397_v13 = vsub.f32 %v6378_v49, %v5468_v50 }
 0x24c   :  { %v1829_v33 = vmul.f32 %v5348_v40, %v1743_v54  ;;  %v1558_v0 = vpop.xlane.xlu1 %1557  ;;  %v6398_v12 = vsub.f32 %v6379_v11, %v5468_v50  ;;  %v6399_v43 = vsub.f32 %v4948_v39, %v5468_v50 }
 0x24d   :  { %3005 = vrsqrt.f32 %v1696_v37  ;;  %v1586_v15 = vmul.f32 0.001953125, %v1558_v0  ;;  %v1602_v18 = vmul.f32 %v5588_v25, %v5588_v25  ;;  %v1697_v45 = vadd.f32 1e-05, %v1617_v44 }
 0x24e   :  { %v3000_v47 = vpop.eup %2999  ;;  %v1407_v10 = vpop.xlane.xlu0 %1406  ;;  %v5623_v49 = vadd.f32 %v5351_v22, %v1829_v33  ;;  %v6402_v33 = vsub.f32 %v6382_v24, %v5495_v31 }
 0x24f   :  { %v1746_v37 = vmul.f32 %v3000_v47, %v6397_v13  ;;  %v1747_v60 = vmul.f32 %v3000_v47, %v6398_v12  ;;  %v1748_v54 = vmul.f32 %v3000_v47, %v6399_v43  ;;  %v5618_v0 = vmul.f32 %v3000_v47, %v6400_v1 }
 0x250   :  { %v1618_v7 = vsub.f32 %v1586_v15, %v1602_v18  ;;  %v5620_v28 = vmul.f32 0.001953125, %v1407_v10  ;;  %v1402_v36 = vpop.xlane.xlu1 %1401  ;;  %3007 = vrsqrt.f32 %v1697_v45  ;;  %v6417_v10 = vsub.f32 %v6389_v63, %v5547_v53 }
 0x251   :  { %v5626_v11 = vmul.f32 %v5342_v20, %v1746_v37  ;;  %v5629_v13 = vmul.f32 %v5354_v57, %v1748_v54  ;;  %v5631_v39 = vmul.f32 0.001953125, %v1402_v36  ;;  %v5634_v27 = vmul.f32 %v5348_v40, %v1747_v60 }
 0x252   :  { %6401 = vst [vmem:[#allocation51_spill] sm:$0xff] %v5620_v28  ;;  %v3002_v50 = vpop.eup %3001  ;;  %v1698_v1 = vadd.f32 1e-05, %v1618_v7  ;;  %v1412_v44 = vpop.xlane.xlu0 %1411  ;;  %v6403_v36 = vsub.f32 %v6383_v14, %v5495_v31  ;;  %v6404_v60 = vsub.f32 %v4956_v58, %v5495_v31  ;;  %v6405_v7 = vsub.f32 %v4966_v16, %v5495_v31  ;;  %v6407_v31 = vld [vmem:[#allocation48_spill] sm:$0xff] }
 0x253   :  { %v1750_v43 = vmul.f32 %v3002_v50, %v6402_v33  ;;  %v5670_v15 = vmul.f32 0.001953125, %v1412_v44 }
 0x254   :  { %v1751_v54 = vmul.f32 %v3002_v50, %v6403_v36  ;;  %v1752_v45 = vmul.f32 %v3002_v50, %v6404_v60  ;;  %v1753_v18 = vmul.f32 %v3002_v50, %v6405_v7  ;;  %3009 = vrsqrt.f32 %v1698_v1  ;;  %v5662_v16 = vpop.eup %3003 }
 0x255   :  { %v1836_v14 = vmul.f32 %v5342_v20, %v1750_v43  ;;  %v1563_v43 = vpop.xlane.xlu1 %1562  ;;  %v1604_v50 = vmul.f32 %v5620_v28, %v5620_v28  ;;  %v6419_v28 = vsub.f32 %v5002_v2, %v5547_v53 }
 0x256   :  { %v1837_v33 = vmul.f32 %v5348_v40, %v1751_v54  ;;  %v1838_v58 = vmul.f32 %v5354_v57, %v1752_v45  ;;  %v1839_v36 = vmul.f32 %v5360_v8, %v1753_v18  ;;  %v1568_v24 = vpop.xlane.xlu0 %1567  ;;  %v1587_v7 = vmul.f32 0.001953125, %v1563_v43 }
 0x257   :  { %v1922_v54 = vadd.f32 %v5345_v34, %v1836_v14  ;;  %v1588_v47 = vmul.f32 0.001953125, %v1568_v24 }
 0x258   :  { %v1923_v45 = vadd.f32 %v5351_v22, %v1837_v33  ;;  %v1924_v18 = vadd.f32 %v5357_v4, %v1838_v58  ;;  %v1925_v12 = vadd.f32 %v5363_v46, %v1839_v36  ;;  %v1603_v36 = vmul.f32 %v5631_v39, %v5631_v39 }
 0x259   :  { %v2146_v14 = vrot.slane %v1922_v54, 4 }
 0x25a   :  { %v2152_v37 = vrot.slane %v1923_v45, 4  ;;  %v2158_v33 = vrot.slane %v1924_v18, 4  ;;  %v2164_v9 = vrot.slane %v1925_v12, 4  ;;  %v3006_v58 = vpop.eup %3005 }
 0x25b   :  { %v5688_v56 = vadd.f32 %v2146_v14, %v1922_v54  ;;  %v1758_v1 = vmul.f32 %v3006_v58, %v6417_v10  ;;  %v1759_v43 = vmul.f32 %v3006_v58, %v6418_v29  ;;  %v1760_v24 = vmul.f32 %v3006_v58, %v6419_v28 }
 0x25c   :  { %v5690_v60 = vadd.f32 %v2152_v37, %v1923_v45  ;;  %v5692_v44 = vadd.f32 %v2158_v33, %v1924_v18  ;;  %v5694_v61 = vadd.f32 %v2164_v9, %v1925_v12  ;;  %v6420_v37 = vsub.f32 %v5015_v55, %v5547_v53  ;;  %v1573_v45 = vpop.xlane.xlu1 %1572 }
 0x25d   :  { %6414 = vst [vmem:[#allocation18_spill] sm:$0xff] %v5688_v56  ;;  %v1844_v6 = vmul.f32 %v5342_v20, %v1758_v1  ;;  %v1845_v29 = vmul.f32 %v5348_v40, %v1759_v43  ;;  %v1846_v2 = vmul.f32 %v5354_v57, %v1760_v24  ;;  %v5716_v55 = vpop.eup %3007  ;;  %v1619_v53 = vsub.f32 %v1587_v7, %v1603_v36 }
 0x25e   :  { %6415 = vst [vmem:[#allocation54_spill] sm:$0xff] %v5692_v44  ;;  %6416 = vst [vmem:[#allocation15_spill] sm:$0xff] %v5694_v61  ;;  %v1761_v54 = vmul.f32 %v3006_v58, %v6420_v37  ;;  %v1620_v18 = vsub.f32 %v1588_v47, %v1604_v50  ;;  %v1589_v14 = vmul.f32 0.001953125, %v1573_v45  ;;  %v1605_v33 = vmul.f32 %v5670_v15, %v5670_v15 }
 0x25f   :  { %v1930_v58 = vadd.f32 %v5345_v34, %v1844_v6  ;;  %v1931_v37 = vadd.f32 %v5351_v22, %v1845_v29  ;;  %v1932_v1 = vadd.f32 %v5357_v4, %v1846_v2  ;;  %v1919_v47 = vadd.f32 %v5351_v22, %v5634_v27 }
 0x260   :  { %v1847_v28 = vmul.f32 %v5360_v8, %v1761_v54  ;;  %v1699_v54 = vadd.f32 1e-05, %v1619_v53  ;;  %v1700_v63 = vadd.f32 1e-05, %v1620_v18  ;;  %v1621_v9 = vsub.f32 %v1589_v14, %v1605_v33 }
 0x261   :  { %v5724_v24 = vpop.eup %3009  ;;  %v2194_v50 = vrot.slane %v1930_v58, 4  ;;  %v2200_v7 = vrot.slane %v1931_v37, 4  ;;  %v2206_v36 = vrot.slane %v1932_v1, 4  ;;  %v6421_v29 = vrot.slane %v5553_v35, 2 }
 0x262   :  { %v1933_v43 = vadd.f32 %v5363_v46, %v1847_v28  ;;  %3011 = vrsqrt.f32 %v1699_v54  ;;  %v1701_v6 = vadd.f32 1e-05, %v1621_v9  ;;  %v6422_v28 = vrot.slane %v5551_v5, 4 }
 0x263   :  { %v2011_v2 = vadd.f32 %v6421_v29, %v5553_v35  ;;  %v5734_v53 = vadd.f32 %v2194_v50, %v1930_v58  ;;  %v5736_v18 = vadd.f32 %v2200_v7, %v1931_v37  ;;  %v5738_v14 = vadd.f32 %v2206_v36, %v1932_v1  ;;  %v6427_v29 = vld [vmem:[#allocation55_spill] sm:$0xff] }
 0x264   :  { %v2212_v45 = vrot.slane %v1933_v43, 4  ;;  %v2033_v10 = vadd.f32 %v6422_v28, %v5551_v5  ;;  %3013 = vrsqrt.f32 %v1700_v63  ;;  %v2058_v54 = vrot.slane %v5593_v19, 2 }
 0x265   :  { %6423 = vst [vmem:[#allocation19_spill] sm:$0xff] %v5734_v53  ;;  %6424 = vst [vmem:[#allocation22_spill] sm:$0xff] %v5738_v14  ;;  %v2012_v33 = vrot.slane %v2011_v2, 1  ;;  %3015 = vrsqrt.f32 %v1701_v6  ;;  %v6426_v35 = vrot.slane %v5572_v38, 4  ;;  %v2104_v58 = vrot.slane %v5623_v49, 4 }
 0x266   :  { %v5740_v27 = vadd.f32 %v2212_v45, %v1933_v43  ;;  %v2034_v9 = vrot.slane %v2033_v10, 2  ;;  %v2128_v37 = vrot.slane %v1919_v47, 4  ;;  %v2059_v43 = vadd.f32 %v2058_v54, %v5593_v19 }
 0x267   :  { %v2081_v5 = vadd.f32 %v6426_v35, %v5572_v38  ;;  %v2013_v50 = vadd.f32 %v2012_v33, %v2011_v2  ;;  %v2344_v7 = vmul.f32 0.125, %v5545_v42  ;;  %v2105_v36 = vadd.f32 %v2104_v58, %v5623_v49  ;;  %v6429_v33 = vld [vmem:[#allocation57_spill] sm:$0xff] }
 0x268   :  { %6425 = vst [vmem:[#allocation24_spill] sm:$0xff] %v5740_v27  ;;  %v2035_v1 = vadd.f32 %v2034_v9, %v2033_v10  ;;  %v2129_v45 = vadd.f32 %v2128_v37, %v1919_v47  ;;  %v6428_v6 = vsub.f32 %v6427_v29, %v5387_v62  ;;  %v2060_v35 = vrot.slane %v2059_v43, 1  ;;  %v6431_v37 = vld [vmem:[#allocation59_spill] sm:$0xff] }
 0x269   :  { %v2082_v63 = vrot.slane %v2081_v5, 2  ;;  %v2348_v12 = vmul.f32 0.125, %v2013_v50  ;;  %v2552_v10 = vsel %vm2538_vm0, %v2344_v7, %v5555_v32  ;;  %v2106_v2 = vrot.slane %v2105_v36, 2 }
 0x26a   :  { %v1733_v28 = vmul.f32 %v5501_v21, %v6428_v6  ;;  %v2036_v38 = vrot.slane %v2035_v1, 1  ;;  %v2130_v42 = vrot.slane %v2129_v45, 2  ;;  %v6430_v49 = vsub.f32 %v6429_v33, %v5423_v51 }
 0x26b   :  { %v2083_v19 = vadd.f32 %v2082_v63, %v2081_v5  ;;  %v2061_v54 = vadd.f32 %v2060_v35, %v2059_v43  ;;  %v2553_v58 = vsel %vm2540_vm1, %v2348_v12, %v2552_v10  ;;  %v6432_v50 = vsub.f32 %v6431_v37, %v5443_v23 }
 0x26c   :  { %v1741_v47 = vmul.f32 %v5527_v48, %v6430_v49  ;;  %v2037_v9 = vadd.f32 %v2036_v38, %v2035_v1  ;;  %v2107_v32 = vadd.f32 %v2106_v2, %v2105_v36  ;;  %v2131_v5 = vadd.f32 %v2130_v42, %v2129_v45 }
 0x26d   :  { %v1745_v29 = vmul.f32 %v5563_v52, %v6432_v50  ;;  %v2084_v6 = vrot.slane %v2083_v19, 1  ;;  %v1815_v7 = vmul.f32 %v5360_v8, %v5481_v41  ;;  %v2356_v14 = vmul.f32 0.125, %v2061_v54 }
 0x26e   :  { %v2352_v63 = vmul.f32 0.125, %v2037_v9  ;;  %v1819_v33 = vmul.f32 %v5360_v8, %v1733_v28  ;;  %v1823_v1 = vmul.f32 %v5360_v8, %v5508_v17  ;;  %v2108_v12 = vrot.slane %v2107_v32, 1 }
 0x26f   :  { %v2085_v43 = vadd.f32 %v2084_v6, %v2083_v19  ;;  %v2132_v38 = vrot.slane %v2131_v5, 1  ;;  %v1827_v35 = vmul.f32 %v5360_v8, %v1741_v47  ;;  %v1831_v36 = vmul.f32 %v5360_v8, %v1745_v29  ;;  %v5776_v2 = vpop.eup %3011 }
 0x270   :  { %v2554_v10 = vsel %vm2542_vm2, %v2352_v63, %v2553_v58  ;;  %v1835_v45 = vmul.f32 %v5360_v8, %v5618_v0  ;;  %v1901_v41 = vadd.f32 %v5363_v46, %v1815_v7  ;;  %v2109_v28 = vadd.f32 %v2108_v12, %v2107_v32  ;;  %v6433_v32 = vld [vmem:[#allocation9_spill] sm:$0xff] }
 0x271   :  { %v2133_v42 = vadd.f32 %v2132_v38, %v2131_v5  ;;  %v2360_v49 = vmul.f32 0.125, %v2085_v43  ;;  %v2555_v17 = vsel %vm2544_vm3, %v2356_v14, %v2554_v10  ;;  %v1905_v19 = vadd.f32 %v5363_v46, %v1819_v33  ;;  %v5783_v58 = vpop.eup %3013 }
 0x272   :  { %v1909_v47 = vadd.f32 %v5363_v46, %v1823_v1  ;;  %v1913_v9 = vadd.f32 %v5363_v46, %v1827_v35  ;;  %v1917_v54 = vadd.f32 %v5363_v46, %v1831_v36  ;;  %v2364_v0 = vmul.f32 0.125, %v2109_v28  ;;  %v5787_v6 = vpop.eup %3015 }
 0x273   :  { %v2368_v37 = vmul.f32 0.125, %v2133_v42  ;;  %v2556_v50 = vsel %vm2546_vm4, %v2360_v49, %v2555_v17  ;;  %v1921_v29 = vadd.f32 %v5363_v46, %v1835_v45  ;;  %v1974_v14 = vrot.slane %v6433_v32, 2 }
 0x274   :  { %v6434_v5 = vrot.slane %v5461_v30, 2  ;;  %v2020_v63 = vrot.slane %v1901_v41, 4  ;;  %v2044_v33 = vrot.slane %v1905_v19, 4  ;;  %v2557_v1 = vsel %vm2548_vm5, %v2364_v0, %v2556_v50 }
 0x275   :  { %v2068_v43 = vrot.slane %v1909_v47, 4  ;;  %v2092_v12 = vrot.slane %v1913_v9, 4  ;;  %v2116_v38 = vrot.slane %v1917_v54, 4  ;;  %v2558_v35 = vsel %vm2550_vm6, %v2368_v37, %v2557_v1 }
 0x276   :  { %v1999_v7 = vadd.f32 %v6434_v5, %v5461_v30  ;;  %v1975_v10 = vadd.f32 %v1974_v14, %v6433_v32  ;;  %v2021_v45 = vadd.f32 %v2020_v63, %v1901_v41  ;;  %2673 = vmatprep.mubr.f32.mxu0 %v2558_v35  ;;  %v2045_v28 = vadd.f32 %v2044_v33, %v1905_v19  ;;  %v6437_v33 = vld [vmem:[#allocation10_spill] sm:$0xff] }
 0x277   :  { %v2069_v42 = vadd.f32 %v2068_v43, %v1909_v47  ;;  %v2093_v49 = vadd.f32 %v2092_v12, %v1913_v9  ;;  %v2117_v17 = vadd.f32 %v2116_v38, %v1917_v54  ;;  %v2140_v53 = vrot.slane %v1921_v29, 4  ;;  %v6435_v54 = vld [vmem:[#allocation14_spill] sm:$0xff] }
 0x278   :  { %v2000_v36 = vrot.slane %v1999_v7, 1  ;;  %v1976_v44 = vrot.slane %v1975_v10, 1  ;;  %v2022_v5 = vrot.slane %v2021_v45, 2  ;;  %v2046_v56 = vrot.slane %v2045_v28, 2 }
 0x279   :  { %v2070_v0 = vrot.slane %v2069_v42, 2  ;;  %v2094_v50 = vrot.slane %v2093_v49, 2  ;;  %v2118_v27 = vrot.slane %v2117_v17, 2  ;;  %v2141_v37 = vadd.f32 %v2140_v53, %v1921_v29 }
 0x27a   :  { %v2001_v30 = vadd.f32 %v2000_v36, %v1999_v7  ;;  %v1977_v61 = vadd.f32 %v1976_v44, %v1975_v10  ;;  %v2023_v46 = vadd.f32 %v2022_v5, %v2021_v45  ;;  %v2047_v32 = vadd.f32 %v2046_v56, %v2045_v28  ;;  %v6438_v56 = vld [vmem:[#allocation16_spill] sm:$0xff]  ;;  %v6441_v5 = vld [vmem:[#allocation5_spill] sm:$0xff] }
 0x27b   :  { %v2071_v14 = vadd.f32 %v2070_v0, %v2069_v42  ;;  %v2095_v41 = vadd.f32 %v2094_v50, %v2093_v49  ;;  %v2119_v63 = vadd.f32 %v2118_v27, %v2117_v17  ;;  %v2142_v47 = vrot.slane %v2141_v37, 2  ;;  %v6443_v50 = vld [vmem:[#allocation44_spill] sm:$0xff] }
 0x27c   :  { %v2346_v1 = vmul.f32 0.125, %v2001_v30  ;;  %v2024_v19 = vrot.slane %v2023_v46, 1  ;;  %v2342_v9 = vmul.f32 0.125, %v1977_v61  ;;  %v6436_v7 = vsub.f32 %v6435_v54, %v5339_v59  ;;  %v6440_v30 = vld [vmem:[#allocation17_spill] sm:$0xff] }
 0x27d   :  { %v2048_v12 = vrot.slane %v2047_v32, 1  ;;  %v2072_v38 = vrot.slane %v2071_v14, 1  ;;  %v2096_v35 = vrot.slane %v2095_v41, 1  ;;  %v2120_v36 = vrot.slane %v2119_v63, 1 }
 0x27e   :  { %v1726_v43 = vmul.f32 %v6437_v33, %v6436_v7  ;;  %v2025_v44 = vadd.f32 %v2024_v19, %v2023_v46  ;;  %v2143_v10 = vadd.f32 %v2142_v47, %v2141_v37  ;;  %v2566_v53 = vsel %vm2538_vm0, %v2346_v1, %v2342_v9  ;;  %v6444_v46 = vld [vmem:[#allocation20_spill] sm:$0xff] }
 0x27f   :  { %v6439_v29 = vsub.f32 %v6438_v56, %v5387_v62  ;;  %v2049_v45 = vadd.f32 %v2048_v12, %v2047_v32  ;;  %v2073_v61 = vadd.f32 %v2072_v38, %v2071_v14  ;;  %v2097_v28 = vadd.f32 %v2096_v35, %v2095_v41  ;;  %v6446_v41 = vld [vmem:[#allocation21_spill] sm:$0xff] }
 0x280   :  { %v2121_v42 = vadd.f32 %v2120_v36, %v2119_v63  ;;  %v2144_v49 = vrot.slane %v2143_v10, 1  ;;  %v2350_v17 = vmul.f32 0.125, %v2025_v44  ;;  %v6442_v0 = vsub.f32 %v6440_v30, %v6441_v5  ;;  %v6448_v30 = vld [vmem:[#allocation8_spill] sm:$0xff] }
 0x281   :  { %v1730_v27 = vmul.f32 %v5501_v21, %v6439_v29  ;;  %v6445_v37 = vsub.f32 %v6444_v46, %v5423_v51  ;;  %v2354_v19 = vmul.f32 0.125, %v2049_v45  ;;  %v2358_v47 = vmul.f32 0.125, %v2073_v61 }
 0x282   :  { %v1734_v54 = vmul.f32 %v6443_v50, %v6442_v0  ;;  %v2362_v9 = vmul.f32 0.125, %v2097_v28  ;;  %v2366_v7 = vmul.f32 0.125, %v2121_v42  ;;  %v2145_v32 = vadd.f32 %v2144_v49, %v2143_v10 }
 0x283   :  { %v1738_v1 = vmul.f32 %v5527_v48, %v6445_v37  ;;  %v2567_v14 = vsel %vm2540_vm1, %v2350_v17, %v2566_v53  ;;  %v6447_v63 = vsub.f32 %v6446_v41, %v5443_v23  ;;  %v1812_v38 = vmul.f32 %v5342_v20, %v1726_v43  ;;  %v6450_v37 = vld [vmem:[#allocation45_spill] sm:$0xff] }
 0x284   :  { %v2568_v35 = vsel %vm2542_vm2, %v2354_v19, %v2567_v14  ;;  %v1816_v36 = vmul.f32 %v5342_v20, %v1730_v27  ;;  %v1820_v44 = vmul.f32 %v5342_v20, %v1734_v54  ;;  %v2370_v29 = vmul.f32 0.125, %v2145_v32 }
 0x285   :  { %v1742_v12 = vmul.f32 %v5563_v52, %v6447_v63  ;;  %v1824_v56 = vmul.f32 %v5342_v20, %v1738_v1  ;;  %v2569_v10 = vsel %vm2544_vm3, %v2358_v47, %v2568_v35  ;;  %v1898_v45 = vadd.f32 %v5345_v34, %v1812_v38 }
 0x286   :  { %v2570_v61 = vsel %vm2546_vm4, %v2362_v9, %v2569_v10  ;;  %v1902_v28 = vadd.f32 %v5345_v34, %v1816_v36  ;;  %v1906_v43 = vadd.f32 %v5345_v34, %v1820_v44  ;;  %v1918_v17 = vadd.f32 %v5345_v34, %v5626_v11 }
 0x287   :  { %v1828_v53 = vmul.f32 %v5342_v20, %v1742_v12  ;;  %v1910_v42 = vadd.f32 %v5345_v34, %v1824_v56  ;;  %v2571_v27 = vsel %vm2548_vm5, %v2366_v7, %v2570_v61  ;;  %v6449_v0 = vrot.slane %v6448_v30, 4  ;;  %v6452_v61 = vld [vmem:[#allocation50_spill] sm:$0xff] }
 0x288   :  { %v2572_v46 = vsel %vm2550_vm6, %v2370_v29, %v2571_v27  ;;  %v6451_v1 = vrot.slane %v6450_v37, 1  ;;  %v2002_v47 = vrot.slane %v1898_v45, 4  ;;  %v2026_v9 = vrot.slane %v1902_v28, 4 }
 0x289   :  { %v1914_v49 = vadd.f32 %v5345_v34, %v1828_v53  ;;  %v1955_v54 = vadd.f32 %v6449_v0, %v6448_v30  ;;  %2748 = vmatprep.mubr.f32.mxu1 %v2572_v46  ;;  %v2050_v7 = vrot.slane %v1906_v43, 4  ;;  %v2074_v14 = vrot.slane %v1910_v42, 4 }
 0x28a   :  { %v1983_v19 = vadd.f32 %v6451_v1, %v6450_v37  ;;  %v2003_v63 = vadd.f32 %v2002_v47, %v1898_v45  ;;  %v2027_v12 = vadd.f32 %v2026_v9, %v1902_v28  ;;  %v2122_v11 = vrot.slane %v1918_v17, 4 }
 0x28b   :  { %v1956_v32 = vrot.slane %v1955_v54, 2  ;;  %v2098_v41 = vrot.slane %v1914_v49, 4  ;;  %v2051_v36 = vadd.f32 %v2050_v7, %v1906_v43  ;;  %v2075_v44 = vadd.f32 %v2074_v14, %v1910_v42 }
 0x28c   :  { %v2343_v38 = vmul.f32 0.125, %v1983_v19  ;;  %v2004_v29 = vrot.slane %v2003_v63, 2  ;;  %v2028_v10 = vrot.slane %v2027_v12, 2  ;;  %v2123_v53 = vadd.f32 %v2122_v11, %v1918_v17  ;;  %v6454_v19 = vld [vmem:[#allocation53_spill] sm:$0xff] }
 0x28d   :  { %v1957_v35 = vadd.f32 %v1956_v32, %v1955_v54  ;;  %v2099_v56 = vadd.f32 %v2098_v41, %v1914_v49  ;;  %v6453_v27 = vsub.f32 %v6452_v61, %v5339_v59  ;;  %v2052_v46 = vrot.slane %v2051_v36, 2 }
 0x28e   :  { %v2076_v37 = vrot.slane %v2075_v44, 2  ;;  %v2005_v45 = vadd.f32 %v2004_v29, %v2003_v63  ;;  %v2029_v28 = vadd.f32 %v2028_v10, %v2027_v12  ;;  %v2124_v47 = vrot.slane %v2123_v53, 2 }
 0x28f   :  { %v1728_v30 = vmul.f32 %v6437_v33, %v6453_v27  ;;  %v1958_v0 = vrot.slane %v1957_v35, 1  ;;  %v2100_v1 = vrot.slane %v2099_v56, 2  ;;  %v6455_v43 = vsub.f32 %v6454_v19, %v5387_v62  ;;  %v6456_v33 = vld [vmem:[#allocation52_spill] sm:$0xff] }
 0x290   :  { %v2053_v54 = vadd.f32 %v2052_v46, %v2051_v36  ;;  %v2077_v17 = vadd.f32 %v2076_v37, %v2075_v44  ;;  %v2006_v32 = vrot.slane %v2005_v45, 1  ;;  %v2030_v59 = vrot.slane %v2029_v28, 1  ;;  %v6460_v46 = vld [vmem:[#allocation58_spill] sm:$0xff] }
 0x291   :  { %v1732_v42 = vmul.f32 %v5501_v21, %v6455_v43  ;;  %v1959_v49 = vadd.f32 %v1958_v0, %v1957_v35  ;;  %v2101_v9 = vadd.f32 %v2100_v1, %v2099_v56  ;;  %v2125_v7 = vadd.f32 %v2124_v47, %v2123_v53  ;;  %v6458_v21 = vld [vmem:[#allocation56_spill] sm:$0xff] }
 0x292   :  { %v6457_v14 = vsub.f32 %v6456_v33, %v6441_v5  ;;  %v2054_v63 = vrot.slane %v2053_v54, 1  ;;  %v2078_v12 = vrot.slane %v2077_v17, 1  ;;  %v2007_v10 = vadd.f32 %v2006_v32, %v2005_v45  ;;  %v6462_v33 = vld [vmem:[#allocation7_spill] sm:$0xff] }
 0x293   :  { %v2102_v11 = vrot.slane %v2101_v9, 1  ;;  %v2339_v29 = vmul.f32 0.125, %v1959_v49  ;;  %v2031_v62 = vadd.f32 %v2030_v59, %v2029_v28  ;;  %v2126_v61 = vrot.slane %v2125_v7, 1 }
 0x294   :  { %v1736_v41 = vmul.f32 %v6443_v50, %v6457_v14  ;;  %v6459_v35 = vsub.f32 %v6458_v21, %v5423_v51  ;;  %v2055_v44 = vadd.f32 %v2054_v63, %v2053_v54  ;;  %v2079_v56 = vadd.f32 %v2078_v12, %v2077_v17  ;;  %v6464_v12 = vld [vmem:[#allocation11_spill] sm:$0xff] }
 0x295   :  { %v2103_v53 = vadd.f32 %v2102_v11, %v2101_v9  ;;  %v2539_v27 = vsel %vm2538_vm0, %v2343_v38, %v2339_v29  ;;  %v2127_v5 = vadd.f32 %v2126_v61, %v2125_v7  ;;  %v2347_v0 = vmul.f32 0.125, %v2007_v10 }
 0x296   :  { %v1740_v36 = vmul.f32 %v5527_v48, %v6459_v35  ;;  %v2351_v50 = vmul.f32 0.125, %v2031_v62  ;;  %v6461_v37 = vsub.f32 %v6460_v46, %v5443_v23  ;;  %v2355_v45 = vmul.f32 0.125, %v2055_v44 }
 0x297   :  { %v2359_v28 = vmul.f32 0.125, %v2079_v56  ;;  %v2363_v47 = vmul.f32 0.125, %v2103_v53  ;;  %v1814_v51 = vmul.f32 %v5354_v57, %v1728_v30  ;;  %v2367_v19 = vmul.f32 0.125, %v2127_v5 }
 0x298   :  { %v1744_v1 = vmul.f32 %v5563_v52, %v6461_v37  ;;  %v2541_v48 = vsel %vm2540_vm1, %v2347_v0, %v2539_v27  ;;  %v1818_v43 = vmul.f32 %v5354_v57, %v1732_v42  ;;  %v1822_v38 = vmul.f32 %v5354_v57, %v1736_v41 }
 0x299   :  { %v2543_v49 = vsel %vm2542_vm2, %v2351_v50, %v2541_v48  ;;  %v1826_v54 = vmul.f32 %v5354_v57, %v1740_v36  ;;  %v1900_v52 = vadd.f32 %v5357_v4, %v1814_v51  ;;  %v1920_v32 = vadd.f32 %v5357_v4, %v5629_v13  ;;  %v6467_v48 = vld [vmem:[#allocation12_spill] sm:$0xff] }
 0x29a   :  { %v1830_v23 = vmul.f32 %v5354_v57, %v1744_v1  ;;  %v2545_v17 = vsel %vm2544_vm3, %v2355_v45, %v2543_v49  ;;  %v1904_v9 = vadd.f32 %v5357_v4, %v1818_v43  ;;  %v1908_v30 = vadd.f32 %v5357_v4, %v1822_v38 }
 0x29b   :  { %v2547_v42 = vsel %vm2546_vm4, %v2359_v28, %v2545_v17  ;;  %v1912_v59 = vadd.f32 %v5357_v4, %v1826_v54  ;;  %v6463_v14 = vrot.slane %v6462_v33, 4  ;;  %v6465_v11 = vrot.slane %v6464_v12, 1 }
 0x29c   :  { %v1916_v7 = vadd.f32 %v5357_v4, %v1830_v23  ;;  %v2549_v63 = vsel %vm2548_vm5, %v2363_v47, %v2547_v42  ;;  %v2014_v10 = vrot.slane %v1900_v52, 4  ;;  %v2038_v62 = vrot.slane %v1904_v9, 4  ;;  %v6469_v42 = vld [vmem:[#allocation13_spill] sm:$0xff] }
 0x29d   :  { %v1967_v41 = vadd.f32 %v6463_v14, %v6462_v33  ;;  %v1995_v29 = vadd.f32 %v6465_v11, %v6464_v12  ;;  %v2551_v13 = vsel %vm2550_vm6, %v2367_v19, %v2549_v63  ;;  %v2062_v21 = vrot.slane %v1908_v30, 4  ;;  %v6466_v19 = vld [vmem:[#allocation27_spill] sm:$0xff] }
 0x29e   :  { %v2086_v35 = vrot.slane %v1912_v59, 4  ;;  %2674 = vmatmul.mubr.f32.vlgmr.msra.gmra.mxu0 %v2551_v13  ;;  %v2015_v36 = vadd.f32 %v2014_v10, %v1900_v52  ;;  %v2039_v44 = vadd.f32 %v2038_v62, %v1904_v9  ;;  %v2110_v56 = vrot.slane %v1916_v7, 4 }
 0x29f   :  { %v1968_v61 = vrot.slane %v1967_v41, 2  ;;  %v2134_v53 = vrot.slane %v1920_v32, 4  ;;  %v2063_v5 = vadd.f32 %v2062_v21, %v1908_v30  ;;  %v2345_v50 = vmul.f32 0.125, %v1995_v29 }
 0x2a0   :  { %v2087_v0 = vadd.f32 %v2086_v35, %v1912_v59  ;;  %v2016_v46 = vrot.slane %v2015_v36, 2  ;;  %v2040_v37 = vrot.slane %v2039_v44, 2  ;;  %v2111_v1 = vadd.f32 %v2110_v56, %v1916_v7 }
 0x2a1   :  { %v1969_v27 = vadd.f32 %v1968_v61, %v1967_v41  ;;  %v2135_v45 = vadd.f32 %v2134_v53, %v1920_v32  ;;  %v2064_v47 = vrot.slane %v2063_v5, 2  ;;  %v6468_v43 = vsub.f32 %v6466_v19, %v6467_v48 }
 0x2a2   :  { %v2088_v51 = vrot.slane %v2087_v0, 2  ;;  %v2017_v49 = vadd.f32 %v2016_v46, %v2015_v36  ;;  %v2041_v54 = vadd.f32 %v2040_v37, %v2039_v44  ;;  %v2112_v23 = vrot.slane %v2111_v1, 2  ;;  %v6473_v37 = vld [vmem:[#allocation35_spill] sm:$0xff] }
 0x2a3   :  { %v1970_v28 = vrot.slane %v1969_v27, 1  ;;  %v1755_v38 = vmul.f32 %v5662_v16, %v6468_v43  ;;  %v2136_v52 = vrot.slane %v2135_v45, 2  ;;  %v2065_v9 = vadd.f32 %v2064_v47, %v2063_v5  ;;  %v6476_v47 = vld [vmem:[#allocation39_spill] sm:$0xff] }
 0x2a4   :  { %v2089_v30 = vadd.f32 %v2088_v51, %v2087_v0  ;;  %v6470_v59 = vsub.f32 %v6394_v3, %v6469_v42  ;;  %v2018_v7 = vrot.slane %v2017_v49, 1  ;;  %v2042_v33 = vrot.slane %v2041_v54, 1 }
 0x2a5   :  { %v1971_v17 = vadd.f32 %v1970_v28, %v1969_v27  ;;  %v2113_v14 = vadd.f32 %v2112_v23, %v2111_v1  ;;  %v2137_v41 = vadd.f32 %v2136_v52, %v2135_v45  ;;  %v2066_v63 = vrot.slane %v2065_v9, 1  ;;  %v6474_v1 = vld [vmem:[#allocation51_spill] sm:$0xff] }
 0x2a6   :  { %v1763_v32 = vmul.f32 %v5716_v55, %v6470_v59  ;;  %v2090_v12 = vrot.slane %v2089_v30, 1  ;;  %v6471_v29 = vsub.f32 %v6396_v26, %v5588_v25  ;;  %v2019_v62 = vadd.f32 %v2018_v7, %v2017_v49 }
 0x2a7   :  { %v2341_v11 = vmul.f32 0.125, %v1971_v17  ;;  %v2043_v13 = vadd.f32 %v2042_v33, %v2041_v54  ;;  %v2114_v61 = vrot.slane %v2113_v14, 1  ;;  %v2138_v21 = vrot.slane %v2137_v41, 1 }
 0x2a8   :  { %v1767_v10 = vmul.f32 %v5724_v24, %v6471_v29  ;;  %v2067_v35 = vadd.f32 %v2066_v63, %v2065_v9  ;;  %v2091_v3 = vadd.f32 %v2090_v12, %v2089_v30  ;;  %v6472_v44 = vsub.f32 %v6407_v31, %v5631_v39 }
 0x2a9   :  { %v2559_v36 = vsel %vm2538_vm0, %v2345_v50, %v2341_v11  ;;  %v2115_v53 = vadd.f32 %v2114_v61, %v2113_v14  ;;  %v2139_v27 = vadd.f32 %v2138_v21, %v2137_v41  ;;  %v2349_v5 = vmul.f32 0.125, %v2019_v62 }
 0x2aa   :  { %v1771_v56 = vmul.f32 %v5776_v2, %v6472_v44  ;;  %v2353_v0 = vmul.f32 0.125, %v2043_v13  ;;  %v2357_v26 = vmul.f32 0.125, %v2067_v35  ;;  %v2361_v46 = vmul.f32 0.125, %v2091_v3 }
 0x2ab   :  { %v6475_v45 = vsub.f32 %v6473_v37, %v6474_v1  ;;  %v6477_v51 = vsub.f32 %v6476_v47, %v5670_v15  ;;  %v2365_v19 = vmul.f32 0.125, %v2115_v53  ;;  %v2369_v31 = vmul.f32 0.125, %v2139_v27 }
 0x2ac   :  { %v2560_v43 = vsel %vm2540_vm1, %v2349_v5, %v2559_v36  ;;  %v1841_v49 = vmul.f32 %v5348_v40, %v1755_v38  ;;  %v1849_v23 = vmul.f32 %v5348_v40, %v1763_v32  ;;  %v1853_v52 = vmul.f32 %v5348_v40, %v1767_v10 }
 0x2ad   :  { %v1775_v28 = vmul.f32 %v5783_v58, %v6475_v45  ;;  %v1779_v50 = vmul.f32 %v5787_v6, %v6477_v51  ;;  %v2561_v54 = vsel %vm2542_vm2, %v2353_v0, %v2560_v43  ;;  %v1857_v17 = vmul.f32 %v5348_v40, %v1771_v56 }
 0x2ae   :  { %v2562_v9 = vsel %vm2544_vm3, %v2357_v26, %v2561_v54  ;;  %v1927_v7 = vadd.f32 %v5351_v22, %v1841_v49  ;;  %v1935_v38 = vadd.f32 %v5351_v22, %v1849_v23  ;;  %v1939_v14 = vadd.f32 %v5351_v22, %v1853_v52  ;;  %v6479_v23 = vld [vmem:[#allocation61_spill] sm:$0xff] }
 0x2af   :  { %v1861_v30 = vmul.f32 %v5348_v40, %v1775_v28  ;;  %v1865_v59 = vmul.f32 %v5348_v40, %v1779_v50  ;;  %v2563_v33 = vsel %vm2546_vm4, %v2361_v46, %v2562_v9  ;;  %v1943_v32 = vadd.f32 %v5351_v22, %v1857_v17 }
 0x2b0   :  { %v2564_v41 = vsel %vm2548_vm5, %v2365_v19, %v2563_v33  ;;  %v6478_v11 = vrot.slane %v5690_v60, 2  ;;  %v2176_v10 = vrot.slane %v1927_v7, 4  ;;  %v2202_v62 = vrot.slane %v5736_v18, 2 }
 0x2b1   :  { %v1947_v63 = vadd.f32 %v5351_v22, %v1861_v30  ;;  %v1951_v12 = vadd.f32 %v5351_v22, %v1865_v59  ;;  %v2565_v29 = vsel %vm2550_vm6, %v2369_v31, %v2564_v41  ;;  %v2224_v13 = vrot.slane %v1935_v38, 4 }
 0x2b2   :  { %v2155_v40 = vadd.f32 %v6478_v11, %v5690_v60  ;;  %2749 = vmatmul.mubr.f32.vlgmr.msra.gmra.mxu1 %v2565_v29  ;;  %v2248_v21 = vrot.slane %v1939_v14, 4  ;;  %v2272_v35 = vrot.slane %v1943_v32, 4  ;;  %v2177_v36 = vadd.f32 %v2176_v10, %v1927_v7  ;;  %v6483_v29 = vld [vmem:[#allocation36_spill] sm:$0xff] }
 0x2b3   :  { %v2296_v3 = vrot.slane %v1947_v63, 4  ;;  %v2203_v44 = vadd.f32 %v2202_v62, %v5736_v18  ;;  %v2225_v56 = vadd.f32 %v2224_v13, %v1935_v38  ;;  %v2320_v22 = vrot.slane %v1951_v12, 4 }
 0x2b4   :  { %v2156_v61 = vrot.slane %v2155_v40, 1  ;;  %v2249_v27 = vadd.f32 %v2248_v21, %v1939_v14  ;;  %v2273_v5 = vadd.f32 %v2272_v35, %v1943_v32  ;;  %v2178_v0 = vrot.slane %v2177_v36, 2  ;;  %v6481_v32 = vld [vmem:[#allocation47_spill] sm:$0xff]  ;;  %v6485_v35 = vld [vmem:[#allocation46_spill] sm:$0xff] }
 0x2b5   :  { %v2297_v60 = vadd.f32 %v2296_v3, %v1947_v63  ;;  %v2204_v26 = vrot.slane %v2203_v44, 1  ;;  %v2226_v46 = vrot.slane %v2225_v56, 2  ;;  %v2321_v37 = vadd.f32 %v2320_v22, %v1951_v12 }
 0x2b6   :  { %v2157_v53 = vadd.f32 %v2156_v61, %v2155_v40  ;;  %v2250_v45 = vrot.slane %v2249_v27, 2  ;;  %v2274_v28 = vrot.slane %v2273_v5, 2  ;;  %v2179_v50 = vadd.f32 %v2178_v0, %v2177_v36 }
 0x2b7   :  { %v2298_v47 = vrot.slane %v2297_v60, 2  ;;  %v2205_v19 = vadd.f32 %v2204_v26, %v2203_v44  ;;  %v2227_v31 = vadd.f32 %v2226_v46, %v2225_v56  ;;  %v2322_v43 = vrot.slane %v2321_v37, 2  ;;  %v6489_v46 = vld [vmem:[#allocation64_spill] sm:$0xff] }
 0x2b8   :  { %v2372_v51 = vmul.f32 0.125, %v2157_v53  ;;  %v2251_v49 = vadd.f32 %v2250_v45, %v2249_v27  ;;  %v2275_v18 = vadd.f32 %v2274_v28, %v2273_v5  ;;  %v6480_v52 = vsub.f32 %v6479_v23, %v6467_v48  ;;  %v6487_v53 = vld [vmem:[#allocation38_spill] sm:$0xff] }
 0x2b9   :  { %v2299_v54 = vadd.f32 %v2298_v47, %v2297_v60  ;;  %v2180_v9 = vrot.slane %v2179_v50, 1  ;;  %v2228_v30 = vrot.slane %v2227_v31, 1  ;;  %v2323_v59 = vadd.f32 %v2322_v43, %v2321_v37 }
 0x2ba   :  { %v1757_v17 = vmul.f32 %v5662_v16, %v6480_v52  ;;  %v2380_v7 = vmul.f32 0.125, %v2205_v19  ;;  %v2252_v33 = vrot.slane %v2251_v49, 1  ;;  %v2276_v38 = vrot.slane %v2275_v18, 1  ;;  %v6491_v52 = vld [vmem:[#allocation6_spill] sm:$0xff] }
 0x2bb   :  { %v2300_v14 = vrot.slane %v2299_v54, 1  ;;  %v6482_v41 = vsub.f32 %v6481_v32, %v6469_v42  ;;  %v2181_v12 = vadd.f32 %v2180_v9, %v2179_v50  ;;  %v2229_v11 = vadd.f32 %v2228_v30, %v2227_v31 }
 0x2bc   :  { %v2324_v40 = vrot.slane %v2323_v59, 1  ;;  %v6484_v10 = vsub.f32 %v6483_v29, %v5588_v25  ;;  %v2253_v13 = vadd.f32 %v2252_v33, %v2251_v49  ;;  %v2277_v61 = vadd.f32 %v2276_v38, %v2275_v18 }
 0x2bd   :  { %v1765_v63 = vmul.f32 %v5716_v55, %v6482_v41  ;;  %v2301_v21 = vadd.f32 %v2300_v14, %v2299_v54  ;;  %v6486_v3 = vsub.f32 %v6485_v35, %v5631_v39  ;;  %v2376_v56 = vmul.f32 0.125, %v2181_v12  ;;  %v6492_v14 = vld [vmem:[#allocation15_spill] sm:$0xff]  ;;  %v6494_v12 = vld [vmem:[#allocation24_spill] sm:$0xff] }
 0x2be   :  { %v1769_v62 = vmul.f32 %v5724_v24, %v6484_v10  ;;  %v2325_v44 = vadd.f32 %v2324_v40, %v2323_v59  ;;  %v2384_v22 = vmul.f32 0.125, %v2229_v11  ;;  %v6488_v27 = vsub.f32 %v6487_v53, %v6474_v1 }
 0x2bf   :  { %v1773_v36 = vmul.f32 %v5776_v2, %v6486_v3  ;;  %v2388_v60 = vmul.f32 0.125, %v2253_v13  ;;  %v2392_v0 = vmul.f32 0.125, %v2277_v61  ;;  %v2396_v26 = vmul.f32 0.125, %v2301_v21 }
 0x2c0   :  { %v1777_v5 = vmul.f32 %v5783_v58, %v6488_v27  ;;  %v6490_v37 = vsub.f32 %v6489_v46, %v5670_v15  ;;  %v2400_v28 = vmul.f32 0.125, %v2325_v44  ;;  %v2580_v47 = vsel %vm2538_vm0, %v2376_v56, %v2372_v51 }
 0x2c1   :  { %v1843_v50 = vmul.f32 %v5360_v8, %v1757_v17  ;;  %v1851_v19 = vmul.f32 %v5360_v8, %v1765_v63  ;;  %v2581_v31 = vsel %vm2540_vm1, %v2380_v7, %v2580_v47  ;;  %v1855_v43 = vmul.f32 %v5360_v8, %v1769_v62 }
 0x2c2   :  { %v1781_v45 = vmul.f32 %v5787_v6, %v6490_v37  ;;  %v1859_v49 = vmul.f32 %v5360_v8, %v1773_v36  ;;  %v1863_v18 = vmul.f32 %v5360_v8, %v1777_v5  ;;  %v2582_v54 = vsel %vm2542_vm2, %v2384_v22, %v2581_v31 }
 0x2c3   :  { %v1929_v9 = vadd.f32 %v6491_v52, %v1843_v50  ;;  %v1937_v51 = vadd.f32 %v6491_v52, %v1851_v19  ;;  %v2583_v17 = vsel %vm2544_vm3, %v2388_v60, %v2582_v54  ;;  %v1941_v30 = vadd.f32 %v6491_v52, %v1855_v43 }
 0x2c4   :  { %v1867_v23 = vmul.f32 %v5360_v8, %v1781_v45  ;;  %v1945_v59 = vadd.f32 %v6491_v52, %v1859_v49  ;;  %v1949_v7 = vadd.f32 %v6491_v52, %v1863_v18  ;;  %v2584_v33 = vsel %vm2546_vm4, %v2392_v0, %v2583_v17  ;;  %v6495_v18 = vld [vmem:[#allocation28_spill] sm:$0xff] }
 0x2c5   :  { %v6493_v32 = vrot.slane %v6492_v14, 2  ;;  %v2188_v41 = vrot.slane %v1929_v9, 4  ;;  %v2585_v63 = vsel %vm2548_vm5, %v2396_v26, %v2584_v33  ;;  %v2214_v11 = vrot.slane %v6494_v12, 2  ;;  %v6497_v33 = vld [vmem:[#allocation33_spill] sm:$0xff] }
 0x2c6   :  { %v1953_v38 = vadd.f32 %v6491_v52, %v1867_v23  ;;  %v2236_v40 = vrot.slane %v1937_v51, 4  ;;  %v2260_v29 = vrot.slane %v1941_v30, 4  ;;  %v2586_v10 = vsel %vm2550_vm6, %v2400_v28, %v2585_v63  ;;  %v6499_v63 = vld [vmem:[#allocation37_spill] sm:$0xff] }
 0x2c7   :  { %v2167_v8 = vadd.f32 %v6493_v32, %v6492_v14  ;;  %v2189_v13 = vadd.f32 %v2188_v41, %v1929_v9  ;;  %v2284_v61 = vrot.slane %v1945_v59, 4  ;;  %2678 = vmatprep.mubr.f32.mxu0 %v2586_v10  ;;  %v2215_v21 = vadd.f32 %v2214_v11, %v6494_v12 }
 0x2c8   :  { %v2237_v35 = vadd.f32 %v2236_v40, %v1937_v51  ;;  %v2261_v3 = vadd.f32 %v2260_v29, %v1941_v30  ;;  %v2308_v36 = vrot.slane %v1949_v7, 4  ;;  %v2332_v53 = vrot.slane %v1953_v38, 4 }
 0x2c9   :  { %v2168_v62 = vrot.slane %v2167_v8, 1  ;;  %v2190_v56 = vrot.slane %v2189_v13, 2  ;;  %v2285_v22 = vadd.f32 %v2284_v61, %v1945_v59  ;;  %v2216_v27 = vrot.slane %v2215_v21, 1 }
 0x2ca   :  { %v2238_v5 = vrot.slane %v2237_v35, 2  ;;  %v2262_v60 = vrot.slane %v2261_v3, 2  ;;  %v2309_v0 = vadd.f32 %v2308_v36, %v1949_v7  ;;  %v2333_v37 = vadd.f32 %v2332_v53, %v1953_v38  ;;  %v6503_v36 = vld [vmem:[#allocation43_spill] sm:$0xff] }
 0x2cb   :  { %v2169_v44 = vadd.f32 %v2168_v62, %v2167_v8  ;;  %v2191_v26 = vadd.f32 %v2190_v56, %v2189_v13  ;;  %v2286_v46 = vrot.slane %v2285_v22, 2  ;;  %v2217_v28 = vadd.f32 %v2216_v27, %v2215_v21  ;;  %v6501_v62 = vld [vmem:[#allocation63_spill] sm:$0xff] }
 0x2cc   :  { %v2239_v47 = vadd.f32 %v2238_v5, %v2237_v35  ;;  %v2263_v50 = vadd.f32 %v2262_v60, %v2261_v3  ;;  %v2310_v19 = vrot.slane %v2309_v0, 2  ;;  %v2334_v49 = vrot.slane %v2333_v37, 2  ;;  %v6505_v5 = vld [vmem:[#allocation49_spill] sm:$0xff] }
 0x2cd   :  { %v2374_v45 = vmul.f32 0.125, %v2169_v44  ;;  %v2192_v31 = vrot.slane %v2191_v26, 1  ;;  %v2287_v43 = vadd.f32 %v2286_v46, %v2285_v22  ;;  %v6496_v54 = vsub.f32 %v6495_v18, %v6467_v48 }
 0x2ce   :  { %v2240_v52 = vrot.slane %v2239_v47, 1  ;;  %v2264_v9 = vrot.slane %v2263_v50, 1  ;;  %v2311_v51 = vadd.f32 %v2310_v19, %v2309_v0  ;;  %v2382_v17 = vmul.f32 0.125, %v2217_v28 }
 0x2cf   :  { %v1754_v23 = vmul.f32 %v5662_v16, %v6496_v54  ;;  %v2193_v30 = vadd.f32 %v2192_v31, %v2191_v26  ;;  %v2288_v59 = vrot.slane %v2287_v43, 1  ;;  %v2335_v7 = vadd.f32 %v2334_v49, %v2333_v37 }
 0x2d0   :  { %v6498_v38 = vsub.f32 %v6497_v33, %v6469_v42  ;;  %v2241_v32 = vadd.f32 %v2240_v52, %v2239_v47  ;;  %v2265_v8 = vadd.f32 %v2264_v9, %v2263_v50  ;;  %v2312_v41 = vrot.slane %v2311_v51, 1 }
 0x2d1   :  { %v6500_v12 = vsub.f32 %v6499_v63, %v5588_v25  ;;  %v2289_v40 = vadd.f32 %v2288_v59, %v2287_v43  ;;  %v2336_v29 = vrot.slane %v2335_v7, 1  ;;  %v2378_v10 = vmul.f32 0.125, %v2193_v30  ;;  %v6507_v59 = vld [vmem:[#allocation18_spill] sm:$0xff] }
 0x2d2   :  { %v1762_v14 = vmul.f32 %v5716_v55, %v6498_v38  ;;  %v6502_v13 = vsub.f32 %v6501_v62, %v5631_v39  ;;  %v2313_v21 = vadd.f32 %v2312_v41, %v2311_v51  ;;  %v2386_v35 = vmul.f32 0.125, %v2241_v32 }
 0x2d3   :  { %v1766_v11 = vmul.f32 %v5724_v24, %v6500_v12  ;;  %v2390_v3 = vmul.f32 0.125, %v2265_v8  ;;  %v6504_v44 = vsub.f32 %v6503_v36, %v6474_v1  ;;  %v2337_v22 = vadd.f32 %v2336_v29, %v2335_v7 }
 0x2d4   :  { %v1770_v61 = vmul.f32 %v5776_v2, %v6502_v13  ;;  %v2394_v53 = vmul.f32 0.125, %v2289_v40  ;;  %v2594_v27 = vsel %vm2538_vm0, %v2378_v10, %v2374_v45  ;;  %v6506_v60 = vsub.f32 %v6505_v5, %v5670_v15 }
 0x2d5   :  { %v1774_v56 = vmul.f32 %v5783_v58, %v6504_v44  ;;  %v2398_v26 = vmul.f32 0.125, %v2313_v21  ;;  %v2595_v46 = vsel %vm2540_vm1, %v2382_v17, %v2594_v27  ;;  %v1840_v37 = vmul.f32 %v5342_v20, %v1754_v23 }
 0x2d6   :  { %v1778_v0 = vmul.f32 %v5787_v6, %v6506_v60  ;;  %v1848_v28 = vmul.f32 %v5342_v20, %v1762_v14  ;;  %v2402_v47 = vmul.f32 0.125, %v2337_v22  ;;  %v2596_v50 = vsel %vm2542_vm2, %v2386_v35, %v2595_v46  ;;  %v6509_v14 = vld [vmem:[#allocation19_spill] sm:$0xff] }
 0x2d7   :  { %v1852_v19 = vmul.f32 %v5342_v20, %v1766_v11  ;;  %v1856_v31 = vmul.f32 %v5342_v20, %v1770_v61  ;;  %v2597_v45 = vsel %vm2544_vm3, %v2390_v3, %v2596_v50  ;;  %v1860_v43 = vmul.f32 %v5342_v20, %v1774_v56 }
 0x2d8   :  { %v1864_v49 = vmul.f32 %v5342_v20, %v1778_v0  ;;  %v1926_v18 = vadd.f32 %v5345_v34, %v1840_v37  ;;  %v2598_v54 = vsel %vm2546_vm4, %v2394_v53, %v2597_v45  ;;  %v1934_v23 = vadd.f32 %v5345_v34, %v1848_v28 }
 0x2d9   :  { %v1938_v52 = vadd.f32 %v5345_v34, %v1852_v19  ;;  %v1942_v9 = vadd.f32 %v5345_v34, %v1856_v31  ;;  %v2599_v51 = vsel %vm2548_vm5, %v2398_v26, %v2598_v54  ;;  %v1946_v17 = vadd.f32 %v5345_v34, %v1860_v43 }
 0x2da   :  { %v1950_v30 = vadd.f32 %v5345_v34, %v1864_v49  ;;  %v6508_v7 = vrot.slane %v6507_v59, 2  ;;  %v2600_v33 = vsel %vm2550_vm6, %v2402_v47, %v2599_v51  ;;  %v2170_v38 = vrot.slane %v1926_v18, 4  ;;  %v6510_v47 = vld [vmem:[#allocation60_spill] sm:$0xff] }
 0x2db   :  { %v2196_v32 = vrot.slane %v6509_v14, 2  ;;  %v2218_v8 = vrot.slane %v1934_v23, 4  ;;  %2753 = vmatprep.mubr.f32.mxu1 %v2600_v33  ;;  %v2242_v63 = vrot.slane %v1938_v52, 4  ;;  %v2266_v12 = vrot.slane %v1942_v9, 4 }
 0x2dc   :  { %v2149_v20 = vadd.f32 %v6508_v7, %v6507_v59  ;;  %v2290_v11 = vrot.slane %v1946_v17, 4  ;;  %v2171_v40 = vadd.f32 %v2170_v38, %v1926_v18  ;;  %v2314_v34 = vrot.slane %v1950_v30, 4  ;;  %v6514_v7 = vld [vmem:[#allocation34_spill] sm:$0xff] }
 0x2dd   :  { %v2197_v29 = vadd.f32 %v2196_v32, %v6509_v14  ;;  %v2219_v10 = vadd.f32 %v2218_v8, %v1934_v23  ;;  %v2243_v13 = vadd.f32 %v2242_v63, %v1938_v52  ;;  %v2267_v61 = vadd.f32 %v2266_v12, %v1942_v9  ;;  %v6512_v52 = vld [vmem:[#allocation62_spill] sm:$0xff]  ;;  %v6516_v14 = vld [vmem:[#allocation40_spill] sm:$0xff] }
 0x2de   :  { %v2150_v41 = vrot.slane %v2149_v20, 1  ;;  %v2291_v21 = vadd.f32 %v2290_v11, %v1946_v17  ;;  %v2172_v35 = vrot.slane %v2171_v40, 2  ;;  %v2315_v44 = vadd.f32 %v2314_v34, %v1950_v30 }
 0x2df   :  { %v2198_v3 = vrot.slane %v2197_v29, 1  ;;  %v2220_v36 = vrot.slane %v2219_v10, 2  ;;  %v2244_v56 = vrot.slane %v2243_v13, 2  ;;  %v2268_v22 = vrot.slane %v2267_v61, 2 }
 0x2e0   :  { %v2151_v62 = vadd.f32 %v2150_v41, %v2149_v20  ;;  %v2292_v53 = vrot.slane %v2291_v21, 2  ;;  %v2173_v5 = vadd.f32 %v2172_v35, %v2171_v40  ;;  %v2316_v26 = vrot.slane %v2315_v44, 2 }
 0x2e1   :  { %v2199_v60 = vadd.f32 %v2198_v3, %v2197_v29  ;;  %v2221_v0 = vadd.f32 %v2220_v36, %v2219_v10  ;;  %v2245_v46 = vadd.f32 %v2244_v56, %v2243_v13  ;;  %v2269_v37 = vadd.f32 %v2268_v22, %v2267_v61 }
 0x2e2   :  { %v2371_v27 = vmul.f32 0.125, %v2151_v62  ;;  %v2293_v28 = vadd.f32 %v2292_v53, %v2291_v21  ;;  %v6511_v50 = vsub.f32 %v6510_v47, %v6467_v48  ;;  %v2174_v31 = vrot.slane %v2173_v5, 1 }
 0x2e3   :  { %v2222_v45 = vrot.slane %v2221_v0, 1  ;;  %v2317_v43 = vadd.f32 %v2316_v26, %v2315_v44  ;;  %v2379_v49 = vmul.f32 0.125, %v2199_v60  ;;  %v2246_v18 = vrot.slane %v2245_v46, 1 }
 0x2e4   :  { %v1756_v19 = vmul.f32 %v5662_v16, %v6511_v50  ;;  %v2270_v54 = vrot.slane %v2269_v37, 1  ;;  %v2294_v23 = vrot.slane %v2293_v28, 1  ;;  %v6513_v9 = vsub.f32 %v6512_v52, %v6469_v42 }
 0x2e5   :  { %v2175_v17 = vadd.f32 %v2174_v31, %v2173_v5  ;;  %v2223_v30 = vadd.f32 %v2222_v45, %v2221_v0  ;;  %v2318_v59 = vrot.slane %v2317_v43, 1  ;;  %v6515_v48 = vsub.f32 %v6514_v7, %v5588_v25  ;;  %v6522_v5 = vld [vmem:[#allocation54_spill] sm:$0xff] }
 0x2e6   :  { %v1764_v51 = vmul.f32 %v5716_v55, %v6513_v9  ;;  %v2247_v20 = vadd.f32 %v2246_v18, %v2245_v46  ;;  %v2271_v33 = vadd.f32 %v2270_v54, %v2269_v37  ;;  %v2295_v38 = vadd.f32 %v2294_v23, %v2293_v28  ;;  %v6518_v55 = vld [vmem:[#allocation32_spill] sm:$0xff]  ;;  %v6524_v46 = vld [vmem:[#allocation22_spill] sm:$0xff] }
 0x2e7   :  { %v1768_v16 = vmul.f32 %v5724_v24, %v6515_v48  ;;  %v6517_v32 = vsub.f32 %v6516_v14, %v5631_v39  ;;  %v2319_v41 = vadd.f32 %v2318_v59, %v2317_v43  ;;  %v2375_v42 = vmul.f32 0.125, %v2175_v17  ;;  %v6520_v24 = vld [vmem:[#allocation42_spill] sm:$0xff] }
 0x2e8   :  { %v2383_v63 = vmul.f32 0.125, %v2223_v30  ;;  %v6519_v12 = vsub.f32 %v6518_v55, %v6474_v1  ;;  %v2387_v40 = vmul.f32 0.125, %v2247_v20  ;;  %v2391_v25 = vmul.f32 0.125, %v2271_v33 }
 0x2e9   :  { %v1772_v8 = vmul.f32 %v5776_v2, %v6517_v32  ;;  %v2395_v29 = vmul.f32 0.125, %v2295_v38  ;;  %v6521_v10 = vsub.f32 %v6520_v24, %v5670_v15  ;;  %v2399_v62 = vmul.f32 0.125, %v2319_v41 }
 0x2ea   :  { %v1776_v11 = vmul.f32 %v5783_v58, %v6519_v12  ;;  %v2573_v39 = vsel %vm2538_vm0, %v2375_v42, %v2371_v27  ;;  %v1842_v2 = vmul.f32 %v5354_v57, %v1756_v19  ;;  %v1850_v13 = vmul.f32 %v5354_v57, %v1764_v51 }
 0x2eb   :  { %v1780_v34 = vmul.f32 %v5787_v6, %v6521_v10  ;;  %v2574_v61 = vsel %vm2540_vm1, %v2379_v49, %v2573_v39  ;;  %v1854_v1 = vmul.f32 %v5354_v57, %v1768_v16  ;;  %v1858_v58 = vmul.f32 %v5354_v57, %v1772_v8 }
 0x2ec   :  { %v1862_v21 = vmul.f32 %v5354_v57, %v1776_v11  ;;  %v2575_v35 = vsel %vm2542_vm2, %v2383_v63, %v2574_v61  ;;  %v1928_v6 = vadd.f32 %v5357_v4, %v1842_v2  ;;  %v1936_v3 = vadd.f32 %v5357_v4, %v1850_v13 }
 0x2ed   :  { %v1866_v15 = vmul.f32 %v5354_v57, %v1780_v34  ;;  %v2576_v36 = vsel %vm2544_vm3, %v2387_v40, %v2575_v35  ;;  %v1940_v44 = vadd.f32 %v5357_v4, %v1854_v1  ;;  %v1944_v56 = vadd.f32 %v5357_v4, %v1858_v58 }
 0x2ee   :  { %v1948_v22 = vadd.f32 %v5357_v4, %v1862_v21  ;;  %v2577_v53 = vsel %vm2546_vm4, %v2391_v25, %v2576_v36  ;;  %v6523_v60 = vrot.slane %v6522_v5, 2  ;;  %v2182_v0 = vrot.slane %v1928_v6, 4 }
 0x2ef   :  { %v1952_v27 = vadd.f32 %v5357_v4, %v1866_v15  ;;  %v2578_v26 = vsel %vm2548_vm5, %v2395_v29, %v2577_v53  ;;  %v2208_v37 = vrot.slane %v6524_v46, 2  ;;  %v2230_v28 = vrot.slane %v1936_v3, 4 }
 0x2f0   :  { %v2161_v57 = vadd.f32 %v6523_v60, %v6522_v5  ;;  %v2254_v47 = vrot.slane %v1940_v44, 4  ;;  %v2579_v50 = vsel %vm2550_vm6, %v2399_v62, %v2578_v26  ;;  %v2183_v19 = vadd.f32 %v2182_v0, %v1928_v6 }
 0x2f1   :  { %v2278_v31 = vrot.slane %v1944_v56, 4  ;;  %2679 = vmatmul.mubr.f32.gmra.mxu0 %v2579_v50  ;;  %v2209_v45 = vadd.f32 %v2208_v37, %v6524_v46  ;;  %v2231_v43 = vadd.f32 %v2230_v28, %v1936_v3  ;;  %v2302_v49 = vrot.slane %v1948_v22, 4 }
 0x2f2   :  { %v2255_v4 = vadd.f32 %v2254_v47, %v1940_v44  ;;  %v2162_v18 = vrot.slane %v2161_v57, 1  ;;  %v2184_v54 = vrot.slane %v2183_v19, 2  ;;  %v2326_v52 = vrot.slane %v1952_v27, 4 }
 0x2f3   :  { %v2279_v23 = vadd.f32 %v2278_v31, %v1944_v56  ;;  %v2210_v9 = vrot.slane %v2209_v45, 1  ;;  %v2232_v51 = vrot.slane %v2231_v43, 2  ;;  %v2303_v30 = vadd.f32 %v2302_v49, %v1948_v22 }
 0x2f4   :  { %v2256_v17 = vrot.slane %v2255_v4, 2  ;;  %v2185_v59 = vadd.f32 %v2184_v54, %v2183_v19  ;;  %v2327_v48 = vadd.f32 %v2326_v52, %v1952_v27  ;;  %v2163_v14 = vadd.f32 %v2162_v18, %v2161_v57  ;;  %v2777_v57 = vld [vmem:[%s6097_s6] ss:$0 sm:$0xff] }
 0x2f5   :  { %v2280_v7 = vrot.slane %v2279_v23, 2  ;;  %v2211_v16 = vadd.f32 %v2210_v9, %v2209_v45  ;;  %v2233_v20 = vadd.f32 %v2232_v51, %v2231_v43  ;;  %v2304_v38 = vrot.slane %v2303_v30, 2 }
 0x2f6   :  { %v2257_v33 = vadd.f32 %v2256_v17, %v2255_v4  ;;  %v2186_v32 = vrot.slane %v2185_v59, 1  ;;  %v2328_v41 = vrot.slane %v2327_v48, 2  ;;  %v2373_v39 = vmul.f32 0.125, %v2163_v14 }
 0x2f7   :  { %v2281_v8 = vadd.f32 %v2280_v7, %v2279_v23  ;;  %v2234_v42 = vrot.slane %v2233_v20, 1  ;;  %v2305_v55 = vadd.f32 %v2304_v38, %v2303_v30  ;;  %v2381_v10 = vmul.f32 0.125, %v2211_v16 }
 0x2f8   :  { %v2258_v63 = vrot.slane %v2257_v33, 1  ;;  %v2187_v12 = vadd.f32 %v2186_v32, %v2185_v59  ;;  %v2329_v40 = vadd.f32 %v2328_v41, %v2327_v48 }
 0x2f9   :  { %v2282_v11 = vrot.slane %v2281_v8, 1  ;;  %v2235_v25 = vadd.f32 %v2234_v42, %v2233_v20  ;;  %v2306_v24 = vrot.slane %v2305_v55, 1 }
 0x2fa   :  { %v2259_v29 = vadd.f32 %v2258_v63, %v2257_v33  ;;  %v2330_v62 = vrot.slane %v2329_v40, 1  ;;  %v2377_v2 = vmul.f32 0.125, %v2187_v12 }
 0x2fb   :  { %v2283_v34 = vadd.f32 %v2282_v11, %v2281_v8  ;;  %v2307_v13 = vadd.f32 %v2306_v24, %v2305_v55  ;;  %v2385_v61 = vmul.f32 0.125, %v2235_v25 }
 0x2fc   :  { %v2389_v1 = vmul.f32 0.125, %v2259_v29  ;;  %v2331_v58 = vadd.f32 %v2330_v62, %v2329_v40  ;;  %v2587_v35 = vsel %vm2538_vm0, %v2377_v2, %v2373_v39 }
 0x2fd   :  { %v2393_v21 = vmul.f32 0.125, %v2283_v34  ;;  %v2397_v15 = vmul.f32 0.125, %v2307_v13  ;;  %v2588_v6 = vsel %vm2540_vm1, %v2381_v10, %v2587_v35 }
 0x2fe   :  { %v2401_v3 = vmul.f32 0.125, %v2331_v58  ;;  %v2589_v36 = vsel %vm2542_vm2, %v2385_v61, %v2588_v6 }
 0x2ff   :  { %v2590_v44 = vsel %vm2544_vm3, %v2389_v1, %v2589_v36 }
 0x300   :  { %v2591_v56 = vsel %vm2546_vm4, %v2393_v21, %v2590_v44 }
 0x301   :  { %v2592_v22 = vsel %vm2548_vm5, %v2397_v15, %v2591_v56 }
 0x302   :  { %v2593_v53 = vsel %vm2550_vm6, %v2401_v3, %v2592_v22 }
 0x303   :  { %2754 = vmatmul.mubr.f32.gmra.mxu1 %v2593_v53 }
 0x35e   :  { %v2810_v27 = vpop.f32.mrf.mxu0 }
 0x360   :  { %v2811_v5 = vpop.f32.mrf.mxu0 }
 0x361   :  { %v2812_v60 = vadd.f32 %v2811_v5, %v2810_v27 }
 0x363   :  { %v2676_v26 = vadd.f32 %v2812_v60, %v2777_v57 }
 0x372   :  { %v2848_v0 = vpop.f32.mrf.mxu1 }
 0x374   :  { %v2849_v46 = vpop.f32.mrf.mxu1 }
 0x375   :  { %v2850_v37 = vadd.f32 %v2849_v46, %v2848_v0 }
 0x377   :  { %v2751_v28 = vadd.f32 %v2850_v37, %v2676_v26 }
 0x379   :  { %2759 = vst [vmem:[#allocation2] sm:$0xff] %v2751_v28 }
 0x3b1   :  { %v2813_v47 = vpop.f32.mrf.mxu0 }
 0x3b3   :  { %v2814_v50 = vpop.f32.mrf.mxu0 }
 0x3b4   :  { %v2815_v19 = vadd.f32 %v2814_v50, %v2813_v47 }
 0x3b6   :  { %v2681_v45 = vadd.f32 %v2815_v19, %v2777_v57 }
 0x3c3   :  { %v2851_v31 = vpop.f32.mrf.mxu1 }
 0x3c5   :  { %v2852_v43 = vpop.f32.mrf.mxu1 }
 0x3c6   :  { %v2853_v4 = vadd.f32 %v2852_v43, %v2851_v31 }
 0x3c8   :  { %v2756_v49 = vadd.f32 %v2853_v4, %v2681_v45 }
 0x3ca   :  { %2760 = vst [vmem:[#allocation2 + $0x8] sm:$0xff] %v2756_v49 }
 0x3cb   :  { %3028 = shalt.err (!%p3025_p4)
}
 0x3cc   :  { %s3040_s6 = smov 128   ;;  %s3041_s23 = smov 8  }
 0x3cd   :  { %2772 = dma.vmem_to_hbm [thread:$0]  %s2767_s21, 256, %s6098_s7, [#allocation3], %s3040_s6, %s3040_s6, %s3041_s23  }
 0x3ce   :  { %3037 = dma.done.wait [#allocation3], 256  }
 0x3cf   :  { %3038 = vsyncadd [#allocation3], 4294967040 }
 0x3d0   :  { %2776 = vsyncpa [#allocation3], 1 }

</bundles_post_ra>
